<compile_context>
chip_gen: v7x
topology: tpu7x:2x2x1
jax: 0.10.0
libtpu: 0.0.40
codegen_flags: <defaults>
</compile_context>

<pallas_src>
import jax
import jax.numpy as jnp
from jax.experimental import pallas as pl
from jax.experimental.pallas import tpu as pltpu


def _conv_block_kernel(x_ref, w1_ref, w2_ref, s1_ref, b1_ref, s2_ref, b2_ref,
                       o_ref, y1_pad):
    # x_ref : (1, H+2, W+2, Cin)  f32  halo-padded NHWC input (one image)
    # w1_ref: (9*Cin,  Cout)      f32  conv1 weights, im2col layout
    # w2_ref: (9*Cout, Cout)      f32  conv2 weights, im2col layout
    # s1/b1 : (1, Cout)           f32  fused bias+BN scale/shift, stage 1
    # s2/b2 : (Cout, 1)           f32  fused bias+BN scale/shift, stage 2
    # o_ref : (1, Cout, H*W)      f32  NCHW-ordered output (lane-dense)
    # y1_pad: (H+2, W+2, Cout)    f32  VMEM scratch: padded stage-1 activation
    H = x_ref.shape[1] - 2
    W = x_ref.shape[2] - 2
    Cin = x_ref.shape[3]
    Cout = o_ref.shape[1]

    # ---- stage 1: 3x3 conv as ONE im2col matmul (K = 9*Cin) on the MXU ----
    taps1 = [x_ref[0, dy:dy + H, dx:dx + W, :].reshape(H * W, Cin)
             for dy in range(3) for dx in range(3)]
    p1 = jnp.concatenate(taps1, axis=1)                        # (H*W, 9*Cin)
    acc1 = jnp.dot(p1, w1_ref[...], preferred_element_type=jnp.float32)

    y1 = jnp.maximum(acc1 * s1_ref[...] + b1_ref[...], 0.0)    # bias+BN+ReLU

    # Stage-1 activation stays entirely in VMEM (zero halo for pad=1 conv2).
    y1_pad[...] = jnp.zeros_like(y1_pad)
    y1_pad[1:H + 1, 1:W + 1, :] = y1.reshape(H, W, Cout).astype(y1_pad.dtype)

    # ---- stage 2: 3x3 conv as ONE im2col matmul (K = 9*Cout) ----
    taps2 = [y1_pad[dy:dy + H, dx:dx + W, :].reshape(H * W, Cout)
             for dy in range(3) for dx in range(3)]
    p2 = jnp.concatenate(taps2, axis=1)                        # (H*W, 9*Cout)
    acc2 = jnp.dot(p2, w2_ref[...], preferred_element_type=jnp.float32)

    # Transpose the small (H*W, Cout) result to (Cout, H*W): lane-dense
    # epilogue + unmasked stores, and free NCHW reshape in the wrapper.
    z = acc2.T
    z = jnp.maximum(z * s2_ref[...] + b2_ref[...], 0.0)
    o_ref[0] = z.astype(o_ref.dtype)


def conv_block_forward(x_nchw,
                       w1_oihw, b1, g1, be1, m1, v1,
                       w2_oihw, b2, g2, be2, m2, v2,
                       eps=1e-5):
    """Pallas implementation of conv_block.forward. Input/output are NCHW f32."""
    N, Cin, H, W = x_nchw.shape
    Cout = w1_oihw.shape[0]

    # Layout plumbing in the wrapper: NHWC + 1-px halo, f32 matmul operands.
    x = jnp.transpose(x_nchw, (0, 2, 3, 1))
    x = jnp.pad(x, ((0, 0), (1, 1), (1, 1), (0, 0))).astype(jnp.float32)

    # OIHW -> HWIO -> (9*C, Cout); row order (dy, dx, cin) matches kernel taps.
    w1m = jnp.transpose(w1_oihw, (2, 3, 1, 0)).reshape(9 * Cin, Cout)
    w2m = jnp.transpose(w2_oihw, (2, 3, 1, 0)).reshape(9 * Cout, Cout)
    w1m = w1m.astype(jnp.float32)
    w2m = w2m.astype(jnp.float32)

    # Fold conv bias + eval-mode BatchNorm into per-channel scale/shift (f32).
    s1 = g1 / jnp.sqrt(v1 + eps)
    sh1 = be1 + (b1 - m1) * s1
    s2 = g2 / jnp.sqrt(v2 + eps)
    sh2 = be2 + (b2 - m2) * s2

    out = pl.pallas_call(
        _conv_block_kernel,
        out_shape=jax.ShapeDtypeStruct((N, Cout, H * W), jnp.float32),
        grid_spec=pltpu.PrefetchScalarGridSpec(
            num_scalar_prefetch=0,
            grid=(N,),
            in_specs=[
                pl.BlockSpec((1, H + 2, W + 2, Cin), lambda n: (n, 0, 0, 0)),
                pl.BlockSpec((9 * Cin, Cout), lambda n: (0, 0)),
                pl.BlockSpec((9 * Cout, Cout), lambda n: (0, 0)),
                pl.BlockSpec((1, Cout), lambda n: (0, 0)),
                pl.BlockSpec((1, Cout), lambda n: (0, 0)),
                pl.BlockSpec((Cout, 1), lambda n: (0, 0)),
                pl.BlockSpec((Cout, 1), lambda n: (0, 0)),
            ],
            out_specs=pl.BlockSpec((1, Cout, H * W), lambda n: (n, 0, 0)),
            scratch_shapes=[pltpu.VMEM((H + 2, W + 2, Cout), jnp.float32)],
        ),
        compiler_params=pltpu.CompilerParams(
            dimension_semantics=("parallel",),
        ),
    )(
        x, w1m, w2m,
        s1.reshape(1, Cout).astype(jnp.float32),
        sh1.reshape(1, Cout).astype(jnp.float32),
        s2.reshape(Cout, 1).astype(jnp.float32),
        sh2.reshape(Cout, 1).astype(jnp.float32),
    )

    # Output is already NCHW-ordered over a flat H*W axis; reshape is free.
    return out.reshape(N, Cout, H, W)


def _reference(x, w1, b1, g1, be1, m1, v1, w2, b2, g2, be2, m2, v2, eps=1e-5):
    """Pure-JAX f32 reference for correctness check (eval-mode BN)."""
    def stage(xx, w, b, g, be, m, v):
        y = jax.lax.conv_general_dilated(
            xx, w, window_strides=(1, 1), padding=((1, 1), (1, 1)),
            dimension_numbers=("NCHW", "OIHW", "NCHW"))
        y = y + b[None, :, None, None]
        y = (y - m[None, :, None, None]) / jnp.sqrt(v[None, :, None, None] + eps)
        y = y * g[None, :, None, None] + be[None, :, None, None]
        return jnp.maximum(y, 0.0)

    y = stage(x, w1, b1, g1, be1, m1, v1)
    return stage(y, w2, b2, g2, be2, m2, v2)


if __name__ == "__main__":
    key = jax.random.PRNGKey(0)
    ks = jax.random.split(key, 13)

    N, Cin, Cout, H, W = 2, 4, 8, 16, 16

    x = jax.random.normal(ks[0], (N, Cin, H, W), dtype=jnp.float32)

    # Synthetic params: nn.Conv2d(4,8,3)+BN(8) then nn.Conv2d(8,8,3)+BN(8).
    w1 = 0.1 * jax.random.normal(ks[1], (Cout, Cin, 3, 3), dtype=jnp.float32)
    b1 = 0.1 * jax.random.normal(ks[2], (Cout,), dtype=jnp.float32)
    g1 = 1.0 + 0.1 * jax.random.normal(ks[3], (Cout,), dtype=jnp.float32)
    be1 = 0.1 * jax.random.normal(ks[4], (Cout,), dtype=jnp.float32)
    m1 = 0.1 * jax.random.normal(ks[5], (Cout,), dtype=jnp.float32)
    v1 = jnp.abs(1.0 + 0.1 * jax.random.normal(ks[6], (Cout,), dtype=jnp.float32))

    w2 = 0.1 * jax.random.normal(ks[7], (Cout, Cout, 3, 3), dtype=jnp.float32)
    b2 = 0.1 * jax.random.normal(ks[8], (Cout,), dtype=jnp.float32)
    g2 = 1.0 + 0.1 * jax.random.normal(ks[9], (Cout,), dtype=jnp.float32)
    be2 = 0.1 * jax.random.normal(ks[10], (Cout,), dtype=jnp.float32)
    m2 = 0.1 * jax.random.normal(ks[11], (Cout,), dtype=jnp.float32)
    v2 = jnp.abs(1.0 + 0.1 * jax.random.normal(ks[12], (Cout,), dtype=jnp.float32))

    out = conv_block_forward(x, w1, b1, g1, be1, m1, v1,
                             w2, b2, g2, be2, m2, v2)
    out = jax.block_until_ready(out)

    ref = _reference(x, w1, b1, g1, be1, m1, v1, w2, b2, g2, be2, m2, v2)
    assert out.shape == (N, Cout, H, W), out.shape
    max_err = float(jnp.max(jnp.abs(out - ref)))
    # Pure f32 path now -> tight tolerance (only accumulation-order differences).
    assert jnp.allclose(out, ref, rtol=1e-3, atol=1e-3), max_err

    print("KERNEL_OK")
</pallas_src>

<mosaic_0001>
module attributes {stable_mosaic.version = 11 : i64} {
  func.func @_conv_block_kernel(%arg0: i32, %arg1: memref<1x18x18x4xf32, #tpu.memory_space<vmem>>, %arg2: memref<36x8xf32, #tpu.memory_space<vmem>>, %arg3: memref<72x8xf32, #tpu.memory_space<vmem>>, %arg4: memref<1x8xf32, #tpu.memory_space<vmem>>, %arg5: memref<1x8xf32, #tpu.memory_space<vmem>>, %arg6: memref<8x1xf32, #tpu.memory_space<vmem>>, %arg7: memref<8x1xf32, #tpu.memory_space<vmem>>, %arg8: memref<1x8x256xf32, #tpu.memory_space<vmem>>, %arg9: memref<18x18x8xf32, #tpu.memory_space<vmem>>) attributes {dimension_semantics = [#tpu.dimension_semantics<parallel>], iteration_bounds = array<i64: 2>, scalar_prefetch = 0 : i64, scratch_operands = 1 : i64, tpu.core_type = #tpu.core_type<tc>, window_params = [{transform_indices = @transform_0, window_bounds = array<i64: 1, 18, 18, 4>}, {pipeline_mode = #tpu.pipeline_mode<synchronous>, transform_indices = @transform_1, window_bounds = array<i64: 36, 8>}, {pipeline_mode = #tpu.pipeline_mode<synchronous>, transform_indices = @transform_2, window_bounds = array<i64: 72, 8>}, {pipeline_mode = #tpu.pipeline_mode<synchronous>, transform_indices = @transform_3, window_bounds = array<i64: 1, 8>}, {pipeline_mode = #tpu.pipeline_mode<synchronous>, transform_indices = @transform_4, window_bounds = array<i64: 1, 8>}, {pipeline_mode = #tpu.pipeline_mode<synchronous>, transform_indices = @transform_5, window_bounds = array<i64: 8, 1>}, {pipeline_mode = #tpu.pipeline_mode<synchronous>, transform_indices = @transform_6, window_bounds = array<i64: 8, 1>}, {transform_indices = @transform_7, window_bounds = array<i64: 1, 8, 256>}]} {
    %c0 = arith.constant 0 : index
    %c0_0 = arith.constant 0 : index
    %c0_1 = arith.constant 0 : index
    %c0_2 = arith.constant 0 : index
    %0 = vector.load %arg1[%c0, %c0_0, %c0_1, %c0_2] : memref<1x18x18x4xf32, #tpu.memory_space<vmem>>, vector<1x16x16x4xf32>
    %1 = vector.shape_cast %0 : vector<1x16x16x4xf32> to vector<16x16x4xf32>
    %2 = vector.shape_cast %1 : vector<16x16x4xf32> to vector<256x4xf32>
    %c0_3 = arith.constant 0 : index
    %c0_4 = arith.constant 0 : index
    %c1 = arith.constant 1 : index
    %c0_5 = arith.constant 0 : index
    %3 = vector.load %arg1[%c0_3, %c0_4, %c1, %c0_5] : memref<1x18x18x4xf32, #tpu.memory_space<vmem>>, vector<1x16x16x4xf32>
    %4 = vector.shape_cast %3 : vector<1x16x16x4xf32> to vector<16x16x4xf32>
    %5 = vector.shape_cast %4 : vector<16x16x4xf32> to vector<256x4xf32>
    %c0_6 = arith.constant 0 : index
    %c0_7 = arith.constant 0 : index
    %c2 = arith.constant 2 : index
    %c0_8 = arith.constant 0 : index
    %6 = vector.load %arg1[%c0_6, %c0_7, %c2, %c0_8] : memref<1x18x18x4xf32, #tpu.memory_space<vmem>>, vector<1x16x16x4xf32>
    %7 = vector.shape_cast %6 : vector<1x16x16x4xf32> to vector<16x16x4xf32>
    %8 = vector.shape_cast %7 : vector<16x16x4xf32> to vector<256x4xf32>
    %c0_9 = arith.constant 0 : index
    %c1_10 = arith.constant 1 : index
    %c0_11 = arith.constant 0 : index
    %c0_12 = arith.constant 0 : index
    %9 = vector.load %arg1[%c0_9, %c1_10, %c0_11, %c0_12] : memref<1x18x18x4xf32, #tpu.memory_space<vmem>>, vector<1x16x16x4xf32>
    %10 = vector.shape_cast %9 : vector<1x16x16x4xf32> to vector<16x16x4xf32>
    %11 = vector.shape_cast %10 : vector<16x16x4xf32> to vector<256x4xf32>
    %c0_13 = arith.constant 0 : index
    %c1_14 = arith.constant 1 : index
    %c1_15 = arith.constant 1 : index
    %c0_16 = arith.constant 0 : index
    %12 = vector.load %arg1[%c0_13, %c1_14, %c1_15, %c0_16] : memref<1x18x18x4xf32, #tpu.memory_space<vmem>>, vector<1x16x16x4xf32>
    %13 = vector.shape_cast %12 : vector<1x16x16x4xf32> to vector<16x16x4xf32>
    %14 = vector.shape_cast %13 : vector<16x16x4xf32> to vector<256x4xf32>
    %c0_17 = arith.constant 0 : index
    %c1_18 = arith.constant 1 : index
    %c2_19 = arith.constant 2 : index
    %c0_20 = arith.constant 0 : index
    %15 = vector.load %arg1[%c0_17, %c1_18, %c2_19, %c0_20] : memref<1x18x18x4xf32, #tpu.memory_space<vmem>>, vector<1x16x16x4xf32>
    %16 = vector.shape_cast %15 : vector<1x16x16x4xf32> to vector<16x16x4xf32>
    %17 = vector.shape_cast %16 : vector<16x16x4xf32> to vector<256x4xf32>
    %c0_21 = arith.constant 0 : index
    %c2_22 = arith.constant 2 : index
    %c0_23 = arith.constant 0 : index
    %c0_24 = arith.constant 0 : index
    %18 = vector.load %arg1[%c0_21, %c2_22, %c0_23, %c0_24] : memref<1x18x18x4xf32, #tpu.memory_space<vmem>>, vector<1x16x16x4xf32>
    %19 = vector.shape_cast %18 : vector<1x16x16x4xf32> to vector<16x16x4xf32>
    %20 = vector.shape_cast %19 : vector<16x16x4xf32> to vector<256x4xf32>
    %c0_25 = arith.constant 0 : index
    %c2_26 = arith.constant 2 : index
    %c1_27 = arith.constant 1 : index
    %c0_28 = arith.constant 0 : index
    %21 = vector.load %arg1[%c0_25, %c2_26, %c1_27, %c0_28] : memref<1x18x18x4xf32, #tpu.memory_space<vmem>>, vector<1x16x16x4xf32>
    %22 = vector.shape_cast %21 : vector<1x16x16x4xf32> to vector<16x16x4xf32>
    %23 = vector.shape_cast %22 : vector<16x16x4xf32> to vector<256x4xf32>
    %c0_29 = arith.constant 0 : index
    %c2_30 = arith.constant 2 : index
    %c2_31 = arith.constant 2 : index
    %c0_32 = arith.constant 0 : index
    %24 = vector.load %arg1[%c0_29, %c2_30, %c2_31, %c0_32] : memref<1x18x18x4xf32, #tpu.memory_space<vmem>>, vector<1x16x16x4xf32>
    %25 = vector.shape_cast %24 : vector<1x16x16x4xf32> to vector<16x16x4xf32>
    %26 = vector.shape_cast %25 : vector<16x16x4xf32> to vector<256x4xf32>
    %27 = tpu.concatenate %2, %5, %8, %11, %14, %17, %20, %23, %26 in 1 : vector<256x4xf32>, vector<256x4xf32>, vector<256x4xf32>, vector<256x4xf32>, vector<256x4xf32>, vector<256x4xf32>, vector<256x4xf32>, vector<256x4xf32>, vector<256x4xf32> -> vector<256x36xf32>
    %c0_33 = arith.constant 0 : index
    %c0_34 = arith.constant 0 : index
    %28 = vector.load %arg2[%c0_33, %c0_34] : memref<36x8xf32, #tpu.memory_space<vmem>>, vector<36x8xf32>
    %cst = arith.constant dense<0.000000e+00> : vector<256x8xf32>
    %29 = tpu.matmul %27, %28, %cst {dimension_numbers = #tpu.dot_dimension_numbers<[1], [0], [0], [1], [0, 0, 1, 1], [], []>} : vector<256x36xf32>, vector<36x8xf32>, vector<256x8xf32> -> vector<256x8xf32>
    %c0_35 = arith.constant 0 : index
    %c0_36 = arith.constant 0 : index
    %30 = vector.load %arg4[%c0_35, %c0_36] : memref<1x8xf32, #tpu.memory_space<vmem>>, vector<1x8xf32>
    %31 = vector.broadcast %30 : vector<1x8xf32> to vector<256x8xf32>
    %32 = arith.mulf %29, %31 : vector<256x8xf32>
    %c0_37 = arith.constant 0 : index
    %c0_38 = arith.constant 0 : index
    %33 = vector.load %arg5[%c0_37, %c0_38] : memref<1x8xf32, #tpu.memory_space<vmem>>, vector<1x8xf32>
    %34 = vector.broadcast %33 : vector<1x8xf32> to vector<256x8xf32>
    %35 = arith.addf %32, %34 : vector<256x8xf32>
    %cst_39 = arith.constant 0.000000e+00 : f32
    %36 = vector.broadcast %cst_39 : f32 to vector<256x8xf32>
    %37 = arith.maximumf %35, %36 : vector<256x8xf32>
    %cst_40 = arith.constant 0.000000e+00 : f32
    %38 = vector.broadcast %cst_40 : f32 to vector<18x18x8xf32>
    %c0_41 = arith.constant 0 : index
    %c0_42 = arith.constant 0 : index
    %c0_43 = arith.constant 0 : index
    %39 = vector.load %arg9[%c0_41, %c0_42, %c0_43] : memref<18x18x8xf32, #tpu.memory_space<vmem>>, vector<18x18x8xf32>
    tpu.vector_store %arg9[%c0_41, %c0_42, %c0_43], %38 {strides = array<i32>} : memref<18x18x8xf32, #tpu.memory_space<vmem>>, vector<18x18x8xf32>,
    %40 = vector.shape_cast %37 : vector<256x8xf32> to vector<16x16x8xf32>
    %c1_44 = arith.constant 1 : index
    %c1_45 = arith.constant 1 : index
    %c0_46 = arith.constant 0 : index
    %41 = vector.load %arg9[%c1_44, %c1_45, %c0_46] : memref<18x18x8xf32, #tpu.memory_space<vmem>>, vector<16x16x8xf32>
    tpu.vector_store %arg9[%c1_44, %c1_45, %c0_46], %40 {strides = array<i32>} : memref<18x18x8xf32, #tpu.memory_space<vmem>>, vector<16x16x8xf32>,
    %c0_47 = arith.constant 0 : index
    %c0_48 = arith.constant 0 : index
    %c0_49 = arith.constant 0 : index
    %42 = vector.load %arg9[%c0_47, %c0_48, %c0_49] : memref<18x18x8xf32, #tpu.memory_space<vmem>>, vector<16x16x8xf32>
    %43 = vector.shape_cast %42 : vector<16x16x8xf32> to vector<256x8xf32>
    %c0_50 = arith.constant 0 : index
    %c1_51 = arith.constant 1 : index
    %c0_52 = arith.constant 0 : index
    %44 = vector.load %arg9[%c0_50, %c1_51, %c0_52] : memref<18x18x8xf32, #tpu.memory_space<vmem>>, vector<16x16x8xf32>
    %45 = vector.shape_cast %44 : vector<16x16x8xf32> to vector<256x8xf32>
    %c0_53 = arith.constant 0 : index
    %c2_54 = arith.constant 2 : index
    %c0_55 = arith.constant 0 : index
    %46 = vector.load %arg9[%c0_53, %c2_54, %c0_55] : memref<18x18x8xf32, #tpu.memory_space<vmem>>, vector<16x16x8xf32>
    %47 = vector.shape_cast %46 : vector<16x16x8xf32> to vector<256x8xf32>
    %c1_56 = arith.constant 1 : index
    %c0_57 = arith.constant 0 : index
    %c0_58 = arith.constant 0 : index
    %48 = vector.load %arg9[%c1_56, %c0_57, %c0_58] : memref<18x18x8xf32, #tpu.memory_space<vmem>>, vector<16x16x8xf32>
    %49 = vector.shape_cast %48 : vector<16x16x8xf32> to vector<256x8xf32>
    %c1_59 = arith.constant 1 : index
    %c1_60 = arith.constant 1 : index
    %c0_61 = arith.constant 0 : index
    %50 = vector.load %arg9[%c1_59, %c1_60, %c0_61] : memref<18x18x8xf32, #tpu.memory_space<vmem>>, vector<16x16x8xf32>
    %51 = vector.shape_cast %50 : vector<16x16x8xf32> to vector<256x8xf32>
    %c1_62 = arith.constant 1 : index
    %c2_63 = arith.constant 2 : index
    %c0_64 = arith.constant 0 : index
    %52 = vector.load %arg9[%c1_62, %c2_63, %c0_64] : memref<18x18x8xf32, #tpu.memory_space<vmem>>, vector<16x16x8xf32>
    %53 = vector.shape_cast %52 : vector<16x16x8xf32> to vector<256x8xf32>
    %c2_65 = arith.constant 2 : index
    %c0_66 = arith.constant 0 : index
    %c0_67 = arith.constant 0 : index
    %54 = vector.load %arg9[%c2_65, %c0_66, %c0_67] : memref<18x18x8xf32, #tpu.memory_space<vmem>>, vector<16x16x8xf32>
    %55 = vector.shape_cast %54 : vector<16x16x8xf32> to vector<256x8xf32>
    %c2_68 = arith.constant 2 : index
    %c1_69 = arith.constant 1 : index
    %c0_70 = arith.constant 0 : index
    %56 = vector.load %arg9[%c2_68, %c1_69, %c0_70] : memref<18x18x8xf32, #tpu.memory_space<vmem>>, vector<16x16x8xf32>
    %57 = vector.shape_cast %56 : vector<16x16x8xf32> to vector<256x8xf32>
    %c2_71 = arith.constant 2 : index
    %c2_72 = arith.constant 2 : index
    %c0_73 = arith.constant 0 : index
    %58 = vector.load %arg9[%c2_71, %c2_72, %c0_73] : memref<18x18x8xf32, #tpu.memory_space<vmem>>, vector<16x16x8xf32>
    %59 = vector.shape_cast %58 : vector<16x16x8xf32> to vector<256x8xf32>
    %60 = tpu.concatenate %43, %45, %47, %49, %51, %53, %55, %57, %59 in 1 : vector<256x8xf32>, vector<256x8xf32>, vector<256x8xf32>, vector<256x8xf32>, vector<256x8xf32>, vector<256x8xf32>, vector<256x8xf32>, vector<256x8xf32>, vector<256x8xf32> -> vector<256x72xf32>
    %c0_74 = arith.constant 0 : index
    %c0_75 = arith.constant 0 : index
    %61 = vector.load %arg3[%c0_74, %c0_75] : memref<72x8xf32, #tpu.memory_space<vmem>>, vector<72x8xf32>
    %cst_76 = arith.constant dense<0.000000e+00> : vector<256x8xf32>
    %62 = tpu.matmul %60, %61, %cst_76 {dimension_numbers = #tpu.dot_dimension_numbers<[1], [0], [0], [1], [0, 0, 1, 1], [], []>} : vector<256x72xf32>, vector<72x8xf32>, vector<256x8xf32> -> vector<256x8xf32>
    %63 = tpu.transpose %62, [1, 0] : vector<256x8xf32> -> vector<8x256xf32>
    %c0_77 = arith.constant 0 : index
    %c0_78 = arith.constant 0 : index
    %64 = vector.load %arg6[%c0_77, %c0_78] : memref<8x1xf32, #tpu.memory_space<vmem>>, vector<8x1xf32>
    %65 = vector.broadcast %64 : vector<8x1xf32> to vector<8x256xf32>
    %66 = arith.mulf %63, %65 : vector<8x256xf32>
    %c0_79 = arith.constant 0 : index
    %c0_80 = arith.constant 0 : index
    %67 = vector.load %arg7[%c0_79, %c0_80] : memref<8x1xf32, #tpu.memory_space<vmem>>, vector<8x1xf32>
    %68 = vector.broadcast %67 : vector<8x1xf32> to vector<8x256xf32>
    %69 = arith.addf %66, %68 : vector<8x256xf32>
    %cst_81 = arith.constant 0.000000e+00 : f32
    %70 = vector.broadcast %cst_81 : f32 to vector<8x256xf32>
    %71 = arith.maximumf %69, %70 : vector<8x256xf32>
    %c0_82 = arith.constant 0 : index
    %c0_83 = arith.constant 0 : index
    %c0_84 = arith.constant 0 : index
    %72 = vector.load %arg8[%c0_82, %c0_83, %c0_84] : memref<1x8x256xf32, #tpu.memory_space<vmem>>, vector<1x8x256xf32>
    %73 = vector.shape_cast %72 : vector<1x8x256xf32> to vector<8x256xf32>
    %74 = vector.shape_cast %71 : vector<8x256xf32> to vector<1x8x256xf32>
    tpu.vector_store %arg8[%c0_82, %c0_83, %c0_84], %74 {strides = array<i32>} : memref<1x8x256xf32, #tpu.memory_space<vmem>>, vector<1x8x256xf32>,
    return
  }
  func.func @transform_0(%arg0: i32) -> (i32, i32, i32, i32) {
    %c0_i32 = arith.constant 0 : i32
    %c0_i32_0 = arith.constant 0 : i32
    %c0_i32_1 = arith.constant 0 : i32
    %c0_i32_2 = arith.constant 0 : i32
    return %arg0, %c0_i32, %c0_i32_0, %c0_i32_1 : i32, i32, i32, i32
  }
  func.func @transform_1(%arg0: i32) -> (i32, i32) {
    %c0_i32 = arith.constant 0 : i32
    %c0_i32_0 = arith.constant 0 : i32
    %c0_i32_1 = arith.constant 0 : i32
    return %c0_i32, %c0_i32_0 : i32, i32
  }
  func.func @transform_2(%arg0: i32) -> (i32, i32) {
    %c0_i32 = arith.constant 0 : i32
    %c0_i32_0 = arith.constant 0 : i32
    %c0_i32_1 = arith.constant 0 : i32
    return %c0_i32, %c0_i32_0 : i32, i32
  }
  func.func @transform_3(%arg0: i32) -> (i32, i32) {
    %c0_i32 = arith.constant 0 : i32
    %c0_i32_0 = arith.constant 0 : i32
    %c0_i32_1 = arith.constant 0 : i32
    return %c0_i32, %c0_i32_0 : i32, i32
  }
  func.func @transform_4(%arg0: i32) -> (i32, i32) {
    %c0_i32 = arith.constant 0 : i32
    %c0_i32_0 = arith.constant 0 : i32
    %c0_i32_1 = arith.constant 0 : i32
    return %c0_i32, %c0_i32_0 : i32, i32
  }
  func.func @transform_5(%arg0: i32) -> (i32, i32) {
    %c0_i32 = arith.constant 0 : i32
    %c0_i32_0 = arith.constant 0 : i32
    %c0_i32_1 = arith.constant 0 : i32
    return %c0_i32, %c0_i32_0 : i32, i32
  }
  func.func @transform_6(%arg0: i32) -> (i32, i32) {
    %c0_i32 = arith.constant 0 : i32
    %c0_i32_0 = arith.constant 0 : i32
    %c0_i32_1 = arith.constant 0 : i32
    return %c0_i32, %c0_i32_0 : i32, i32
  }
  func.func @transform_7(%arg0: i32) -> (i32, i32, i32) {
    %c0_i32 = arith.constant 0 : i32
    %c0_i32_0 = arith.constant 0 : i32
    %c0_i32_1 = arith.constant 0 : i32
    return %arg0, %c0_i32, %c0_i32_0 : i32, i32, i32
  }
}

</mosaic_0001>

<bundles_post_ra>
// kernel: tpu_custom_call.1
= control target key start
LH: loop header
LB: loop body
LE: loop exit
PB: predicated region body
PF: predicated region fallthrough
CT: control target
= control target key end

     0   :  { %12 = vsyncpa [#allocation4], 0  ;;  %s8456_s0 = inlined_call_operand.vmem [shape: f32[2,18,18,4], index: 0, kind: input, shape index: {}]   ;;  %s8457_s1 = inlined_call_operand.vmem [shape: f32[36,8], index: 1, kind: input, shape index: {}]   ;;  %s8458_s2 = inlined_call_operand.vmem [shape: f32[72,8], index: 2, kind: input, shape index: {}]   ;;  %s8459_s3 = inlined_call_operand.vmem [shape: f32[1,8], index: 3, kind: input, shape index: {}]   ;;  %s8460_s4 = inlined_call_operand.vmem [shape: f32[1,8], index: 4, kind: input, shape index: {}]   ;;  %s8461_s5 = inlined_call_operand.vmem [shape: f32[8,1], index: 5, kind: input, shape index: {}]   ;;  %s8462_s6 = inlined_call_operand.vmem [shape: f32[8,1], index: 6, kind: input, shape index: {}]   ;;  %s8463_s7 = inlined_call_operand.hbm [shape: f32[2,8,256], index: 7, kind: output, shape index: {}]  }
   0x1   :  { %14 = vsyncpa [#allocation4 + $0x1], 0  ;;  %s5176_s24 = smov 0   ;;  %s5178_s25 = smov 0  }
   0x2   :  { %s5180_s26 = smov 0   ;;  %s5182_s27 = smov 0  }
   0x3 LB: > { %s5197_s28 = sadd.s32 4294967295, %s5119_s27   ;;  %s4446_s29 = sadd.s32 4294967294, %s5119_s27   ;;  %s5119_s27 = sphi %s5182_s27, %s9079_s27   ;;  %s5115_s26 = sphi %s5180_s26, %s9078_s26   ;;  %s5111_s25 = sphi %s5178_s25, %s9077_s25   ;;  %s5107_s24 = sphi %s5176_s24, %s9076_s24  }
   0x4   : > { %s5201_s30 = sadd.s32 1, %s5119_s27   ;;  %s179_s8 = sadd.s32 1, %s5115_s26 }
   0x5   : > { %s176_s9 = ssub.s32 %s5119_s27, %s5201_s30  ;;  %p189_p0 = scmp.ne.s32.totalorder %s5115_s26, %s5111_s25 }
   0x6   : > { %p177_p1 = scmp.eq.s32.totalorder %s176_s9, 0  ;;  %p190_p2 = scmp.eq.s32.totalorder %s5197_s28, 1 }
   0x7   : > { %p195_p3 = scmp.ne.s32.totalorder %s5111_s25, %s5107_s24  ;;  %p196_p4 = scmp.eq.s32.totalorder %s4446_s29, 1 }
   0x8   : > { %s5212_s10 = scalar_select %p177_p1, %s5115_s26, %s179_s8  }
   0x9   : > { %p5214_p5 = por %p190_p2, %p189_p0  ;;  %p5218_p6 = por %p196_p4, %p195_p3 }
   0xa   : > { %p4449_p7 = scmp.ge.s32.totalorder %s5119_s27, 1  ;;  %p240_p8 = scmp.lt.s32.totalorder %s5119_s27, 3 }
   0xc   : > { %p241_p9 = pnand %p4449_p7, %p240_p8 }
   0xe   : > { %244 = sbr.rel (%p241_p9) target bundleno = 1753 (0x6d9), region = 48 }
  0x15   : > { %p272_p10 = scmp.lt.s32.totalorder %s5197_s28, 1  ;;  %s5121_s18 = smov 4   ;;  %vm1957_vm0 = vcmask 1043456   ;;  %vm1591_vm1 = vcmask 31744   ;;  %vm1624_vm2 = vcmask 64512   ;;  %vm1657_vm3 = vcmask 97280  }
  0x16   : > { %s5122_s19 = smov 8   ;;  %s5123_s20 = smov 12   ;;  %vm1690_vm4 = vcmask 130048   ;;  %vm1723_vm5 = vcmask 162816   ;;  %vm1756_vm6 = vcmask 195584   ;;  %vm1789_vm7 = vcmask 228352  }
  0x17   : > { %s273_s13 = scalar_select %p272_p10, %s5197_s28, 1  ;;  %vm1822_vm8 = vcmask 261120   ;;  %vm1860_vm9 = vcmask 293888   ;;  %vm2298_vm10 = vcmask 58368   ;;  %vm3825_vm11 = vcmask 326656  }
  0x18   : > { %s5124_s21 = smov 16   ;;  %s5125_s22 = smov 20   ;;  %vm3858_vm12 = vcmask 392192   ;;  %vm3891_vm13 = vcmask 457728   ;;  %vm3924_vm14 = vcmask 523264   ;;  %vm3966_vm15 = vcmask 588800  }
  0x19   : > { %s4953_s14 = smul.u32 432, %s273_s13  ;;  %s5126_s23 = smov 24  }
  0x1a   : > { %s5127_s29 = smov 28   ;;  %s5128_s9 = smov 32  }
  0x1b   : > { %s5229_s17 = scalar_lea.vmem %s8456_s0, %s4953_s14  ;;  %s5130_s15 = smov 40  }
  0x1c   : > { %v5232_v0 = vld [vmem:[%s5229_s17 + $0x19] sm:$0xff]  ;;  %v309_v1 = vld [vmem:[%s5229_s17 + $0x1] sm:$0xff]  ;;  %v310_v3 = vld [vmem:[%s5229_s17 + $0x9] sm:$0xff]  ;;  %s5133_s8 = smov 64   ;;  %s269_s14 = sand.u32 1, %s5111_s25  }
  0x1d   : > { %603 = vrot.lane.b32.xlu1 %v5232_v0, %s5121_s18  ;;  %599 = vrot.lane.b32.xlu0 %v309_v1, %s5121_s18  ;;  %v5239_v2 = vld [vmem:[%s5229_s17 + $0x21] sm:$0xff]  ;;  %v5246_v4 = vld [vmem:[%s5229_s17 + $0x39] sm:$0xff] }
  0x1e   : > { %v5249_v5 = vld [vmem:[%s5229_s17 + $0x31] sm:$0xff]  ;;  %v5259_v7 = vld [vmem:[%s5229_s17 + $0x49] sm:$0xff]  ;;  %v5269_v9 = vld [vmem:[%s5229_s17 + $0x61] sm:$0xff] }
  0x1f   : > { %v5256_v6 = vld [vmem:[%s5229_s17 + $0x51] sm:$0xff]  ;;  %v5266_v8 = vld [vmem:[%s5229_s17 + $0x69] sm:$0xff]  ;;  %v5276_v10 = vld [vmem:[%s5229_s17 + $0x81] sm:$0xff] }
  0x20   : > { %v5279_v11 = vld [vmem:[%s5229_s17 + $0x79] sm:$0xff]  ;;  %v5289_v13 = vld [vmem:[%s5229_s17 + $0x91] sm:$0xff]  ;;  %v5299_v15 = vld [vmem:[%s5229_s17 + $0xa9] sm:$0xff] }
  0x21   : > { %605 = vrot.lane.b32.xlu1 %v5239_v2, %s5121_s18  ;;  %601 = vrot.lane.b32.xlu0 %v310_v3, %s5121_s18  ;;  %v5286_v12 = vld [vmem:[%s5229_s17 + $0x99] sm:$0xff]  ;;  %v5296_v14 = vld [vmem:[%s5229_s17 + $0xb1] sm:$0xff] }
  0x22   : > { %v5306_v16 = vld [vmem:[%s5229_s17 + $0xc9] sm:$0xff]  ;;  %v5309_v17 = vld [vmem:[%s5229_s17 + $0xc1] sm:$0xff]  ;;  %v5319_v19 = vld [vmem:[%s5229_s17 + $0xd9] sm:$0xff] }
  0x23   : > { %v5316_v18 = vld [vmem:[%s5229_s17 + $0xe1] sm:$0xff]  ;;  %v5326_v20 = vld [vmem:[%s5229_s17 + $0xf9] sm:$0xff]  ;;  %v5329_v21 = vld [vmem:[%s5229_s17 + $0xf1] sm:$0xff] }
  0x24   : > { %v5336_v22 = vld [vmem:[%s5229_s17 + $0x111] sm:$0xff]  ;;  %v5339_v23 = vld [vmem:[%s5229_s17 + $0x109] sm:$0xff]  ;;  %v5349_v25 = vld [vmem:[%s5229_s17 + $0x121] sm:$0xff] }
  0x25   : > { %609 = vrot.lane.b32.xlu1 %v5246_v4, %s5121_s18  ;;  %607 = vrot.lane.b32.xlu0 %v5249_v5, %s5121_s18  ;;  %v5346_v24 = vld [vmem:[%s5229_s17 + $0x129] sm:$0xff]  ;;  %v5356_v26 = vld [vmem:[%s5229_s17 + $0x141] sm:$0xff] }
  0x26   : > { %v5359_v27 = vld [vmem:[%s5229_s17 + $0x139] sm:$0xff]  ;;  %v5369_v29 = vld [vmem:[%s5229_s17 + $0x151] sm:$0xff]  ;;  %v5379_v31 = vld [vmem:[%s5229_s17 + $0x169] sm:$0xff] }
  0x27   : > { %v5366_v28 = vld [vmem:[%s5229_s17 + $0x159] sm:$0xff]  ;;  %v5376_v30 = vld [vmem:[%s5229_s17 + $0x171] sm:$0xff]  ;;  %v341_v33 = vld [vmem:[%s5229_s17 + $0x2] sm:$0xff] }
  0x28   : > { %v342_v32 = vld [vmem:[%s5229_s17 + $0xa] sm:$0xff]  ;;  %v5390_v34 = vld [vmem:[%s5229_s17 + $0x22] sm:$0xff]  ;;  %v5393_v35 = vld [vmem:[%s5229_s17 + $0x1a] sm:$0xff] }
  0x29   : > { %613 = vrot.lane.b32.xlu1 %v5256_v6, %s5121_s18  ;;  %611 = vrot.lane.b32.xlu0 %v5259_v7, %s5121_s18  ;;  %v5400_v36 = vld [vmem:[%s5229_s17 + $0x3a] sm:$0xff]  ;;  %v5403_v37 = vld [vmem:[%s5229_s17 + $0x32] sm:$0xff] }
  0x2a   : > { %v5410_v38 = vld [vmem:[%s5229_s17 + $0x52] sm:$0xff]  ;;  %v5413_v39 = vld [vmem:[%s5229_s17 + $0x4a] sm:$0xff]  ;;  %v5423_v41 = vld [vmem:[%s5229_s17 + $0x62] sm:$0xff] }
  0x2b   : > { %v5420_v40 = vld [vmem:[%s5229_s17 + $0x6a] sm:$0xff]  ;;  %v5430_v42 = vld [vmem:[%s5229_s17 + $0x82] sm:$0xff]  ;;  %v5433_v43 = vld [vmem:[%s5229_s17 + $0x7a] sm:$0xff] }
  0x2c   : > { %v5440_v44 = vld [vmem:[%s5229_s17 + $0x9a] sm:$0xff]  ;;  %v5443_v45 = vld [vmem:[%s5229_s17 + $0x92] sm:$0xff]  ;;  %v5453_v47 = vld [vmem:[%s5229_s17 + $0xaa] sm:$0xff] }
  0x2d   : > { %617 = vrot.lane.b32.xlu1 %v5266_v8, %s5121_s18  ;;  %615 = vrot.lane.b32.xlu0 %v5269_v9, %s5121_s18  ;;  %v5450_v46 = vld [vmem:[%s5229_s17 + $0xb2] sm:$0xff]  ;;  %v5460_v48 = vld [vmem:[%s5229_s17 + $0xca] sm:$0xff] }
  0x2e   : > { %v5463_v49 = vld [vmem:[%s5229_s17 + $0xc2] sm:$0xff]  ;;  %v5473_v51 = vld [vmem:[%s5229_s17 + $0xda] sm:$0xff]  ;;  %v5483_v53 = vld [vmem:[%s5229_s17 + $0xf2] sm:$0xff] }
  0x2f   : > { %v5470_v50 = vld [vmem:[%s5229_s17 + $0xe2] sm:$0xff]  ;;  %v5480_v52 = vld [vmem:[%s5229_s17 + $0xfa] sm:$0xff]  ;;  %v5490_v54 = vld [vmem:[%s5229_s17 + $0x112] sm:$0xff] }
  0x30   : > { %v5493_v55 = vld [vmem:[%s5229_s17 + $0x10a] sm:$0xff]  ;;  %v5503_v57 = vld [vmem:[%s5229_s17 + $0x122] sm:$0xff]  ;;  %v5513_v59 = vld [vmem:[%s5229_s17 + $0x13a] sm:$0xff] }
  0x31   : > { %621 = vrot.lane.b32.xlu1 %v5276_v10, %s5121_s18  ;;  %619 = vrot.lane.b32.xlu0 %v5279_v11, %s5121_s18  ;;  %v5500_v56 = vld [vmem:[%s5229_s17 + $0x12a] sm:$0xff]  ;;  %v5510_v58 = vld [vmem:[%s5229_s17 + $0x142] sm:$0xff] }
  0x32   : > { %v5524_v62 = vld [vmem:[%s5229_s17 + $0x15a] sm:$0xff]  ;;  %v5527_v63 = vld [vmem:[%s5229_s17 + $0x152] sm:$0xff] }
  0x33   : > { %8506 = vst [vmem:[#allocation8_spill] sm:$0xff] %v5524_v62  ;;  %8507 = vst [vmem:[#allocation9_spill] sm:$0xff] %v5527_v63 }
  0x35   : > { %625 = vrot.lane.b32.xlu1 %v5286_v12, %s5121_s18  ;;  %623 = vrot.lane.b32.xlu0 %v5289_v13, %s5121_s18 }
  0x39   : > { %629 = vrot.lane.b32.xlu1 %v5296_v14, %s5121_s18  ;;  %627 = vrot.lane.b32.xlu0 %v5299_v15, %s5121_s18 }
  0x3d   : > { %633 = vrot.lane.b32.xlu1 %v5306_v16, %s5121_s18  ;;  %631 = vrot.lane.b32.xlu0 %v5309_v17, %s5121_s18 }
  0x41   : > { %637 = vrot.lane.b32.xlu1 %v5316_v18, %s5121_s18  ;;  %635 = vrot.lane.b32.xlu0 %v5319_v19, %s5121_s18 }
  0x45   : > { %641 = vrot.lane.b32.xlu1 %v5326_v20, %s5121_s18  ;;  %639 = vrot.lane.b32.xlu0 %v5329_v21, %s5121_s18 }
  0x49   : > { %645 = vrot.lane.b32.xlu1 %v5336_v22, %s5121_s18  ;;  %643 = vrot.lane.b32.xlu0 %v5339_v23, %s5121_s18 }
  0x4d   : > { %649 = vrot.lane.b32.xlu1 %v5346_v24, %s5121_s18  ;;  %647 = vrot.lane.b32.xlu0 %v5349_v25, %s5121_s18 }
  0x51   : > { %653 = vrot.lane.b32.xlu1 %v5356_v26, %s5121_s18  ;;  %651 = vrot.lane.b32.xlu0 %v5359_v27, %s5121_s18 }
  0x55   : > { %657 = vrot.lane.b32.xlu1 %v5366_v28, %s5121_s18  ;;  %655 = vrot.lane.b32.xlu0 %v5369_v29, %s5121_s18 }
  0x59   : > { %661 = vrot.lane.b32.xlu1 %v5376_v30, %s5121_s18  ;;  %659 = vrot.lane.b32.xlu0 %v5379_v31, %s5121_s18 }
  0x5d   : > { %729 = vrot.lane.b32.xlu1 %v342_v32, %s5122_s19  ;;  %727 = vrot.lane.b32.xlu0 %v341_v33, %s5122_s19  ;;  %v5538_v32 = vld [vmem:[%s5229_s17 + $0x172] sm:$0xff]  ;;  %v5541_v33 = vld [vmem:[%s5229_s17 + $0x16a] sm:$0xff] }
  0x5e   : > { %8510 = vst [vmem:[#allocation12_spill] sm:$0xff] %v5538_v32  ;;  %8511 = vst [vmem:[#allocation13_spill] sm:$0xff] %v5541_v33 }
  0x61   : > { %733 = vrot.lane.b32.xlu1 %v5390_v34, %s5122_s19  ;;  %731 = vrot.lane.b32.xlu0 %v5393_v35, %s5122_s19 }
  0x65   : > { %737 = vrot.lane.b32.xlu1 %v5400_v36, %s5122_s19  ;;  %735 = vrot.lane.b32.xlu0 %v5403_v37, %s5122_s19 }
  0x69   : > { %741 = vrot.lane.b32.xlu1 %v5410_v38, %s5122_s19  ;;  %739 = vrot.lane.b32.xlu0 %v5413_v39, %s5122_s19 }
  0x6d   : > { %745 = vrot.lane.b32.xlu1 %v5420_v40, %s5122_s19  ;;  %743 = vrot.lane.b32.xlu0 %v5423_v41, %s5122_s19 }
  0x71   : > { %749 = vrot.lane.b32.xlu1 %v5430_v42, %s5122_s19  ;;  %747 = vrot.lane.b32.xlu0 %v5433_v43, %s5122_s19 }
  0x75   : > { %753 = vrot.lane.b32.xlu1 %v5440_v44, %s5122_s19  ;;  %751 = vrot.lane.b32.xlu0 %v5443_v45, %s5122_s19 }
  0x79   : > { %757 = vrot.lane.b32.xlu1 %v5450_v46, %s5122_s19  ;;  %755 = vrot.lane.b32.xlu0 %v5453_v47, %s5122_s19 }
  0x7d   : > { %761 = vrot.lane.b32.xlu1 %v5460_v48, %s5122_s19  ;;  %759 = vrot.lane.b32.xlu0 %v5463_v49, %s5122_s19 }
  0x81   : > { %765 = vrot.lane.b32.xlu1 %v5470_v50, %s5122_s19  ;;  %763 = vrot.lane.b32.xlu0 %v5473_v51, %s5122_s19 }
  0x85   : > { %769 = vrot.lane.b32.xlu1 %v5480_v52, %s5122_s19  ;;  %767 = vrot.lane.b32.xlu0 %v5483_v53, %s5122_s19 }
  0x89   : > { %773 = vrot.lane.b32.xlu1 %v5490_v54, %s5122_s19  ;;  %771 = vrot.lane.b32.xlu0 %v5493_v55, %s5122_s19 }
  0x8d   : > { %777 = vrot.lane.b32.xlu1 %v5500_v56, %s5122_s19  ;;  %775 = vrot.lane.b32.xlu0 %v5503_v57, %s5122_s19 }
  0x8f   : > { %v5515_v60 = vpop.permute.xlu1 %603  ;;  %v5517_v61 = vpop.permute.xlu0 %599 }
  0x90   : > { %8504 = vst [vmem:[#allocation6_spill] sm:$0xff] %v5515_v60  ;;  %8505 = vst [vmem:[#allocation7_spill] sm:$0xff] %v5517_v61 }
  0x91   : > { %781 = vrot.lane.b32.xlu1 %v5510_v58, %s5122_s19  ;;  %779 = vrot.lane.b32.xlu0 %v5513_v59, %s5122_s19 }
  0x93   : > { %v5529_v1 = vpop.permute.xlu1 %605  ;;  %v5531_v3 = vpop.permute.xlu0 %601 }
  0x94   : > { %8508 = vst [vmem:[#allocation10_spill] sm:$0xff] %v5529_v1  ;;  %8509 = vst [vmem:[#allocation11_spill] sm:$0xff] %v5531_v3 }
  0x95   : > { %785 = vrot.lane.b32.xlu1 %v5524_v62, %s5122_s19  ;;  %783 = vrot.lane.b32.xlu0 %v5527_v63, %s5122_s19  ;;  %v279_v63 = vld [vmem:[%s5229_s17 + $0x18] sm:$0xff]  ;;  %v280_v62 = vld [vmem:[%s5229_s17 + $0x20] sm:$0xff] }
  0x97   : > { %v5543_v60 = vpop.permute.xlu1 %609  ;;  %v5545_v61 = vpop.permute.xlu0 %607 }
  0x98   : > { %8512 = vst [vmem:[#allocation14_spill] sm:$0xff] %v5543_v60  ;;  %8513 = vst [vmem:[#allocation15_spill] sm:$0xff] %v5545_v61 }
  0x99   : > { %789 = vrot.lane.b32.xlu1 %v5538_v32, %s5122_s19  ;;  %787 = vrot.lane.b32.xlu0 %v5541_v33, %s5122_s19  ;;  %v5564_v33 = vld [vmem:[%s5229_s17 + $0x38] sm:$0xff]  ;;  %v5567_v32 = vld [vmem:[%s5229_s17 + $0x30] sm:$0xff] }
  0x9a   : > { %8518 = vst [vmem:[#allocation20_spill] sm:$0xff] %v5564_v33  ;;  %8519 = vst [vmem:[#allocation21_spill] sm:$0xff] %v5567_v32 }
  0x9b   : > { %v5551_v1 = vpop.permute.xlu1 %613  ;;  %v5553_v3 = vpop.permute.xlu0 %611 }
  0x9c   : > { %8514 = vst [vmem:[#allocation16_spill] sm:$0xff] %v5551_v1  ;;  %8515 = vst [vmem:[#allocation17_spill] sm:$0xff] %v5553_v3  ;;  %v5578_v3 = vld [vmem:[%s5229_s17 + $0x50] sm:$0xff] }
  0x9d   : > { %857 = vrot.lane.b32.xlu1 %v280_v62, %s5123_s20  ;;  %855 = vrot.lane.b32.xlu0 %v279_v63, %s5123_s20  ;;  %8522 = vst [vmem:[#allocation24_spill] sm:$0xff] %v5578_v3 }
  0x9f   : > { %v5559_v61 = vpop.permute.xlu1 %617  ;;  %v5561_v60 = vpop.permute.xlu0 %615 }
  0xa0   : > { %8516 = vst [vmem:[#allocation18_spill] sm:$0xff] %v5559_v61  ;;  %8517 = vst [vmem:[#allocation19_spill] sm:$0xff] %v5561_v60  ;;  %v5581_v61 = vld [vmem:[%s5229_s17 + $0x48] sm:$0xff] }
  0xa1   : > { %861 = vrot.lane.b32.xlu1 %v5564_v33, %s5123_s20  ;;  %859 = vrot.lane.b32.xlu0 %v5567_v32, %s5123_s20  ;;  %8523 = vst [vmem:[#allocation25_spill] sm:$0xff] %v5581_v61  ;;  %v5592_v32 = vld [vmem:[%s5229_s17 + $0x68] sm:$0xff]  ;;  %v5746_v33 = vld [vmem:[%s5229_s17 + $0x170] sm:$0xff] }
  0xa2   : > { %8526 = vst [vmem:[#allocation28_spill] sm:$0xff] %v5592_v32 }
  0xa3   : > { %v5573_v62 = vpop.permute.xlu1 %621  ;;  %v5575_v63 = vpop.permute.xlu0 %619 }
  0xa4   : > { %8520 = vst [vmem:[#allocation22_spill] sm:$0xff] %v5573_v62  ;;  %8521 = vst [vmem:[#allocation23_spill] sm:$0xff] %v5575_v63  ;;  %v5595_v62 = vld [vmem:[%s5229_s17 + $0x60] sm:$0xff] }
  0xa5   : > { %865 = vrot.lane.b32.xlu1 %v5578_v3, %s5123_s20  ;;  %863 = vrot.lane.b32.xlu0 %v5581_v61, %s5123_s20  ;;  %8527 = vst [vmem:[#allocation29_spill] sm:$0xff] %v5595_v62  ;;  %v5606_v3 = vld [vmem:[%s5229_s17 + $0x80] sm:$0xff] }
  0xa6   : > { %8530 = vst [vmem:[#allocation32_spill] sm:$0xff] %v5606_v3 }
  0xa7   : > { %v5587_v60 = vpop.permute.xlu1 %625  ;;  %v5589_v1 = vpop.permute.xlu0 %623 }
  0xa8   : > { %8524 = vst [vmem:[#allocation26_spill] sm:$0xff] %v5587_v60  ;;  %8525 = vst [vmem:[#allocation27_spill] sm:$0xff] %v5589_v1  ;;  %v5609_v60 = vld [vmem:[%s5229_s17 + $0x78] sm:$0xff] }
  0xa9   : > { %869 = vrot.lane.b32.xlu1 %v5592_v32, %s5123_s20  ;;  %867 = vrot.lane.b32.xlu0 %v5595_v62, %s5123_s20  ;;  %8531 = vst [vmem:[#allocation33_spill] sm:$0xff] %v5609_v60  ;;  %v5620_v32 = vld [vmem:[%s5229_s17 + $0x98] sm:$0xff] }
  0xaa   : > { %8534 = vst [vmem:[#allocation36_spill] sm:$0xff] %v5620_v32 }
  0xab   : > { %v5601_v63 = vpop.permute.xlu1 %629  ;;  %v5603_v61 = vpop.permute.xlu0 %627 }
  0xac   : > { %8528 = vst [vmem:[#allocation30_spill] sm:$0xff] %v5601_v63  ;;  %8529 = vst [vmem:[#allocation31_spill] sm:$0xff] %v5603_v61  ;;  %v5623_v63 = vld [vmem:[%s5229_s17 + $0x90] sm:$0xff] }
  0xad   : > { %873 = vrot.lane.b32.xlu1 %v5606_v3, %s5123_s20  ;;  %871 = vrot.lane.b32.xlu0 %v5609_v60, %s5123_s20  ;;  %8535 = vst [vmem:[#allocation37_spill] sm:$0xff] %v5623_v63  ;;  %v5634_v3 = vld [vmem:[%s5229_s17 + $0xb0] sm:$0xff] }
  0xae   : > { %8538 = vst [vmem:[#allocation40_spill] sm:$0xff] %v5634_v3 }
  0xaf   : > { %v5615_v1 = vpop.permute.xlu1 %633  ;;  %v5617_v62 = vpop.permute.xlu0 %631 }
  0xb0   : > { %8532 = vst [vmem:[#allocation34_spill] sm:$0xff] %v5615_v1  ;;  %8533 = vst [vmem:[#allocation35_spill] sm:$0xff] %v5617_v62  ;;  %v5637_v1 = vld [vmem:[%s5229_s17 + $0xa8] sm:$0xff] }
  0xb1   : > { %877 = vrot.lane.b32.xlu1 %v5620_v32, %s5123_s20  ;;  %875 = vrot.lane.b32.xlu0 %v5623_v63, %s5123_s20  ;;  %8539 = vst [vmem:[#allocation41_spill] sm:$0xff] %v5637_v1  ;;  %v5648_v32 = vld [vmem:[%s5229_s17 + $0xc8] sm:$0xff] }
  0xb2   : > { %8542 = vst [vmem:[#allocation44_spill] sm:$0xff] %v5648_v32 }
  0xb3   : > { %v5629_v61 = vpop.permute.xlu1 %637  ;;  %v5631_v60 = vpop.permute.xlu0 %635 }
  0xb4   : > { %8536 = vst [vmem:[#allocation38_spill] sm:$0xff] %v5629_v61  ;;  %8537 = vst [vmem:[#allocation39_spill] sm:$0xff] %v5631_v60  ;;  %v5651_v61 = vld [vmem:[%s5229_s17 + $0xc0] sm:$0xff] }
  0xb5   : > { %881 = vrot.lane.b32.xlu1 %v5634_v3, %s5123_s20  ;;  %879 = vrot.lane.b32.xlu0 %v5637_v1, %s5123_s20  ;;  %8543 = vst [vmem:[#allocation45_spill] sm:$0xff] %v5651_v61  ;;  %v5662_v3 = vld [vmem:[%s5229_s17 + $0xe0] sm:$0xff] }
  0xb6   : > { %8546 = vst [vmem:[#allocation48_spill] sm:$0xff] %v5662_v3 }
  0xb7   : > { %v5643_v62 = vpop.permute.xlu1 %641  ;;  %v5645_v63 = vpop.permute.xlu0 %639 }
  0xb8   : > { %8540 = vst [vmem:[#allocation42_spill] sm:$0xff] %v5643_v62  ;;  %8541 = vst [vmem:[#allocation43_spill] sm:$0xff] %v5645_v63  ;;  %v5665_v62 = vld [vmem:[%s5229_s17 + $0xd8] sm:$0xff] }
  0xb9   : > { %885 = vrot.lane.b32.xlu1 %v5648_v32, %s5123_s20  ;;  %883 = vrot.lane.b32.xlu0 %v5651_v61, %s5123_s20  ;;  %8547 = vst [vmem:[#allocation49_spill] sm:$0xff] %v5665_v62  ;;  %v5676_v32 = vld [vmem:[%s5229_s17 + $0xf8] sm:$0xff] }
  0xba   : > { %8550 = vst [vmem:[#allocation52_spill] sm:$0xff] %v5676_v32 }
  0xbb   : > { %v5657_v60 = vpop.permute.xlu1 %645  ;;  %v5659_v1 = vpop.permute.xlu0 %643 }
  0xbc   : > { %8544 = vst [vmem:[#allocation46_spill] sm:$0xff] %v5657_v60  ;;  %8545 = vst [vmem:[#allocation47_spill] sm:$0xff] %v5659_v1  ;;  %v5679_v60 = vld [vmem:[%s5229_s17 + $0xf0] sm:$0xff] }
  0xbd   : > { %889 = vrot.lane.b32.xlu1 %v5662_v3, %s5123_s20  ;;  %887 = vrot.lane.b32.xlu0 %v5665_v62, %s5123_s20  ;;  %8551 = vst [vmem:[#allocation53_spill] sm:$0xff] %v5679_v60  ;;  %v5690_v3 = vld [vmem:[%s5229_s17 + $0x110] sm:$0xff] }
  0xbe   : > { %8554 = vst [vmem:[#allocation56_spill] sm:$0xff] %v5690_v3 }
  0xbf   : > { %v5671_v63 = vpop.permute.xlu1 %649  ;;  %v5673_v61 = vpop.permute.xlu0 %647 }
  0xc0   : > { %8548 = vst [vmem:[#allocation50_spill] sm:$0xff] %v5671_v63  ;;  %8549 = vst [vmem:[#allocation51_spill] sm:$0xff] %v5673_v61  ;;  %v5693_v63 = vld [vmem:[%s5229_s17 + $0x108] sm:$0xff] }
  0xc1   : > { %893 = vrot.lane.b32.xlu1 %v5676_v32, %s5123_s20  ;;  %891 = vrot.lane.b32.xlu0 %v5679_v60, %s5123_s20  ;;  %8555 = vst [vmem:[#allocation57_spill] sm:$0xff] %v5693_v63  ;;  %v5704_v32 = vld [vmem:[%s5229_s17 + $0x128] sm:$0xff] }
  0xc2   : > { %8558 = vst [vmem:[#allocation60_spill] sm:$0xff] %v5704_v32 }
  0xc3   : > { %v5685_v1 = vpop.permute.xlu1 %653  ;;  %v5687_v62 = vpop.permute.xlu0 %651 }
  0xc4   : > { %8552 = vst [vmem:[#allocation54_spill] sm:$0xff] %v5685_v1  ;;  %8553 = vst [vmem:[#allocation55_spill] sm:$0xff] %v5687_v62  ;;  %v5707_v1 = vld [vmem:[%s5229_s17 + $0x120] sm:$0xff] }
  0xc5   : > { %897 = vrot.lane.b32.xlu1 %v5690_v3, %s5123_s20  ;;  %895 = vrot.lane.b32.xlu0 %v5693_v63, %s5123_s20  ;;  %8559 = vst [vmem:[#allocation61_spill] sm:$0xff] %v5707_v1  ;;  %v5718_v3 = vld [vmem:[%s5229_s17 + $0x140] sm:$0xff] }
  0xc6   : > { %8562 = vst [vmem:[#allocation64_spill] sm:$0xff] %v5718_v3 }
  0xc7   : > { %v5699_v61 = vpop.permute.xlu1 %657  ;;  %v5701_v60 = vpop.permute.xlu0 %655 }
  0xc8   : > { %8556 = vst [vmem:[#allocation58_spill] sm:$0xff] %v5699_v61  ;;  %8557 = vst [vmem:[#allocation59_spill] sm:$0xff] %v5701_v60  ;;  %v5721_v60 = vld [vmem:[%s5229_s17 + $0x138] sm:$0xff] }
  0xc9   : > { %901 = vrot.lane.b32.xlu1 %v5704_v32, %s5123_s20  ;;  %899 = vrot.lane.b32.xlu0 %v5707_v1, %s5123_s20  ;;  %8563 = vst [vmem:[#allocation65_spill] sm:$0xff] %v5721_v60  ;;  %v5732_v32 = vld [vmem:[%s5229_s17 + $0x158] sm:$0xff] }
  0xca   : > { %8566 = vst [vmem:[#allocation68_spill] sm:$0xff] %v5732_v32 }
  0xcb   : > { %v5713_v62 = vpop.permute.xlu1 %661  ;;  %v5715_v63 = vpop.permute.xlu0 %659 }
  0xcc   : > { %8560 = vst [vmem:[#allocation62_spill] sm:$0xff] %v5713_v62  ;;  %8561 = vst [vmem:[#allocation63_spill] sm:$0xff] %v5715_v63  ;;  %v5735_v62 = vld [vmem:[%s5229_s17 + $0x150] sm:$0xff] }
  0xcd   : > { %905 = vrot.lane.b32.xlu1 %v5718_v3, %s5123_s20  ;;  %903 = vrot.lane.b32.xlu0 %v5721_v60, %s5123_s20  ;;  %8567 = vst [vmem:[#allocation69_spill] sm:$0xff] %v5735_v62  ;;  %v5749_v60 = vld [vmem:[%s5229_s17 + $0x168] sm:$0xff] }
  0xcf   : > { %v5727_v61 = vpop.permute.xlu1 %729  ;;  %v5729_v1 = vpop.permute.xlu0 %727 }
  0xd0   : > { %8564 = vst [vmem:[#allocation66_spill] sm:$0xff] %v5727_v61  ;;  %8565 = vst [vmem:[#allocation67_spill] sm:$0xff] %v5729_v1  ;;  %v5756_v1 = vld [vmem:[%s5229_s17 + $0x188] sm:$0xff]  ;;  %v5759_v61 = vld [vmem:[%s5229_s17 + $0x180] sm:$0xff] }
  0xd1   : > { %909 = vrot.lane.b32.xlu1 %v5732_v32, %s5123_s20  ;;  %907 = vrot.lane.b32.xlu0 %v5735_v62, %s5123_s20 }
  0xd3   : > { %v5741_v63 = vpop.permute.xlu1 %733  ;;  %v5743_v3 = vpop.permute.xlu0 %731 }
  0xd4   : > { %8568 = vst [vmem:[#allocation70_spill] sm:$0xff] %v5741_v63  ;;  %8569 = vst [vmem:[#allocation71_spill] sm:$0xff] %v5743_v3 }
  0xd5   : > { %913 = vrot.lane.b32.xlu1 %v5746_v33, %s5123_s20  ;;  %911 = vrot.lane.b32.xlu0 %v5749_v60, %s5123_s20 }
  0xd7   : > { %v5761_v32 = vpop.permute.xlu1 %737  ;;  %v5763_v62 = vpop.permute.xlu0 %735 }
  0xd8   : > { %8570 = vst [vmem:[#allocation72_spill] sm:$0xff] %v5761_v32  ;;  %8571 = vst [vmem:[#allocation73_spill] sm:$0xff] %v5763_v62 }
  0xd9   : > { %917 = vrot.lane.b32.xlu1 %v5756_v1, %s5123_s20  ;;  %915 = vrot.lane.b32.xlu0 %v5759_v61, %s5123_s20  ;;  %s5131_s20 = smov 48  }
  0xdb   : > { %v5769_v3 = vpop.permute.xlu1 %741  ;;  %v5771_v63 = vpop.permute.xlu0 %739 }
  0xdc   : > { %8572 = vst [vmem:[#allocation74_spill] sm:$0xff] %v5769_v3  ;;  %8573 = vst [vmem:[#allocation75_spill] sm:$0xff] %v5771_v63 }
  0xdd   : > { %985 = vrot.lane.b32.xlu1 %v5239_v2, %s5124_s21  ;;  %983 = vrot.lane.b32.xlu0 %v5232_v0, %s5124_s21 }
  0xdf   : > { %v5777_v32 = vpop.permute.xlu1 %745  ;;  %v5779_v62 = vpop.permute.xlu0 %743 }
  0xe1   : > { %989 = vrot.lane.b32.xlu1 %v5246_v4, %s5124_s21  ;;  %987 = vrot.lane.b32.xlu0 %v5249_v5, %s5124_s21 }
  0xe3   : > { %v5785_v3 = vpop.permute.xlu1 %749  ;;  %v5787_v63 = vpop.permute.xlu0 %747 }
  0xe5   : > { %993 = vrot.lane.b32.xlu1 %v5256_v6, %s5124_s21  ;;  %991 = vrot.lane.b32.xlu0 %v5259_v7, %s5124_s21 }
  0xe7   : > { %v5793_v0 = vpop.permute.xlu1 %753  ;;  %v5795_v2 = vpop.permute.xlu0 %751 }
  0xe8   : > { %8574 = vst [vmem:[#allocation76_spill] sm:$0xff] %v5793_v0  ;;  %8575 = vst [vmem:[#allocation77_spill] sm:$0xff] %v5795_v2 }
  0xe9   : > { %997 = vrot.lane.b32.xlu1 %v5266_v8, %s5124_s21  ;;  %995 = vrot.lane.b32.xlu0 %v5269_v9, %s5124_s21 }
  0xeb   : > { %v5801_v4 = vpop.permute.xlu1 %757  ;;  %v5803_v5 = vpop.permute.xlu0 %755 }
  0xec   : > { %8576 = vst [vmem:[#allocation78_spill] sm:$0xff] %v5801_v4  ;;  %8577 = vst [vmem:[#allocation79_spill] sm:$0xff] %v5803_v5 }
  0xed   : > { %1001 = vrot.lane.b32.xlu1 %v5276_v10, %s5124_s21  ;;  %999 = vrot.lane.b32.xlu0 %v5279_v11, %s5124_s21 }
  0xef   : > { %v5809_v6 = vpop.permute.xlu1 %761  ;;  %v5811_v7 = vpop.permute.xlu0 %759 }
  0xf0   : > { %8578 = vst [vmem:[#allocation80_spill] sm:$0xff] %v5809_v6  ;;  %8579 = vst [vmem:[#allocation81_spill] sm:$0xff] %v5811_v7  ;;  %v4588_v6 = vld [vmem:[%s5229_s17 + $0x91] sm:$0xff] }
  0xf1   : > { %1005 = vrot.lane.b32.xlu1 %v5286_v12, %s5124_s21  ;;  %1003 = vrot.lane.b32.xlu0 %v5289_v13, %s5124_s21 }
  0xf3   : > { %v5817_v8 = vpop.permute.xlu1 %765  ;;  %v5819_v9 = vpop.permute.xlu0 %763 }
  0xf4   : > { %8580 = vst [vmem:[#allocation82_spill] sm:$0xff] %v5817_v8  ;;  %8581 = vst [vmem:[#allocation83_spill] sm:$0xff] %v5819_v9  ;;  %v8646_v9 = vld [vmem:[#allocation48_spill] sm:$0xff]  ;;  %v4582_v8 = vld [vmem:[%s5229_s17 + $0x49] sm:$0xff] }
  0xf5   : > { %1009 = vrot.lane.b32.xlu1 %v5296_v14, %s5124_s21  ;;  %1007 = vrot.lane.b32.xlu0 %v5299_v15, %s5124_s21 }
  0xf7   : > { %v5825_v10 = vpop.permute.xlu1 %769  ;;  %v5827_v11 = vpop.permute.xlu0 %767 }
  0xf8   : > { %8582 = vst [vmem:[#allocation84_spill] sm:$0xff] %v5825_v10  ;;  %8583 = vst [vmem:[#allocation85_spill] sm:$0xff] %v5827_v11  ;;  %v8638_v11 = vld [vmem:[#allocation40_spill] sm:$0xff] }
  0xf9   : > { %1013 = vrot.lane.b32.xlu1 %v5306_v16, %s5124_s21  ;;  %1011 = vrot.lane.b32.xlu0 %v5309_v17, %s5124_s21 }
  0xfb   : > { %v5833_v12 = vpop.permute.xlu1 %773  ;;  %v5835_v13 = vpop.permute.xlu0 %771 }
  0xfc   : > { %8584 = vst [vmem:[#allocation86_spill] sm:$0xff] %v5833_v12  ;;  %8585 = vst [vmem:[#allocation87_spill] sm:$0xff] %v5835_v13  ;;  %v8630_v13 = vld [vmem:[#allocation32_spill] sm:$0xff] }
  0xfd   : > { %1017 = vrot.lane.b32.xlu1 %v5316_v18, %s5124_s21  ;;  %1015 = vrot.lane.b32.xlu0 %v5319_v19, %s5124_s21 }
  0xff   : > { %v5841_v14 = vpop.permute.xlu1 %777  ;;  %v5843_v15 = vpop.permute.xlu0 %775 }
 0x100   : > { %8586 = vst [vmem:[#allocation88_spill] sm:$0xff] %v5841_v14  ;;  %8587 = vst [vmem:[#allocation89_spill] sm:$0xff] %v5843_v15 }
 0x101   : > { %1021 = vrot.lane.b32.xlu1 %v5326_v20, %s5124_s21  ;;  %1019 = vrot.lane.b32.xlu0 %v5329_v21, %s5124_s21 }
 0x103   : > { %v5849_v16 = vpop.permute.xlu1 %781  ;;  %v5851_v17 = vpop.permute.xlu0 %779 }
 0x104   : > { %8588 = vst [vmem:[#allocation90_spill] sm:$0xff] %v5849_v16  ;;  %8589 = vst [vmem:[#allocation91_spill] sm:$0xff] %v5851_v17 }
 0x105   : > { %1025 = vrot.lane.b32.xlu1 %v5336_v22, %s5124_s21  ;;  %1023 = vrot.lane.b32.xlu0 %v5339_v23, %s5124_s21 }
 0x107   : > { %v5857_v18 = vpop.permute.xlu1 %785  ;;  %v5859_v19 = vpop.permute.xlu0 %783 }
 0x108   : > { %8590 = vst [vmem:[#allocation92_spill] sm:$0xff] %v5857_v18  ;;  %8591 = vst [vmem:[#allocation93_spill] sm:$0xff] %v5859_v19 }
 0x109   : > { %1029 = vrot.lane.b32.xlu1 %v5346_v24, %s5124_s21  ;;  %1027 = vrot.lane.b32.xlu0 %v5349_v25, %s5124_s21 }
 0x10b   : > { %v5865_v20 = vpop.permute.xlu1 %789  ;;  %v5867_v21 = vpop.permute.xlu0 %787 }
 0x10c   : > { %8592 = vst [vmem:[#allocation94_spill] sm:$0xff] %v5865_v20  ;;  %8593 = vst [vmem:[#allocation95_spill] sm:$0xff] %v5867_v21 }
 0x10d   : > { %1033 = vrot.lane.b32.xlu1 %v5356_v26, %s5124_s21  ;;  %1031 = vrot.lane.b32.xlu0 %v5359_v27, %s5124_s21  ;;  %v5890_v26 = vld [vmem:[%s5229_s17 + $0x189] sm:$0xff]  ;;  %v5893_v27 = vld [vmem:[%s5229_s17 + $0x181] sm:$0xff] }
 0x10f   : > { %v5873_v22 = vpop.permute.xlu1 %857  ;;  %v5875_v23 = vpop.permute.xlu0 %855 }
 0x111   : > { %1037 = vrot.lane.b32.xlu1 %v5366_v28, %s5124_s21  ;;  %1035 = vrot.lane.b32.xlu0 %v5369_v29, %s5124_s21 }
 0x113   : > { %v5881_v24 = vpop.permute.xlu1 %861  ;;  %v5883_v25 = vpop.permute.xlu0 %859 }
 0x115   : > { %1041 = vrot.lane.b32.xlu1 %v5376_v30, %s5124_s21  ;;  %1039 = vrot.lane.b32.xlu0 %v5379_v31, %s5124_s21 }
 0x117   : > { %v5895_v21 = vpop.permute.xlu1 %865  ;;  %v5897_v28 = vpop.permute.xlu0 %863 }
 0x119   : > { %1045 = vrot.lane.b32.xlu1 %v5890_v26, %s5124_s21  ;;  %1043 = vrot.lane.b32.xlu0 %v5893_v27, %s5124_s21 }
 0x11b   : > { %v5903_v29 = vpop.permute.xlu1 %869  ;;  %v5905_v30 = vpop.permute.xlu0 %867 }
 0x11d   : > { %1113 = vrot.lane.b32.xlu1 %v5390_v34, %s5125_s22  ;;  %1111 = vrot.lane.b32.xlu0 %v5393_v35, %s5125_s22 }
 0x11f   : > { %v5911_v31 = vpop.permute.xlu1 %873  ;;  %v5913_v20 = vpop.permute.xlu0 %871 }
 0x121   : > { %1117 = vrot.lane.b32.xlu1 %v5400_v36, %s5125_s22  ;;  %1115 = vrot.lane.b32.xlu0 %v5403_v37, %s5125_s22 }
 0x123   : > { %v5919_v19 = vpop.permute.xlu1 %877  ;;  %v5921_v18 = vpop.permute.xlu0 %875 }
 0x124   : > { %8594 = vst [vmem:[#allocation96_spill] sm:$0xff] %v5919_v19  ;;  %8595 = vst [vmem:[#allocation97_spill] sm:$0xff] %v5921_v18 }
 0x125   : > { %1121 = vrot.lane.b32.xlu1 %v5410_v38, %s5125_s22  ;;  %1119 = vrot.lane.b32.xlu0 %v5413_v39, %s5125_s22 }
 0x127   : > { %v5927_v34 = vpop.permute.xlu1 %881  ;;  %v5929_v35 = vpop.permute.xlu0 %879 }
 0x128   : > { %8596 = vst [vmem:[#allocation98_spill] sm:$0xff] %v5927_v34  ;;  %8597 = vst [vmem:[#allocation99_spill] sm:$0xff] %v5929_v35  ;;  %v4620_v34 = vld [vmem:[%s5229_s17 + $0x92] sm:$0xff] }
 0x129   : > { %1125 = vrot.lane.b32.xlu1 %v5420_v40, %s5125_s22  ;;  %1123 = vrot.lane.b32.xlu0 %v5423_v41, %s5125_s22 }
 0x12b   : > { %v5935_v36 = vpop.permute.xlu1 %885  ;;  %v5937_v37 = vpop.permute.xlu0 %883 }
 0x12c   : > { %8598 = vst [vmem:[#allocation100_spill] sm:$0xff] %v5935_v36  ;;  %8599 = vst [vmem:[#allocation101_spill] sm:$0xff] %v5937_v37 }
 0x12d   : > { %1129 = vrot.lane.b32.xlu1 %v5430_v42, %s5125_s22  ;;  %1127 = vrot.lane.b32.xlu0 %v5433_v43, %s5125_s22 }
 0x12f   : > { %v5943_v38 = vpop.permute.xlu1 %889  ;;  %v5945_v39 = vpop.permute.xlu0 %887 }
 0x130   : > { %8600 = vst [vmem:[#allocation102_spill] sm:$0xff] %v5943_v38  ;;  %8601 = vst [vmem:[#allocation103_spill] sm:$0xff] %v5945_v39  ;;  %v4586_v38 = vld [vmem:[%s5229_s17 + $0x79] sm:$0xff] }
 0x131   : > { %1133 = vrot.lane.b32.xlu1 %v5440_v44, %s5125_s22  ;;  %1131 = vrot.lane.b32.xlu0 %v5443_v45, %s5125_s22 }
 0x133   : > { %v5951_v40 = vpop.permute.xlu1 %893  ;;  %v5953_v41 = vpop.permute.xlu0 %891 }
 0x134   : > { %8602 = vst [vmem:[#allocation104_spill] sm:$0xff] %v5951_v40  ;;  %8603 = vst [vmem:[#allocation105_spill] sm:$0xff] %v5953_v41  ;;  %v8642_v41 = vld [vmem:[#allocation44_spill] sm:$0xff] }
 0x135   : > { %1137 = vrot.lane.b32.xlu1 %v5450_v46, %s5125_s22  ;;  %1135 = vrot.lane.b32.xlu0 %v5453_v47, %s5125_s22 }
 0x137   : > { %v5959_v42 = vpop.permute.xlu1 %897  ;;  %v5961_v43 = vpop.permute.xlu0 %895 }
 0x138   : > { %8604 = vst [vmem:[#allocation106_spill] sm:$0xff] %v5959_v42  ;;  %8605 = vst [vmem:[#allocation107_spill] sm:$0xff] %v5961_v43  ;;  %v8634_v43 = vld [vmem:[#allocation36_spill] sm:$0xff] }
 0x139   : > { %1141 = vrot.lane.b32.xlu1 %v5460_v48, %s5125_s22  ;;  %1139 = vrot.lane.b32.xlu0 %v5463_v49, %s5125_s22 }
 0x13b   : > { %v5967_v44 = vpop.permute.xlu1 %901  ;;  %v5969_v45 = vpop.permute.xlu0 %899 }
 0x13c   : > { %8606 = vst [vmem:[#allocation108_spill] sm:$0xff] %v5967_v44  ;;  %8607 = vst [vmem:[#allocation109_spill] sm:$0xff] %v5969_v45  ;;  %v8626_v45 = vld [vmem:[#allocation28_spill] sm:$0xff] }
 0x13d   : > { %1145 = vrot.lane.b32.xlu1 %v5470_v50, %s5125_s22  ;;  %1143 = vrot.lane.b32.xlu0 %v5473_v51, %s5125_s22 }
 0x13f   : > { %v5975_v46 = vpop.permute.xlu1 %905  ;;  %v5977_v47 = vpop.permute.xlu0 %903 }
 0x140   : > { %8608 = vst [vmem:[#allocation110_spill] sm:$0xff] %v5975_v46  ;;  %8609 = vst [vmem:[#allocation111_spill] sm:$0xff] %v5977_v47  ;;  %v8622_v47 = vld [vmem:[#allocation24_spill] sm:$0xff]  ;;  %v8623_v46 = vld [vmem:[#allocation25_spill] sm:$0xff] }
 0x141   : > { %1149 = vrot.lane.b32.xlu1 %v5480_v52, %s5125_s22  ;;  %1147 = vrot.lane.b32.xlu0 %v5483_v53, %s5125_s22 }
 0x143   : > { %v5983_v48 = vpop.permute.xlu1 %909  ;;  %v5985_v49 = vpop.permute.xlu0 %907 }
 0x144   : > { %8610 = vst [vmem:[#allocation112_spill] sm:$0xff] %v5983_v48  ;;  %8611 = vst [vmem:[#allocation113_spill] sm:$0xff] %v5985_v49  ;;  %v8621_v48 = vld [vmem:[#allocation21_spill] sm:$0xff] }
 0x145   : > { %1153 = vrot.lane.b32.xlu1 %v5490_v54, %s5125_s22  ;;  %1151 = vrot.lane.b32.xlu0 %v5493_v55, %s5125_s22 }
 0x147   : > { %v5991_v50 = vpop.permute.xlu1 %913  ;;  %v5993_v51 = vpop.permute.xlu0 %911 }
 0x148   : > { %8612 = vst [vmem:[#allocation114_spill] sm:$0xff] %v5991_v50  ;;  %8613 = vst [vmem:[#allocation115_spill] sm:$0xff] %v5993_v51  ;;  %v8616_v51 = vld [vmem:[#allocation8_spill] sm:$0xff] }
 0x149   : > { %1157 = vrot.lane.b32.xlu1 %v5500_v56, %s5125_s22  ;;  %1155 = vrot.lane.b32.xlu0 %v5503_v57, %s5125_s22  ;;  %v8617_v56 = vld [vmem:[#allocation9_spill] sm:$0xff] }
 0x14a   : > { %v6027_v50 = vld [vmem:[%s5229_s17 + $0x182] sm:$0xff] }
 0x14b   : > { %v5999_v52 = vpop.permute.xlu1 %917  ;;  %v6001_v53 = vpop.permute.xlu0 %915 }
 0x14c   : > { %8614 = vst [vmem:[#allocation116_spill] sm:$0xff] %v5999_v52  ;;  %8615 = vst [vmem:[#allocation117_spill] sm:$0xff] %v6001_v53  ;;  %v8618_v53 = vld [vmem:[#allocation12_spill] sm:$0xff] }
 0x14d   : > { %1161 = vrot.lane.b32.xlu1 %v5510_v58, %s5125_s22  ;;  %1159 = vrot.lane.b32.xlu0 %v5513_v59, %s5125_s22  ;;  %v8619_v58 = vld [vmem:[#allocation13_spill] sm:$0xff] }
 0x14e   : > { %v6024_v59 = vld [vmem:[%s5229_s17 + $0x18a] sm:$0xff] }
 0x14f   : > { %v6007_v54 = vpop.permute.xlu1 %985  ;;  %v6009_v55 = vpop.permute.xlu0 %983 }
 0x151   : > { %1165 = vrot.lane.b32.xlu1 %v8616_v51, %s5125_s22  ;;  %1163 = vrot.lane.b32.xlu0 %v8617_v56, %s5125_s22 }
 0x153   : > { %v6015_v57 = vpop.permute.xlu1 %989  ;;  %v6017_v52 = vpop.permute.xlu0 %987 }
 0x155   : > { %1169 = vrot.lane.b32.xlu1 %v8618_v53, %s5125_s22  ;;  %1167 = vrot.lane.b32.xlu0 %v8619_v58, %s5125_s22  ;;  %v8620_v58 = vld [vmem:[#allocation20_spill] sm:$0xff] }
 0x157   : > { %v6029_v49 = vpop.permute.xlu1 %993  ;;  %v6031_v51 = vpop.permute.xlu0 %991 }
 0x159   : > { %1173 = vrot.lane.b32.xlu1 %v6024_v59, %s5125_s22  ;;  %1171 = vrot.lane.b32.xlu0 %v6027_v50, %s5125_s22  ;;  %s5132_s22 = smov 56  }
 0x15b   : > { %v6037_v56 = vpop.permute.xlu1 %997  ;;  %v6039_v53 = vpop.permute.xlu0 %995 }
 0x15d   : > { %1241 = vrot.lane.b32.xlu1 %v8620_v58, %s5126_s23  ;;  %1239 = vrot.lane.b32.xlu0 %v8621_v48, %s5126_s23  ;;  %v8627_v58 = vld [vmem:[#allocation29_spill] sm:$0xff] }
 0x15f   : > { %v6045_v17 = vpop.permute.xlu1 %1001  ;;  %v6047_v16 = vpop.permute.xlu0 %999 }
 0x161   : > { %1245 = vrot.lane.b32.xlu1 %v8622_v47, %s5126_s23  ;;  %1243 = vrot.lane.b32.xlu0 %v8623_v46, %s5126_s23  ;;  %v8631_v47 = vld [vmem:[#allocation33_spill] sm:$0xff] }
 0x163   : > { %v6053_v15 = vpop.permute.xlu1 %1005  ;;  %v6055_v14 = vpop.permute.xlu0 %1003 }
 0x164   : > { %8624 = vst [vmem:[#allocation8_spill] sm:$0xff] %v6053_v15  ;;  %8625 = vst [vmem:[#allocation9_spill] sm:$0xff] %v6055_v14 }
 0x165   : > { %1249 = vrot.lane.b32.xlu1 %v8626_v45, %s5126_s23  ;;  %1247 = vrot.lane.b32.xlu0 %v8627_v58, %s5126_s23  ;;  %v8635_v45 = vld [vmem:[#allocation37_spill] sm:$0xff] }
 0x167   : > { %v6061_v48 = vpop.permute.xlu1 %1009  ;;  %v6063_v44 = vpop.permute.xlu0 %1007 }
 0x168   : > { %8628 = vst [vmem:[#allocation12_spill] sm:$0xff] %v6061_v48  ;;  %8629 = vst [vmem:[#allocation13_spill] sm:$0xff] %v6063_v44  ;;  %v4618_v48 = vld [vmem:[%s5229_s17 + $0x7a] sm:$0xff] }
 0x169   : > { %1253 = vrot.lane.b32.xlu1 %v8630_v13, %s5126_s23  ;;  %1251 = vrot.lane.b32.xlu0 %v8631_v47, %s5126_s23  ;;  %v8639_v13 = vld [vmem:[#allocation41_spill] sm:$0xff] }
 0x16b   : > { %v6069_v46 = vpop.permute.xlu1 %1013  ;;  %v6071_v12 = vpop.permute.xlu0 %1011 }
 0x16c   : > { %8632 = vst [vmem:[#allocation20_spill] sm:$0xff] %v6069_v46  ;;  %8633 = vst [vmem:[#allocation21_spill] sm:$0xff] %v6071_v12  ;;  %v4590_v46 = vld [vmem:[%s5229_s17 + $0xa9] sm:$0xff] }
 0x16d   : > { %1257 = vrot.lane.b32.xlu1 %v8634_v43, %s5126_s23  ;;  %1255 = vrot.lane.b32.xlu0 %v8635_v45, %s5126_s23  ;;  %v8643_v43 = vld [vmem:[#allocation45_spill] sm:$0xff] }
 0x16f   : > { %v6077_v58 = vpop.permute.xlu1 %1017  ;;  %v6079_v42 = vpop.permute.xlu0 %1015 }
 0x170   : > { %8636 = vst [vmem:[#allocation24_spill] sm:$0xff] %v6077_v58  ;;  %8637 = vst [vmem:[#allocation25_spill] sm:$0xff] %v6079_v42  ;;  %v4584_v58 = vld [vmem:[%s5229_s17 + $0x61] sm:$0xff] }
 0x171   : > { %1261 = vrot.lane.b32.xlu1 %v8638_v11, %s5126_s23  ;;  %1259 = vrot.lane.b32.xlu0 %v8639_v13, %s5126_s23  ;;  %v8647_v11 = vld [vmem:[#allocation49_spill] sm:$0xff] }
 0x173   : > { %v6085_v47 = vpop.permute.xlu1 %1021  ;;  %v6087_v10 = vpop.permute.xlu0 %1019 }
 0x174   : > { %8640 = vst [vmem:[#allocation28_spill] sm:$0xff] %v6085_v47  ;;  %8641 = vst [vmem:[#allocation29_spill] sm:$0xff] %v6087_v10  ;;  %v8650_v10 = vld [vmem:[#allocation52_spill] sm:$0xff] }
 0x175   : > { %1265 = vrot.lane.b32.xlu1 %v8642_v41, %s5126_s23  ;;  %1263 = vrot.lane.b32.xlu0 %v8643_v43, %s5126_s23  ;;  %v8651_v41 = vld [vmem:[#allocation53_spill] sm:$0xff] }
 0x177   : > { %v6093_v45 = vpop.permute.xlu1 %1025  ;;  %v6095_v40 = vpop.permute.xlu0 %1023 }
 0x178   : > { %8644 = vst [vmem:[#allocation32_spill] sm:$0xff] %v6093_v45  ;;  %8645 = vst [vmem:[#allocation33_spill] sm:$0xff] %v6095_v40  ;;  %v8654_v40 = vld [vmem:[#allocation56_spill] sm:$0xff] }
 0x179   : > { %1269 = vrot.lane.b32.xlu1 %v8646_v9, %s5126_s23  ;;  %1267 = vrot.lane.b32.xlu0 %v8647_v11, %s5126_s23  ;;  %v8655_v9 = vld [vmem:[#allocation57_spill] sm:$0xff] }
 0x17b   : > { %v6101_v13 = vpop.permute.xlu1 %1029  ;;  %v6103_v47 = vpop.permute.xlu0 %1027 }
 0x17c   : > { %8648 = vst [vmem:[#allocation36_spill] sm:$0xff] %v6101_v13  ;;  %8649 = vst [vmem:[#allocation37_spill] sm:$0xff] %v6103_v47  ;;  %v8658_v47 = vld [vmem:[#allocation60_spill] sm:$0xff] }
 0x17d   : > { %1273 = vrot.lane.b32.xlu1 %v8650_v10, %s5126_s23  ;;  %1271 = vrot.lane.b32.xlu0 %v8651_v41, %s5126_s23  ;;  %v8659_v10 = vld [vmem:[#allocation61_spill] sm:$0xff] }
 0x17f   : > { %v6109_v43 = vpop.permute.xlu1 %1033  ;;  %v6111_v45 = vpop.permute.xlu0 %1031 }
 0x180   : > { %8652 = vst [vmem:[#allocation40_spill] sm:$0xff] %v6109_v43  ;;  %8653 = vst [vmem:[#allocation41_spill] sm:$0xff] %v6111_v45 }
 0x181   : > { %1277 = vrot.lane.b32.xlu1 %v8654_v40, %s5126_s23  ;;  %1275 = vrot.lane.b32.xlu0 %v8655_v9, %s5126_s23  ;;  %v8662_v40 = vld [vmem:[#allocation64_spill] sm:$0xff]  ;;  %v8663_v9 = vld [vmem:[#allocation65_spill] sm:$0xff] }
 0x183   : > { %v6117_v11 = vpop.permute.xlu1 %1037  ;;  %v6119_v13 = vpop.permute.xlu0 %1035 }
 0x184   : > { %8656 = vst [vmem:[#allocation44_spill] sm:$0xff] %v6117_v11  ;;  %8657 = vst [vmem:[#allocation45_spill] sm:$0xff] %v6119_v13 }
 0x185   : > { %1281 = vrot.lane.b32.xlu1 %v8658_v47, %s5126_s23  ;;  %1279 = vrot.lane.b32.xlu0 %v8659_v10, %s5126_s23  ;;  %v8666_v47 = vld [vmem:[#allocation68_spill] sm:$0xff]  ;;  %v8667_v10 = vld [vmem:[#allocation69_spill] sm:$0xff] }
 0x187   : > { %v6125_v41 = vpop.permute.xlu1 %1041  ;;  %v6127_v45 = vpop.permute.xlu0 %1039 }
 0x188   : > { %8660 = vst [vmem:[#allocation48_spill] sm:$0xff] %v6125_v41  ;;  %8661 = vst [vmem:[#allocation49_spill] sm:$0xff] %v6127_v45 }
 0x189   : > { %1285 = vrot.lane.b32.xlu1 %v8662_v40, %s5126_s23  ;;  %1283 = vrot.lane.b32.xlu0 %v8663_v9, %s5126_s23 }
 0x18b   : > { %v6133_v11 = vpop.permute.xlu1 %1045  ;;  %v6135_v13 = vpop.permute.xlu0 %1043 }
 0x18c   : > { %8664 = vst [vmem:[#allocation52_spill] sm:$0xff] %v6133_v11  ;;  %8665 = vst [vmem:[#allocation53_spill] sm:$0xff] %v6135_v13  ;;  %v4580_v11 = vld [vmem:[%s5229_s17 + $0x31] sm:$0xff] }
 0x18d   : > { %1289 = vrot.lane.b32.xlu1 %v8666_v47, %s5126_s23  ;;  %1287 = vrot.lane.b32.xlu0 %v8667_v10, %s5126_s23  ;;  %v4579_v47 = vld [vmem:[%s5229_s17 + $0x1a0] sm:$0xff]  ;;  %v4578_v10 = vld [vmem:[%s5229_s17 + $0x198] sm:$0xff] }
 0x18f   : > { %v6141_v45 = vpop.permute.xlu1 %1113  ;;  %v6143_v41 = vpop.permute.xlu0 %1111 }
 0x191   : > { %1293 = vrot.lane.b32.xlu1 %v5746_v33, %s5126_s23  ;;  %1291 = vrot.lane.b32.xlu0 %v5749_v60, %s5126_s23  ;;  %v4581_v60 = vld [vmem:[%s5229_s17 + $0x39] sm:$0xff] }
 0x193   : > { %v6149_v40 = vpop.permute.xlu1 %1117  ;;  %v6151_v9 = vpop.permute.xlu0 %1115 }
 0x195   : > { %1297 = vrot.lane.b32.xlu1 %v5756_v1, %s5126_s23  ;;  %1295 = vrot.lane.b32.xlu0 %v5759_v61, %s5126_s23  ;;  %v4583_v61 = vld [vmem:[%s5229_s17 + $0x51] sm:$0xff] }
 0x197   : > { %v6159_v13 = vpop.permute.xlu1 %1121  ;;  %v6161_v33 = vpop.permute.xlu0 %1119 }
 0x199   : > { %1301 = vrot.lane.b32.xlu1 %v4579_v47, %s5126_s23  ;;  %1299 = vrot.lane.b32.xlu0 %v4578_v10, %s5126_s23  ;;  %v4585_v10 = vld [vmem:[%s5229_s17 + $0x69] sm:$0xff] }
 0x19b   : > { %v6167_v43 = vpop.permute.xlu1 %1125  ;;  %v6169_v1 = vpop.permute.xlu0 %1123 }
 0x19d   : > { %1369 = vrot.lane.b32.xlu1 %v4581_v60, %s5127_s29  ;;  %1367 = vrot.lane.b32.xlu0 %v4580_v11, %s5127_s29  ;;  %v4587_v11 = vld [vmem:[%s5229_s17 + $0x81] sm:$0xff] }
 0x19f   : > { %v6175_v42 = vpop.permute.xlu1 %1129  ;;  %v6177_v47 = vpop.permute.xlu0 %1127 }
 0x1a1   : > { %1373 = vrot.lane.b32.xlu1 %v4583_v61, %s5127_s29  ;;  %1371 = vrot.lane.b32.xlu0 %v4582_v8, %s5127_s29  ;;  %v4589_v8 = vld [vmem:[%s5229_s17 + $0x99] sm:$0xff] }
 0x1a3   : > { %v6183_v39 = vpop.permute.xlu1 %1133  ;;  %v6185_v60 = vpop.permute.xlu0 %1131 }
 0x1a4   : > { %8668 = vst [vmem:[#allocation56_spill] sm:$0xff] %v6183_v39  ;;  %8669 = vst [vmem:[#allocation57_spill] sm:$0xff] %v6185_v60 }
 0x1a5   : > { %1377 = vrot.lane.b32.xlu1 %v4585_v10, %s5127_s29  ;;  %1375 = vrot.lane.b32.xlu0 %v4584_v58, %s5127_s29  ;;  %v4591_v58 = vld [vmem:[%s5229_s17 + $0xb1] sm:$0xff] }
 0x1a7   : > { %v6191_v7 = vpop.permute.xlu1 %1137  ;;  %v6193_v61 = vpop.permute.xlu0 %1135 }
 0x1a8   : > { %8670 = vst [vmem:[#allocation60_spill] sm:$0xff] %v6191_v7  ;;  %8671 = vst [vmem:[#allocation61_spill] sm:$0xff] %v6193_v61  ;;  %v4616_v7 = vld [vmem:[%s5229_s17 + $0x62] sm:$0xff] }
 0x1a9   : > { %1381 = vrot.lane.b32.xlu1 %v4587_v11, %s5127_s29  ;;  %1379 = vrot.lane.b32.xlu0 %v4586_v38, %s5127_s29  ;;  %v4593_v38 = vld [vmem:[%s5229_s17 + $0xc9] sm:$0xff] }
 0x1ab   : > { %v6199_v12 = vpop.permute.xlu1 %1141  ;;  %v6201_v10 = vpop.permute.xlu0 %1139 }
 0x1ac   : > { %8672 = vst [vmem:[#allocation64_spill] sm:$0xff] %v6199_v12  ;;  %8673 = vst [vmem:[#allocation65_spill] sm:$0xff] %v6201_v10  ;;  %v4592_v12 = vld [vmem:[%s5229_s17 + $0xc1] sm:$0xff] }
 0x1ad   : > { %1385 = vrot.lane.b32.xlu1 %v4589_v8, %s5127_s29  ;;  %1383 = vrot.lane.b32.xlu0 %v4588_v6, %s5127_s29  ;;  %v4595_v6 = vld [vmem:[%s5229_s17 + $0xe1] sm:$0xff] }
 0x1af   : > { %v6207_v37 = vpop.permute.xlu1 %1145  ;;  %v6209_v11 = vpop.permute.xlu0 %1143 }
 0x1b0   : > { %8674 = vst [vmem:[#allocation68_spill] sm:$0xff] %v6207_v37  ;;  %8675 = vst [vmem:[#allocation69_spill] sm:$0xff] %v6209_v11  ;;  %v4594_v37 = vld [vmem:[%s5229_s17 + $0xd9] sm:$0xff] }
 0x1b1   : > { %1389 = vrot.lane.b32.xlu1 %v4591_v58, %s5127_s29  ;;  %1387 = vrot.lane.b32.xlu0 %v4590_v46, %s5127_s29  ;;  %v4597_v46 = vld [vmem:[%s5229_s17 + $0xf9] sm:$0xff] }
 0x1b3   : > { %v6215_v10 = vpop.permute.xlu1 %1149  ;;  %v6217_v8 = vpop.permute.xlu0 %1147 }
 0x1b4   : > { %8676 = vst [vmem:[#allocation118_spill] sm:$0xff] %v6215_v10  ;;  %8677 = vst [vmem:[#allocation119_spill] sm:$0xff] %v6217_v8  ;;  %v4596_v10 = vld [vmem:[%s5229_s17 + $0xf1] sm:$0xff] }
 0x1b5   : > { %1393 = vrot.lane.b32.xlu1 %v4593_v38, %s5127_s29  ;;  %1391 = vrot.lane.b32.xlu0 %v4592_v12, %s5127_s29  ;;  %v4599_v12 = vld [vmem:[%s5229_s17 + $0x111] sm:$0xff]  ;;  %v4598_v38 = vld [vmem:[%s5229_s17 + $0x109] sm:$0xff] }
 0x1b7   : > { %v6223_v11 = vpop.permute.xlu1 %1153  ;;  %v6225_v58 = vpop.permute.xlu0 %1151 }
 0x1b8   : > { %8678 = vst [vmem:[#allocation120_spill] sm:$0xff] %v6223_v11  ;;  %8679 = vst [vmem:[#allocation121_spill] sm:$0xff] %v6225_v58 }
 0x1b9   : > { %1397 = vrot.lane.b32.xlu1 %v4595_v6, %s5127_s29  ;;  %1395 = vrot.lane.b32.xlu0 %v4594_v37, %s5127_s29  ;;  %v4601_v37 = vld [vmem:[%s5229_s17 + $0x129] sm:$0xff]  ;;  %v4600_v6 = vld [vmem:[%s5229_s17 + $0x121] sm:$0xff] }
 0x1bb   : > { %v6231_v8 = vpop.permute.xlu1 %1157  ;;  %v6233_v36 = vpop.permute.xlu0 %1155 }
 0x1bc   : > { %8680 = vst [vmem:[#allocation122_spill] sm:$0xff] %v6231_v8  ;;  %8681 = vst [vmem:[#allocation123_spill] sm:$0xff] %v6233_v36 }
 0x1bd   : > { %1401 = vrot.lane.b32.xlu1 %v4597_v46, %s5127_s29  ;;  %1399 = vrot.lane.b32.xlu0 %v4596_v10, %s5127_s29  ;;  %v1855_v10 = vld [vmem:[%s8457_s1] sm:$0xff] }
 0x1bf   : > { %v6239_v58 = vpop.permute.xlu1 %1161  ;;  %v6241_v11 = vpop.permute.xlu0 %1159 }
 0x1c0   : > { %8682 = vst [vmem:[#allocation124_spill] sm:$0xff] %v6239_v58  ;;  %8683 = vst [vmem:[#allocation125_spill] sm:$0xff] %v6241_v11  ;;  %v4602_v11 = vld [vmem:[%s5229_s17 + $0x139] sm:$0xff] }
 0x1c1   : > { %1405 = vrot.lane.b32.xlu1 %v4599_v12, %s5127_s29  ;;  %1403 = vrot.lane.b32.xlu0 %v4598_v38, %s5127_s29  ;;  %v1856_v12 = vld [vmem:[%s8457_s1 + $0x8] sm:$0xff] }
 0x1c2   : > { %v4603_v38 = vld [vmem:[%s5229_s17 + $0x141] sm:$0xff]  ;;  %v4919_v58 = vpack.c.bf16 %v1856_v12, %v1855_v10  ;;  %v4605_v10 = vld [vmem:[%s5229_s17 + $0x159] sm:$0xff]  ;;  %v4604_v12 = vld [vmem:[%s5229_s17 + $0x151] sm:$0xff] }
 0x1c3   : > { %v6247_v8 = vpop.permute.xlu1 %1165  ;;  %v6249_v46 = vpop.permute.xlu0 %1163 }
 0x1c4   : > { %8684 = vst [vmem:[#allocation126_spill] sm:$0xff] %v6247_v8  ;;  %8685 = vst [vmem:[#allocation127_spill] sm:$0xff] %v6249_v46  ;;  %4920 = vmatprep.subr.bf16.mxu0 %v4919_v58 }
 0x1c5   : > { %1409 = vrot.lane.b32.xlu1 %v4601_v37, %s5127_s29  ;;  %1407 = vrot.lane.b32.xlu0 %v4600_v6, %s5127_s29  ;;  %v1857_v37 = vld [vmem:[%s8457_s1 + $0x10] sm:$0xff]  ;;  %v1858_v6 = vld [vmem:[%s8457_s1 + $0x18] sm:$0xff] }
 0x1c6   : > { %4922 = vmatpush3.bf16.msra.mxu0 %v4919_v58  ;;  %v1859_v58 = vld [vmem:[%s8457_s1 + $0x20] sm:$0xf] }
 0x1c7   : > { %v6261_v8 = vpop.permute.xlu1 %1169  ;;  %v6263_v46 = vpop.permute.xlu0 %1167 }
 0x1c8   : > { %8686 = vst [vmem:[#allocation128_spill] sm:$0xff] %v6261_v8  ;;  %8687 = vst [vmem:[#allocation129_spill] sm:$0xff] %v6263_v46  ;;  %v4923_v8 = vpack.c.bf16 %v1858_v6, %v1857_v37  ;;  %v4611_v6 = vld [vmem:[%s5229_s17 + $0x1a1] sm:$0xff] }
 0x1c9   : > { %1413 = vrot.lane.b32.xlu1 %v4603_v38, %s5127_s29  ;;  %1411 = vrot.lane.b32.xlu0 %v4602_v11, %s5127_s29  ;;  %v4607_v11 = vld [vmem:[%s5229_s17 + $0x171] sm:$0xff]  ;;  %v4606_v38 = vld [vmem:[%s5229_s17 + $0x169] sm:$0xff] }
 0x1ca   : > { %4924 = vmatprep.subr.bf16.mxu0 %v4923_v8 }
 0x1cb   : > { %v6275_v36 = vpop.permute.xlu1 %1173  ;;  %v6277_v46 = vpop.permute.xlu0 %1171  ;;  %4926 = vmatpush3.bf16.msra.mxu0 %v4923_v8 }
 0x1cc   : > { %8688 = vst [vmem:[#allocation130_spill] sm:$0xff] %v6275_v36  ;;  %8689 = vst [vmem:[#allocation131_spill] sm:$0xff] %v6277_v46  ;;  %4803 = vmatprep.subr.msk.mxu0 %vm1957_vm0, %v1859_v58  ;;  %v4614_v36 = vld [vmem:[%s5229_s17 + $0x4a] sm:$0xff] }
 0x1cd   : > { %1417 = vrot.lane.b32.xlu1 %v4605_v10, %s5127_s29  ;;  %1415 = vrot.lane.b32.xlu0 %v4604_v12, %s5127_s29  ;;  %v4610_v10 = vld [vmem:[%s5229_s17 + $0x199] sm:$0xff] }
 0x1cf   : > { %v6283_v5 = vpop.permute.xlu1 %1241  ;;  %v6285_v4 = vpop.permute.xlu0 %1239  ;;  %4804 = vmatpush3.msk.msra.mxu0 %vm1957_vm0, %v1859_v58  ;;  %v4612_v58 = vld [vmem:[%s5229_s17 + $0x32] sm:$0xff] }
 0x1d1   : > { %1421 = vrot.lane.b32.xlu1 %v4607_v11, %s5127_s29  ;;  %1419 = vrot.lane.b32.xlu0 %v4606_v38, %s5127_s29  ;;  %v4613_v38 = vld [vmem:[%s5229_s17 + $0x3a] sm:$0xff] }
 0x1d3   : > { %v6292_v37 = vpop.permute.xlu1 %1245  ;;  %v6294_v8 = vpop.permute.xlu0 %1243 }
 0x1d5   : > { %1425 = vrot.lane.b32.xlu1 %v5890_v26, %s5127_s29  ;;  %1423 = vrot.lane.b32.xlu0 %v5893_v27, %s5127_s29  ;;  %v4615_v27 = vld [vmem:[%s5229_s17 + $0x52] sm:$0xff] }
 0x1d7   : > { %v6302_v12 = vpop.permute.xlu1 %1249  ;;  %v6304_v11 = vpop.permute.xlu0 %1247 }
 0x1d9   : > { %1429 = vrot.lane.b32.xlu1 %v4611_v6, %s5127_s29  ;;  %1427 = vrot.lane.b32.xlu0 %v4610_v10, %s5127_s29  ;;  %v4617_v10 = vld [vmem:[%s5229_s17 + $0x6a] sm:$0xff] }
 0x1db   : > { %v6310_v46 = vpop.permute.xlu1 %1253  ;;  %v6312_v26 = vpop.permute.xlu0 %1251 }
 0x1dd   : > { %1497 = vrot.lane.b32.xlu1 %v4613_v38, %s5128_s9  ;;  %1495 = vrot.lane.b32.xlu0 %v4612_v58, %s5128_s9  ;;  %v4619_v58 = vld [vmem:[%s5229_s17 + $0x82] sm:$0xff] }
 0x1df   : > { %v6318_v61 = vpop.permute.xlu1 %1257  ;;  %v6320_v6 = vpop.permute.xlu0 %1255 }
 0x1e0   : > { %8690 = vst [vmem:[#allocation132_spill] sm:$0xff] %v6318_v61  ;;  %8691 = vst [vmem:[#allocation133_spill] sm:$0xff] %v6320_v6  ;;  %v5009_v6 = vld [vmem:[%s5229_s17 + $0x18] sm:$0xff] }
 0x1e1   : > { %1501 = vrot.lane.b32.xlu1 %v4615_v27, %s5128_s9  ;;  %1499 = vrot.lane.b32.xlu0 %v4614_v36, %s5128_s9  ;;  %v4621_v36 = vld [vmem:[%s5229_s17 + $0x9a] sm:$0xff] }
 0x1e3   : > { %v6326_v44 = vpop.permute.xlu1 %1261  ;;  %v6328_v38 = vpop.permute.xlu0 %1259 }
 0x1e4   : > { %8692 = vst [vmem:[#allocation134_spill] sm:$0xff] %v6326_v44  ;;  %8693 = vst [vmem:[#allocation135_spill] sm:$0xff] %v6328_v38 }
 0x1e5   : > { %1505 = vrot.lane.b32.xlu1 %v4617_v10, %s5128_s9  ;;  %1503 = vrot.lane.b32.xlu0 %v4616_v7, %s5128_s9  ;;  %v4623_v7 = vld [vmem:[%s5229_s17 + $0xb2] sm:$0xff] }
 0x1e7   : > { %v6334_v35 = vpop.permute.xlu1 %1265  ;;  %v6336_v27 = vpop.permute.xlu0 %1263 }
 0x1e8   : > { %8694 = vst [vmem:[#allocation136_spill] sm:$0xff] %v6334_v35  ;;  %8695 = vst [vmem:[#allocation137_spill] sm:$0xff] %v6336_v27  ;;  %v4622_v35 = vld [vmem:[%s5229_s17 + $0xaa] sm:$0xff] }
 0x1e9   : > { %1509 = vrot.lane.b32.xlu1 %v4619_v58, %s5128_s9  ;;  %1507 = vrot.lane.b32.xlu0 %v4618_v48, %s5128_s9  ;;  %v4625_v48 = vld [vmem:[%s5229_s17 + $0xca] sm:$0xff] }
 0x1eb   : > { %v6342_v38 = vpop.permute.xlu1 %1269  ;;  %v6344_v10 = vpop.permute.xlu0 %1267 }
 0x1ec   : > { %8696 = vst [vmem:[#allocation138_spill] sm:$0xff] %v6342_v38  ;;  %8697 = vst [vmem:[#allocation139_spill] sm:$0xff] %v6344_v10  ;;  %v4624_v38 = vld [vmem:[%s5229_s17 + $0xc2] sm:$0xff] }
 0x1ed   : > { %1513 = vrot.lane.b32.xlu1 %v4621_v36, %s5128_s9  ;;  %1511 = vrot.lane.b32.xlu0 %v4620_v34, %s5128_s9  ;;  %v4627_v34 = vld [vmem:[%s5229_s17 + $0xe2] sm:$0xff] }
 0x1ef   : > { %v6350_v27 = vpop.permute.xlu1 %1273  ;;  %v6352_v58 = vpop.permute.xlu0 %1271 }
 0x1f0   : > { %8698 = vst [vmem:[#allocation140_spill] sm:$0xff] %v6350_v27  ;;  %8699 = vst [vmem:[#allocation141_spill] sm:$0xff] %v6352_v58  ;;  %v4626_v27 = vld [vmem:[%s5229_s17 + $0xda] sm:$0xff] }
 0x1f1   : > { %1517 = vrot.lane.b32.xlu1 %v4623_v7, %s5128_s9  ;;  %1515 = vrot.lane.b32.xlu0 %v4622_v35, %s5128_s9  ;;  %v4629_v35 = vld [vmem:[%s5229_s17 + $0xfa] sm:$0xff] }
 0x1f3   : > { %v6358_v10 = vpop.permute.xlu1 %1277  ;;  %v6360_v36 = vpop.permute.xlu0 %1275 }
 0x1f4   : > { %8700 = vst [vmem:[#allocation142_spill] sm:$0xff] %v6358_v10  ;;  %8701 = vst [vmem:[#allocation143_spill] sm:$0xff] %v6360_v36  ;;  %v4628_v10 = vld [vmem:[%s5229_s17 + $0xf2] sm:$0xff] }
 0x1f5   : > { %1521 = vrot.lane.b32.xlu1 %v4625_v48, %s5128_s9  ;;  %1519 = vrot.lane.b32.xlu0 %v4624_v38, %s5128_s9  ;;  %v4631_v38 = vld [vmem:[%s5229_s17 + $0x112] sm:$0xff] }
 0x1f7   : > { %v6366_v58 = vpop.permute.xlu1 %1281  ;;  %v6368_v7 = vpop.permute.xlu0 %1279 }
 0x1f8   : > { %8702 = vst [vmem:[#allocation144_spill] sm:$0xff] %v6366_v58  ;;  %8703 = vst [vmem:[#allocation145_spill] sm:$0xff] %v6368_v7  ;;  %v4630_v58 = vld [vmem:[%s5229_s17 + $0x10a] sm:$0xff] }
 0x1f9   : > { %1525 = vrot.lane.b32.xlu1 %v4627_v34, %s5128_s9  ;;  %1523 = vrot.lane.b32.xlu0 %v4626_v27, %s5128_s9  ;;  %v4633_v27 = vld [vmem:[%s5229_s17 + $0x12a] sm:$0xff] }
 0x1fb   : > { %v6374_v36 = vpop.permute.xlu1 %1285  ;;  %v6376_v48 = vpop.permute.xlu0 %1283 }
 0x1fc   : > { %8704 = vst [vmem:[#allocation146_spill] sm:$0xff] %v6374_v36  ;;  %8705 = vst [vmem:[#allocation147_spill] sm:$0xff] %v6376_v48  ;;  %v4632_v36 = vld [vmem:[%s5229_s17 + $0x122] sm:$0xff] }
 0x1fd   : > { %1529 = vrot.lane.b32.xlu1 %v4629_v35, %s5128_s9  ;;  %1527 = vrot.lane.b32.xlu0 %v4628_v10, %s5128_s9  ;;  %v4635_v10 = vld [vmem:[%s5229_s17 + $0x142] sm:$0xff] }
 0x1ff   : > { %v6382_v7 = vpop.permute.xlu1 %1289  ;;  %v6384_v34 = vpop.permute.xlu0 %1287 }
 0x200   : > { %8706 = vst [vmem:[#allocation148_spill] sm:$0xff] %v6382_v7  ;;  %8707 = vst [vmem:[#allocation149_spill] sm:$0xff] %v6384_v34  ;;  %v4634_v7 = vld [vmem:[%s5229_s17 + $0x13a] sm:$0xff] }
 0x201   : > { %1533 = vrot.lane.b32.xlu1 %v4631_v38, %s5128_s9  ;;  %1531 = vrot.lane.b32.xlu0 %v4630_v58, %s5128_s9  ;;  %v4637_v58 = vld [vmem:[%s5229_s17 + $0x15a] sm:$0xff]  ;;  %v4636_v38 = vld [vmem:[%s5229_s17 + $0x152] sm:$0xff] }
 0x203   : > { %v6390_v48 = vpop.permute.xlu1 %1293  ;;  %v6392_v35 = vpop.permute.xlu0 %1291 }
 0x204   : > { %8708 = vst [vmem:[#allocation150_spill] sm:$0xff] %v6390_v48  ;;  %8709 = vst [vmem:[#allocation151_spill] sm:$0xff] %v6392_v35 }
 0x205   : > { %1537 = vrot.lane.b32.xlu1 %v4633_v27, %s5128_s9  ;;  %1535 = vrot.lane.b32.xlu0 %v4632_v36, %s5128_s9  ;;  %v4639_v36 = vld [vmem:[%s5229_s17 + $0x172] sm:$0xff]  ;;  %v4638_v27 = vld [vmem:[%s5229_s17 + $0x16a] sm:$0xff] }
 0x207   : > { %v6398_v34 = vpop.permute.xlu1 %1297  ;;  %v6400_v44 = vpop.permute.xlu0 %1295 }
 0x208   : > { %8710 = vst [vmem:[#allocation152_spill] sm:$0xff] %v6398_v34  ;;  %8711 = vst [vmem:[#allocation153_spill] sm:$0xff] %v6400_v44 }
 0x209   : > { %1541 = vrot.lane.b32.xlu1 %v4635_v10, %s5128_s9  ;;  %1539 = vrot.lane.b32.xlu0 %v4634_v7, %s5128_s9 }
 0x20b   : > { %v6406_v35 = vpop.permute.xlu1 %1301  ;;  %v6408_v48 = vpop.permute.xlu0 %1299 }
 0x20c   : > { %8712 = vst [vmem:[#allocation154_spill] sm:$0xff] %v6406_v35  ;;  %8713 = vst [vmem:[#allocation155_spill] sm:$0xff] %v6408_v48 }
 0x20d   : > { %1545 = vrot.lane.b32.xlu1 %v4637_v58, %s5128_s9  ;;  %1543 = vrot.lane.b32.xlu0 %v4636_v38, %s5128_s9  ;;  %v4643_v58 = vld [vmem:[%s5229_s17 + $0x1a2] sm:$0xff]  ;;  %v4642_v38 = vld [vmem:[%s5229_s17 + $0x19a] sm:$0xff] }
 0x20f   : > { %v6414_v34 = vpop.permute.xlu1 %1369  ;;  %v6416_v44 = vpop.permute.xlu0 %1367 }
 0x211   : > { %1549 = vrot.lane.b32.xlu1 %v4639_v36, %s5128_s9  ;;  %1547 = vrot.lane.b32.xlu0 %v4638_v27, %s5128_s9 }
 0x213   : > { %v6420_v7 = vpop.permute.xlu1 %1373  ;;  %v6422_v10 = vpop.permute.xlu0 %1371 }
 0x215   : > { %1553 = vrot.lane.b32.xlu1 %v6024_v59, %s5128_s9  ;;  %1551 = vrot.lane.b32.xlu0 %v6027_v50, %s5128_s9 }
 0x217   : > { %v6430_v48 = vpop.permute.xlu1 %1377  ;;  %v6432_v35 = vpop.permute.xlu0 %1375 }
 0x219   : > { %1557 = vrot.lane.b32.xlu1 %v4643_v58, %s5128_s9  ;;  %1555 = vrot.lane.b32.xlu0 %v4642_v38, %s5128_s9 }
 0x21b   : > { %v6436_v36 = vpop.permute.xlu1 %1381  ;;  %v6438_v27 = vpop.permute.xlu0 %1379 }
 0x21f   : > { %v6440_v2 = vpop.permute.xlu1 %1385  ;;  %v6442_v59 = vpop.permute.xlu0 %1383 }
 0x220   : > { %8714 = vst [vmem:[#allocation156_spill] sm:$0xff] %v6440_v2  ;;  %8715 = vst [vmem:[#allocation157_spill] sm:$0xff] %v6442_v59 }
 0x223   : > { %v6444_v0 = vpop.permute.xlu1 %1389  ;;  %v6446_v50 = vpop.permute.xlu0 %1387 }
 0x224   : > { %8716 = vst [vmem:[#allocation158_spill] sm:$0xff] %v6444_v0  ;;  %8717 = vst [vmem:[#allocation159_spill] sm:$0xff] %v6446_v50 }
 0x227   : > { %v6448_v60 = vpop.permute.xlu1 %1393  ;;  %v6450_v39 = vpop.permute.xlu0 %1391 }
 0x228   : > { %8718 = vst [vmem:[#allocation160_spill] sm:$0xff] %v6448_v60  ;;  %8719 = vst [vmem:[#allocation161_spill] sm:$0xff] %v6450_v39 }
 0x22b   : > { %v6452_v58 = vpop.permute.xlu1 %1397  ;;  %v6454_v38 = vpop.permute.xlu0 %1395 }
 0x22c   : > { %8720 = vst [vmem:[#allocation162_spill] sm:$0xff] %v6452_v58  ;;  %8721 = vst [vmem:[#allocation163_spill] sm:$0xff] %v6454_v38  ;;  %v8739_v38 = vld [vmem:[#allocation67_spill] sm:$0xff] }
 0x22f   : > { %v6456_v14 = vpop.permute.xlu1 %1401  ;;  %v6458_v15 = vpop.permute.xlu0 %1399 }
 0x230   : > { %8722 = vst [vmem:[#allocation164_spill] sm:$0xff] %v6456_v14  ;;  %8723 = vst [vmem:[#allocation165_spill] sm:$0xff] %v6458_v15 }
 0x233   : > { %v6460_v2 = vpop.permute.xlu1 %1405  ;;  %v6462_v59 = vpop.permute.xlu0 %1403 }
 0x234   : > { %8724 = vst [vmem:[#allocation166_spill] sm:$0xff] %v6460_v2  ;;  %8725 = vst [vmem:[#allocation167_spill] sm:$0xff] %v6462_v59  ;;  %v277_v2 = vld [vmem:[%s5229_s17] sm:$0xff]  ;;  %v278_v59 = vld [vmem:[%s5229_s17 + $0x8] sm:$0xff] }
 0x237   : > { %v6464_v0 = vpop.permute.xlu1 %1409  ;;  %v6466_v50 = vpop.permute.xlu0 %1407 }
 0x238   : > { %8726 = vst [vmem:[#allocation168_spill] sm:$0xff] %v6464_v0  ;;  %8727 = vst [vmem:[#allocation169_spill] sm:$0xff] %v6466_v50 }
 0x23b   : > { %v6468_v60 = vpop.permute.xlu1 %1413  ;;  %v6470_v39 = vpop.permute.xlu0 %1411 }
 0x23c   : > { %8728 = vst [vmem:[#allocation170_spill] sm:$0xff] %v6468_v60  ;;  %8729 = vst [vmem:[#allocation171_spill] sm:$0xff] %v6470_v39  ;;  %v8736_v39 = vld [vmem:[#allocation7_spill] sm:$0xff] }
 0x23d   : > { %v8737_v60 = vld [vmem:[#allocation11_spill] sm:$0xff] }
 0x23f   : > { %v6472_v58 = vpop.permute.xlu1 %1417  ;;  %v6474_v18 = vpop.permute.xlu0 %1415 }
 0x240   : > { %8730 = vst [vmem:[#allocation172_spill] sm:$0xff] %v6472_v58  ;;  %8731 = vst [vmem:[#allocation173_spill] sm:$0xff] %v6474_v18  ;;  %v1592_v58 = vsel %vm1591_vm1, %v277_v2, %v8736_v39  ;;  %v1593_v18 = vsel %vm1591_vm1, %v278_v59, %v8737_v60 }
 0x241   : > { %v1625_v19 = vsel %vm1624_vm2, %v1592_v58, %v8739_v38 }
 0x242   : > { %v1658_v2 = vsel %vm1657_vm3, %v1625_v19, %v5875_v23 }
 0x243   : > { %v6476_v14 = vpop.permute.xlu1 %1421  ;;  %v6478_v15 = vpop.permute.xlu0 %1419 }
 0x244   : > { %8732 = vst [vmem:[#allocation174_spill] sm:$0xff] %v6476_v14  ;;  %8733 = vst [vmem:[#allocation175_spill] sm:$0xff] %v6478_v15  ;;  %v8738_v14 = vld [vmem:[#allocation66_spill] sm:$0xff] }
 0x245   : > { %v1626_v15 = vsel %vm1624_vm2, %v1593_v18, %v8738_v14  ;;  %v5010_v14 = vld [vmem:[%s5229_s17 + $0x20] sm:$0xff]  ;;  %v8741_v18 = vld [vmem:[#allocation10_spill] sm:$0xff] }
 0x246   : > { %v1595_v59 = vsel %vm1591_vm1, %v5010_v14, %v8741_v18 }
 0x247   : > { %v6482_v0 = vpop.permute.xlu1 %1425  ;;  %v6484_v50 = vpop.permute.xlu0 %1423 }
 0x248   : > { %8734 = vst [vmem:[#allocation176_spill] sm:$0xff] %v6482_v0  ;;  %8735 = vst [vmem:[#allocation177_spill] sm:$0xff] %v6484_v50  ;;  %v8740_v0 = vld [vmem:[#allocation6_spill] sm:$0xff]  ;;  %v1659_v50 = vsel %vm1657_vm3, %v1626_v15, %v5873_v22 }
 0x249   : > { %v1594_v61 = vsel %vm1591_vm1, %v5009_v6, %v8740_v0  ;;  %v1692_v58 = vsel %vm1690_vm4, %v1659_v50, %v6007_v54  ;;  %v1691_v0 = vsel %vm1690_vm4, %v1658_v2, %v6009_v55  ;;  %v8742_v15 = vld [vmem:[#allocation70_spill] sm:$0xff]  ;;  %v8743_v6 = vld [vmem:[#allocation71_spill] sm:$0xff] }
 0x24a   : > { %v1628_v22 = vsel %vm1624_vm2, %v1595_v59, %v8742_v15  ;;  %v1725_v19 = vsel %vm1723_vm5, %v1692_v58, %v6141_v45  ;;  %v1724_v23 = vsel %vm1723_vm5, %v1691_v0, %v6143_v41  ;;  %v1627_v38 = vsel %vm1624_vm2, %v1594_v61, %v8743_v6  ;;  %v5011_v59 = vld [vmem:[%s5229_s17 + $0x38] sm:$0xff] }
 0x24b   : > { %v6501_v39 = vpop.permute.xlu1 %1429  ;;  %v6503_v60 = vpop.permute.xlu0 %1427  ;;  %v1758_v54 = vsel %vm1756_vm6, %v1725_v19, %v6283_v5  ;;  %v1757_v55 = vsel %vm1756_vm6, %v1724_v23, %v6285_v4  ;;  %v1661_v50 = vsel %vm1657_vm3, %v1628_v22, %v5881_v24  ;;  %v1660_v45 = vsel %vm1657_vm3, %v1627_v38, %v5883_v25  ;;  %v8744_v25 = vld [vmem:[#allocation14_spill] sm:$0xff]  ;;  %v8745_v0 = vld [vmem:[#allocation15_spill] sm:$0xff]  ;;  %v8747_v19 = vld [vmem:[#allocation73_spill] sm:$0xff] }
 0x24c   : > { %v1791_v41 = vsel %vm1789_vm7, %v1758_v54, %v6414_v34  ;;  %v1790_v61 = vsel %vm1789_vm7, %v1757_v55, %v6416_v44  ;;  %v1694_v5 = vsel %vm1690_vm4, %v1661_v50, %v6015_v57  ;;  %v1693_v4 = vsel %vm1690_vm4, %v1660_v45, %v6017_v52  ;;  %v5012_v34 = vld [vmem:[%s5229_s17 + $0x30] sm:$0xff]  ;;  %v8746_v52 = vld [vmem:[#allocation72_spill] sm:$0xff] }
 0x24d   : > { %v1597_v58 = vsel %vm1591_vm1, %v5011_v59, %v8744_v25  ;;  %v1596_v44 = vsel %vm1591_vm1, %v5012_v34, %v8745_v0  ;;  %v1727_v15 = vsel %vm1723_vm5, %v1694_v5, %v6149_v40  ;;  %v1726_v57 = vsel %vm1723_vm5, %v1693_v4, %v6151_v9 }
 0x24e   : > { %v1630_v22 = vsel %vm1624_vm2, %v1597_v58, %v8746_v52  ;;  %v1629_v23 = vsel %vm1624_vm2, %v1596_v44, %v8747_v19  ;;  %v1760_v6 = vsel %vm1756_vm6, %v1727_v15, %v6292_v37  ;;  %v1759_v38 = vsel %vm1756_vm6, %v1726_v57, %v6294_v8  ;;  %v5015_v57 = vld [vmem:[%s5229_s17 + $0x68] sm:$0xff] }
 0x24f   : > { %v1498_v2 = vpop.permute.xlu1 %1497  ;;  %v1496_v14 = vpop.permute.xlu0 %1495  ;;  %v1663_v40 = vsel %vm1657_vm3, %v1630_v22, %v5895_v21  ;;  %v1662_v9 = vsel %vm1657_vm3, %v1629_v23, %v5897_v28  ;;  %v1793_v54 = vsel %vm1789_vm7, %v1760_v6, %v6420_v7  ;;  %v1792_v55 = vsel %vm1789_vm7, %v1759_v38, %v6422_v10  ;;  %v8748_v28 = vld [vmem:[#allocation16_spill] sm:$0xff]  ;;  %v5014_v7 = vld [vmem:[%s5229_s17 + $0x48] sm:$0xff]  ;;  %v8753_v22 = vld [vmem:[#allocation19_spill] sm:$0xff] }
 0x250   : > { %v1824_v18 = vsel %vm1822_vm8, %v1791_v41, %v1498_v2  ;;  %v1823_v24 = vsel %vm1822_vm8, %v1790_v61, %v1496_v14  ;;  %v1696_v37 = vsel %vm1690_vm4, %v1663_v40, %v6029_v49  ;;  %v1695_v8 = vsel %vm1690_vm4, %v1662_v9, %v6031_v51  ;;  %v5013_v61 = vld [vmem:[%s5229_s17 + $0x50] sm:$0xff]  ;;  %v8749_v14 = vld [vmem:[#allocation17_spill] sm:$0xff] }
 0x251   : > { %4805 = vmatprep.mubr.msk.f32.mxu0 %vm1860_vm9, %v1823_v24  ;;  %v1599_v2 = vsel %vm1591_vm1, %v5013_v61, %v8748_v28  ;;  %v1598_v10 = vsel %vm1591_vm1, %v5014_v7, %v8749_v14  ;;  %v1729_v5 = vsel %vm1723_vm5, %v1696_v37, %v6159_v13  ;;  %v1728_v49 = vsel %vm1723_vm5, %v1695_v8, %v6161_v33  ;;  %v8750_v51 = vld [vmem:[#allocation74_spill] sm:$0xff]  ;;  %v8757_v61 = vld [vmem:[#allocation133_spill] sm:$0xff]  ;;  %v8760_v14 = vld [vmem:[#allocation156_spill] sm:$0xff] }
 0x252   : > { %4806 = vmatmul.mubr.msk.f32.vlgmr.msra.gmra.mrb[0].mxu0 %vm1860_vm9, %v1824_v18  ;;  %v1632_v4 = vsel %vm1624_vm2, %v1599_v2, %v8750_v51  ;;  %v8751_v18 = vld [vmem:[#allocation75_spill] sm:$0xff]  ;;  %v1762_v59 = vsel %vm1756_vm6, %v1729_v5, %v6302_v12  ;;  %v1761_v25 = vsel %vm1756_vm6, %v1728_v49, %v6304_v11  ;;  %v8759_v2 = vld [vmem:[#allocation97_spill] sm:$0xff]  ;;  %v8762_v51 = vld [vmem:[#allocation8_spill] sm:$0xff] }
 0x253   : > { %v1502_v50 = vpop.permute.xlu1 %1501  ;;  %v1500_v45 = vpop.permute.xlu0 %1499  ;;  %v1631_v24 = vsel %vm1624_vm2, %v1598_v10, %v8751_v18  ;;  %v1665_v13 = vsel %vm1657_vm3, %v1632_v4, %v5903_v29  ;;  %v1795_v58 = vsel %vm1789_vm7, %v1762_v59, %v6430_v48  ;;  %v1794_v34 = vsel %vm1789_vm7, %v1761_v25, %v6432_v35  ;;  %v5016_v48 = vld [vmem:[%s5229_s17 + $0x60] sm:$0xff]  ;;  %v8761_v10 = vld [vmem:[#allocation157_spill] sm:$0xff] }
 0x254   : > { %v1826_v41 = vsel %vm1822_vm8, %v1793_v54, %v1502_v50  ;;  %v1825_v21 = vsel %vm1822_vm8, %v1792_v55, %v1500_v45  ;;  %v1664_v33 = vsel %vm1657_vm3, %v1631_v24, %v5905_v30  ;;  %v1698_v12 = vsel %vm1690_vm4, %v1665_v13, %v6037_v56  ;;  %v8752_v30 = vld [vmem:[#allocation18_spill] sm:$0xff]  ;;  %v5017_v55 = vld [vmem:[%s5229_s17 + $0x80] sm:$0xff]  ;;  %v8755_v45 = vld [vmem:[#allocation23_spill] sm:$0xff] }
 0x255   : > { %4808 = vmatprep.mubr.msk.f32.mxu0 %vm1860_vm9, %v1825_v21  ;;  %v1697_v11 = vsel %vm1690_vm4, %v1664_v33, %v6039_v53  ;;  %v1601_v52 = vsel %vm1591_vm1, %v5015_v57, %v8752_v30  ;;  %v1600_v35 = vsel %vm1591_vm1, %v5016_v48, %v8753_v22  ;;  %v1731_v19 = vsel %vm1723_vm5, %v1698_v12, %v6167_v43  ;;  %v8763_v18 = vld [vmem:[#allocation9_spill] sm:$0xff]  ;;  %v5019_v13 = vld [vmem:[%s5229_s17 + $0x98] sm:$0xff]  ;;  %v8764_v33 = vld [vmem:[#allocation26_spill] sm:$0xff] }
 0x256   : > { %4809 = vmatmul.mubr.msk.f32.gmra.mrb[2].mxu0 %vm1860_vm9, %v1826_v41  ;;  %v1730_v56 = vsel %vm1723_vm5, %v1697_v11, %v6169_v1  ;;  %v1634_v53 = vsel %vm1624_vm2, %v1601_v52, %v5777_v32  ;;  %v1633_v23 = vsel %vm1624_vm2, %v1600_v35, %v5779_v62  ;;  %v1764_v6 = vsel %vm1756_vm6, %v1731_v19, %v6310_v46  ;;  %v8756_v41 = vld [vmem:[#allocation132_spill] sm:$0xff]  ;;  %v8769_v52 = vld [vmem:[#allocation77_spill] sm:$0xff]  ;;  %v8770_v22 = vld [vmem:[#allocation134_spill] sm:$0xff] }
 0x257   : > { %v1506_v0 = vpop.permute.xlu1 %1505  ;;  %v1504_v44 = vpop.permute.xlu0 %1503  ;;  %v1763_v38 = vsel %vm1756_vm6, %v1730_v56, %v6312_v26  ;;  %v1667_v43 = vsel %vm1657_vm3, %v1634_v53, %v5911_v31  ;;  %v1666_v1 = vsel %vm1657_vm3, %v1633_v23, %v5913_v20  ;;  %v1797_v32 = vsel %vm1789_vm7, %v1764_v6, %v6436_v36  ;;  %v8754_v20 = vld [vmem:[#allocation22_spill] sm:$0xff]  ;;  %v5018_v36 = vld [vmem:[%s5229_s17 + $0x78] sm:$0xff]  ;;  %v8766_v12 = vld [vmem:[#allocation56_spill] sm:$0xff] }
 0x258   : > { %v1828_v15 = vsel %vm1822_vm8, %v1795_v58, %v1506_v0  ;;  %v1827_v29 = vsel %vm1822_vm8, %v1794_v34, %v1504_v44  ;;  %v1796_v62 = vsel %vm1789_vm7, %v1763_v38, %v6438_v27  ;;  %v1700_v46 = vsel %vm1690_vm4, %v1667_v43, %v6045_v17  ;;  %v5020_v34 = vld [vmem:[%s5229_s17 + $0x90] sm:$0xff]  ;;  %v8765_v0 = vld [vmem:[#allocation27_spill] sm:$0xff]  ;;  %v8768_v57 = vld [vmem:[#allocation76_spill] sm:$0xff] }
 0x259   : > { %4811 = vmatprep.mubr.msk.f32.mxu0 %vm1860_vm9, %v1827_v29  ;;  %v1699_v26 = vsel %vm1690_vm4, %v1666_v1, %v6047_v16  ;;  %v1603_v50 = vsel %vm1591_vm1, %v5017_v55, %v8754_v20  ;;  %v1602_v27 = vsel %vm1591_vm1, %v5018_v36, %v8755_v45  ;;  %v1733_v37 = vsel %vm1723_vm5, %v1700_v46, %v6175_v42  ;;  %v8758_v42 = vld [vmem:[#allocation96_spill] sm:$0xff]  ;;  %v8771_v19 = vld [vmem:[#allocation135_spill] sm:$0xff]  ;;  %v8772_v53 = vld [vmem:[#allocation98_spill] sm:$0xff] }
 0x25a   : > { %4812 = vmatmul.mubr.msk.f32.gmra.mrb[4].mxu0 %vm1860_vm9, %v1828_v15  ;;  %v1732_v17 = vsel %vm1723_vm5, %v1699_v26, %v6177_v47  ;;  %v1636_v16 = vsel %vm1624_vm2, %v1603_v50, %v5785_v3  ;;  %v1635_v8 = vsel %vm1624_vm2, %v1602_v27, %v5787_v63  ;;  %v1766_v21 = vsel %vm1756_vm6, %v1733_v37, %v8756_v41  ;;  %v8767_v15 = vld [vmem:[#allocation57_spill] sm:$0xff]  ;;  %v8773_v6 = vld [vmem:[#allocation99_spill] sm:$0xff]  ;;  %v8774_v43 = vld [vmem:[#allocation158_spill] sm:$0xff] }
 0x25b   : > { %v1510_v40 = vpop.permute.xlu1 %1509  ;;  %v1508_v9 = vpop.permute.xlu0 %1507  ;;  %v1765_v28 = vsel %vm1756_vm6, %v1732_v17, %v8757_v61  ;;  %v1669_v47 = vsel %vm1657_vm3, %v1636_v16, %v8758_v42  ;;  %v1668_v7 = vsel %vm1657_vm3, %v1635_v8, %v8759_v2  ;;  %v1799_v3 = vsel %vm1789_vm7, %v1766_v21, %v8760_v14  ;;  %v8776_v46 = vld [vmem:[#allocation12_spill] sm:$0xff]  ;;  %v5021_v50 = vld [vmem:[%s5229_s17 + $0xb0] sm:$0xff]  ;;  %v5022_v27 = vld [vmem:[%s5229_s17 + $0xa8] sm:$0xff] }
 0x25c   : > { %v1830_v54 = vsel %vm1822_vm8, %v1797_v32, %v1510_v40  ;;  %v1829_v31 = vsel %vm1822_vm8, %v1796_v62, %v1508_v9  ;;  %v1798_v63 = vsel %vm1789_vm7, %v1765_v28, %v8761_v10  ;;  %v1702_v4 = vsel %vm1690_vm4, %v1669_v47, %v8762_v51  ;;  %v8775_v32 = vld [vmem:[#allocation159_spill] sm:$0xff]  ;;  %v8778_v36 = vld [vmem:[#allocation30_spill] sm:$0xff]  ;;  %v8780_v16 = vld [vmem:[#allocation60_spill] sm:$0xff] }
 0x25d   : > { %4814 = vmatprep.mubr.msk.f32.mxu0 %vm1860_vm9, %v1829_v31  ;;  %v1701_v24 = vsel %vm1690_vm4, %v1668_v7, %v8763_v18  ;;  %v1605_v58 = vsel %vm1591_vm1, %v5019_v13, %v8764_v33  ;;  %v1604_v44 = vsel %vm1591_vm1, %v5020_v34, %v8765_v0  ;;  %v1735_v11 = vsel %vm1723_vm5, %v1702_v4, %v8766_v12  ;;  %v8779_v37 = vld [vmem:[#allocation31_spill] sm:$0xff]  ;;  %v8781_v41 = vld [vmem:[#allocation61_spill] sm:$0xff]  ;;  %v8782_v61 = vld [vmem:[#allocation78_spill] sm:$0xff] }
 0x25e   : > { %4815 = vmatmul.mubr.msk.f32.gmra.mrb[6].mxu0 %vm1860_vm9, %v1830_v54  ;;  %v1734_v29 = vsel %vm1723_vm5, %v1701_v24, %v8767_v15  ;;  %v1638_v30 = vsel %vm1624_vm2, %v1605_v58, %v8768_v57  ;;  %v1637_v48 = vsel %vm1624_vm2, %v1604_v44, %v8769_v52  ;;  %v1768_v35 = vsel %vm1756_vm6, %v1735_v11, %v8770_v22  ;;  %v8777_v54 = vld [vmem:[#allocation13_spill] sm:$0xff]  ;;  %v8783_v42 = vld [vmem:[#allocation79_spill] sm:$0xff]  ;;  %v8784_v2 = vld [vmem:[#allocation136_spill] sm:$0xff] }
 0x25f   : > { %v1514_v5 = vpop.permute.xlu1 %1513  ;;  %v1512_v49 = vpop.permute.xlu0 %1511  ;;  %v1767_v56 = vsel %vm1756_vm6, %v1734_v29, %v8771_v19  ;;  %v1671_v23 = vsel %vm1657_vm3, %v1638_v30, %v8772_v53  ;;  %v1670_v38 = vsel %vm1657_vm3, %v1637_v48, %v8773_v6  ;;  %v1801_v1 = vsel %vm1789_vm7, %v1768_v35, %v8774_v43  ;;  %v8785_v14 = vld [vmem:[#allocation137_spill] sm:$0xff]  ;;  %v8786_v10 = vld [vmem:[#allocation100_spill] sm:$0xff]  ;;  %v8792_v11 = vld [vmem:[#allocation34_spill] sm:$0xff] }
 0x260   : > { %v1832_v59 = vsel %vm1822_vm8, %v1799_v3, %v1514_v5  ;;  %v1831_v25 = vsel %vm1822_vm8, %v1798_v63, %v1512_v49  ;;  %v1800_v62 = vsel %vm1789_vm7, %v1767_v56, %v8775_v32  ;;  %v1704_v26 = vsel %vm1690_vm4, %v1671_v23, %v8776_v46  ;;  %v8787_v5 = vld [vmem:[#allocation101_spill] sm:$0xff]  ;;  %v8788_v51 = vld [vmem:[#allocation160_spill] sm:$0xff]  ;;  %v8793_v57 = vld [vmem:[#allocation35_spill] sm:$0xff] }
 0x261   : > { %4817 = vmatprep.mubr.msk.f32.mxu0 %vm1860_vm9, %v1831_v25  ;;  %v1703_v31 = vsel %vm1690_vm4, %v1670_v38, %v8777_v54  ;;  %v1607_v45 = vsel %vm1591_vm1, %v5021_v50, %v8778_v36  ;;  %v1606_v17 = vsel %vm1591_vm1, %v5022_v27, %v8779_v37  ;;  %v1737_v8 = vsel %vm1723_vm5, %v1704_v26, %v8780_v16  ;;  %v8789_v18 = vld [vmem:[#allocation161_spill] sm:$0xff]  ;;  %v8790_v13 = vld [vmem:[#allocation20_spill] sm:$0xff]  ;;  %v8798_v6 = vld [vmem:[#allocation138_spill] sm:$0xff] }
 0x262   : > { %4818 = vmatmul.mubr.msk.f32.gmra.mrb[8].mxu0 %vm1860_vm9, %v1832_v59  ;;  %v1736_v21 = vsel %vm1723_vm5, %v1703_v31, %v8781_v41  ;;  %v1640_v28 = vsel %vm1624_vm2, %v1607_v45, %v8782_v61  ;;  %v1639_v47 = vsel %vm1624_vm2, %v1606_v17, %v8783_v42  ;;  %v1770_v7 = vsel %vm1756_vm6, %v1737_v8, %v8784_v2  ;;  %v8791_v58 = vld [vmem:[#allocation21_spill] sm:$0xff]  ;;  %v5024_v29 = vld [vmem:[%s5229_s17 + $0xc0] sm:$0xff]  ;;  %v8799_v43 = vld [vmem:[#allocation139_spill] sm:$0xff] }
 0x263   : > { %v1518_v40 = vpop.permute.xlu1 %1517  ;;  %v1516_v9 = vpop.permute.xlu0 %1515  ;;  %v1769_v3 = vsel %vm1756_vm6, %v1736_v21, %v8785_v14  ;;  %v1673_v63 = vsel %vm1657_vm3, %v1640_v28, %v8786_v10  ;;  %v1672_v49 = vsel %vm1657_vm3, %v1639_v47, %v8787_v5  ;;  %v1803_v4 = vsel %vm1789_vm7, %v1770_v7, %v8788_v51  ;;  %v5023_v12 = vld [vmem:[%s5229_s17 + $0xc8] sm:$0xff]  ;;  %v8794_v52 = vld [vmem:[#allocation64_spill] sm:$0xff]  ;;  %v8800_v32 = vld [vmem:[#allocation102_spill] sm:$0xff] }
 0x264   : > { %v1834_v55 = vsel %vm1822_vm8, %v1801_v1, %v1518_v40  ;;  %v1833_v20 = vsel %vm1822_vm8, %v1800_v62, %v1516_v9  ;;  %v1802_v24 = vsel %vm1789_vm7, %v1769_v3, %v8789_v18  ;;  %v1706_v33 = vsel %vm1690_vm4, %v1673_v63, %v8790_v13  ;;  %v8795_v22 = vld [vmem:[#allocation65_spill] sm:$0xff]  ;;  %v8796_v19 = vld [vmem:[#allocation80_spill] sm:$0xff]  ;;  %v8801_v40 = vld [vmem:[#allocation103_spill] sm:$0xff] }
 0x265   : > { %4820 = vmatprep.mubr.msk.f32.mxu0 %vm1860_vm9, %v1833_v20  ;;  %v1705_v34 = vsel %vm1690_vm4, %v1672_v49, %v8791_v58  ;;  %v1609_v15 = vsel %vm1591_vm1, %v5023_v12, %v8792_v11  ;;  %v1608_v30 = vsel %vm1591_vm1, %v5024_v29, %v8793_v57  ;;  %v1739_v48 = vsel %vm1723_vm5, %v1706_v33, %v8794_v52  ;;  %v8797_v53 = vld [vmem:[#allocation81_spill] sm:$0xff]  ;;  %v8802_v46 = vld [vmem:[#allocation162_spill] sm:$0xff]  ;;  %v8803_v54 = vld [vmem:[#allocation163_spill] sm:$0xff] }
 0x266   : > { %4821 = vmatmul.mubr.msk.f32.gmra.mrb[10].mxu0 %vm1860_vm9, %v1834_v55  ;;  %v1738_v35 = vsel %vm1723_vm5, %v1705_v34, %v8795_v22  ;;  %v1642_v56 = vsel %vm1624_vm2, %v1609_v15, %v8796_v19  ;;  %v1641_v23 = vsel %vm1624_vm2, %v1608_v30, %v8797_v53  ;;  %v1772_v38 = vsel %vm1756_vm6, %v1739_v48, %v8798_v6  ;;  %v8804_v50 = vld [vmem:[#allocation24_spill] sm:$0xff]  ;;  %v8805_v45 = vld [vmem:[#allocation25_spill] sm:$0xff]  ;;  %v8806_v8 = vld [vmem:[#allocation38_spill] sm:$0xff] }
 0x267   : > { %v1522_v59 = vpop.permute.xlu1 %1521  ;;  %v1520_v25 = vpop.permute.xlu0 %1519  ;;  %v1771_v1 = vsel %vm1756_vm6, %v1738_v35, %v8799_v43  ;;  %v1675_v62 = vsel %vm1657_vm3, %v1642_v56, %v8800_v32  ;;  %v1674_v9 = vsel %vm1657_vm3, %v1641_v23, %v8801_v40  ;;  %v1805_v26 = vsel %vm1789_vm7, %v1772_v38, %v8802_v46  ;;  %v5025_v16 = vld [vmem:[%s5229_s17 + $0xe0] sm:$0xff]  ;;  %v5026_v21 = vld [vmem:[%s5229_s17 + $0xd8] sm:$0xff]  ;;  %v8809_v2 = vld [vmem:[#allocation69_spill] sm:$0xff] }
 0x268   : > { %v1836_v0 = vsel %vm1822_vm8, %v1803_v4, %v1522_v59  ;;  %v1835_v44 = vsel %vm1822_vm8, %v1802_v24, %v1520_v25  ;;  %v1804_v31 = vsel %vm1789_vm7, %v1771_v1, %v8803_v54  ;;  %v1708_v36 = vsel %vm1690_vm4, %v1675_v62, %v8804_v50  ;;  %v8807_v61 = vld [vmem:[#allocation39_spill] sm:$0xff]  ;;  %v8808_v42 = vld [vmem:[#allocation68_spill] sm:$0xff]  ;;  %v8810_v14 = vld [vmem:[#allocation82_spill] sm:$0xff] }
 0x269   : > { %4823 = vmatprep.mubr.msk.f32.mxu0 %vm1860_vm9, %v1835_v44  ;;  %v1707_v27 = vsel %vm1690_vm4, %v1674_v9, %v8805_v45  ;;  %v1611_v41 = vsel %vm1591_vm1, %v5025_v16, %v8806_v8  ;;  %v1610_v28 = vsel %vm1591_vm1, %v5026_v21, %v8807_v61  ;;  %v1741_v47 = vsel %vm1723_vm5, %v1708_v36, %v8808_v42  ;;  %v8811_v10 = vld [vmem:[#allocation83_spill] sm:$0xff]  ;;  %v8812_v5 = vld [vmem:[#allocation140_spill] sm:$0xff]  ;;  %v8813_v51 = vld [vmem:[#allocation141_spill] sm:$0xff] }
 0x26a   : > { %4824 = vmatmul.mubr.msk.f32.gmra.mrb[12].mxu0 %vm1860_vm9, %v1836_v0  ;;  %v1740_v7 = vsel %vm1723_vm5, %v1707_v27, %v8809_v2  ;;  %v1644_v3 = vsel %vm1624_vm2, %v1611_v41, %v8810_v14  ;;  %v1643_v63 = vsel %vm1624_vm2, %v1610_v28, %v8811_v10  ;;  %v1774_v49 = vsel %vm1756_vm6, %v1741_v47, %v8812_v5  ;;  %v8814_v18 = vld [vmem:[#allocation104_spill] sm:$0xff]  ;;  %v8815_v59 = vld [vmem:[#allocation105_spill] sm:$0xff]  ;;  %v5027_v52 = vld [vmem:[%s5229_s17 + $0xf8] sm:$0xff] }
 0x26b   : > { %v1526_v55 = vpop.permute.xlu1 %1525  ;;  %v1524_v20 = vpop.permute.xlu0 %1523  ;;  %v1773_v4 = vsel %vm1756_vm6, %v1740_v7, %v8813_v51  ;;  %v1677_v24 = vsel %vm1657_vm3, %v1644_v3, %v8814_v18  ;;  %v1676_v25 = vsel %vm1657_vm3, %v1643_v63, %v8815_v59  ;;  %v8816_v13 = vld [vmem:[#allocation164_spill] sm:$0xff]  ;;  %v8817_v58 = vld [vmem:[#allocation165_spill] sm:$0xff]  ;;  %v8820_v48 = vld [vmem:[#allocation42_spill] sm:$0xff] }
 0x26c   : > { %v1838_v37 = vsel %vm1822_vm8, %v1805_v26, %v1526_v55  ;;  %v1837_v17 = vsel %vm1822_vm8, %v1804_v31, %v1524_v20  ;;  %v1807_v33 = vsel %vm1789_vm7, %v1774_v49, %v8816_v13  ;;  %v1806_v34 = vsel %vm1789_vm7, %v1773_v4, %v8817_v58  ;;  %v8818_v12 = vld [vmem:[#allocation28_spill] sm:$0xff]  ;;  %v8819_v15 = vld [vmem:[#allocation29_spill] sm:$0xff]  ;;  %v5028_v35 = vld [vmem:[%s5229_s17 + $0xf0] sm:$0xff] }
 0x26d   : > { %4826 = vmatprep.mubr.msk.f32.mxu0 %vm1860_vm9, %v1837_v17  ;;  %v1710_v11 = vsel %vm1690_vm4, %v1677_v24, %v8818_v12  ;;  %v1709_v29 = vsel %vm1690_vm4, %v1676_v25, %v8819_v15  ;;  %v1613_v22 = vsel %vm1591_vm1, %v5027_v52, %v8820_v48  ;;  %v8821_v19 = vld [vmem:[#allocation43_spill] sm:$0xff]  ;;  %v8822_v53 = vld [vmem:[#allocation118_spill] sm:$0xff]  ;;  %v8824_v43 = vld [vmem:[#allocation84_spill] sm:$0xff] }
 0x26e   : > { %4827 = vmatmul.mubr.msk.f32.gmra.mrb[14].mxu0 %vm1860_vm9, %v1838_v37  ;;  %v1612_v56 = vsel %vm1591_vm1, %v5028_v35, %v8821_v19  ;;  %v1743_v23 = vsel %vm1723_vm5, %v1710_v11, %v8822_v53  ;;  %v8823_v6 = vld [vmem:[#allocation119_spill] sm:$0xff]  ;;  %v1646_v1 = vsel %vm1624_vm2, %v1613_v22, %v8824_v43  ;;  %v8825_v32 = vld [vmem:[#allocation85_spill] sm:$0xff]  ;;  %v8826_v40 = vld [vmem:[#allocation142_spill] sm:$0xff] }
 0x26f   : > { %v1530_v0 = vpop.permute.xlu1 %1529  ;;  %v1528_v44 = vpop.permute.xlu0 %1527  ;;  %v1742_v38 = vsel %vm1723_vm5, %v1709_v29, %v8823_v6  ;;  %v1645_v62 = vsel %vm1624_vm2, %v1612_v56, %v8825_v32  ;;  %v1776_v9 = vsel %vm1756_vm6, %v1743_v23, %v8826_v40  ;;  %v8827_v46 = vld [vmem:[#allocation143_spill] sm:$0xff]  ;;  %v8828_v54 = vld [vmem:[#allocation106_spill] sm:$0xff]  ;;  %v8832_v16 = vld [vmem:[#allocation32_spill] sm:$0xff] }
 0x270   : > { %v1840_v57 = vsel %vm1822_vm8, %v1807_v33, %v1530_v0  ;;  %v1839_v30 = vsel %vm1822_vm8, %v1806_v34, %v1528_v44  ;;  %v1775_v26 = vsel %vm1756_vm6, %v1742_v38, %v8827_v46  ;;  %v1679_v31 = vsel %vm1657_vm3, %v1646_v1, %v8828_v54  ;;  %v8829_v55 = vld [vmem:[#allocation107_spill] sm:$0xff]  ;;  %v8830_v50 = vld [vmem:[#allocation166_spill] sm:$0xff]  ;;  %v8833_v41 = vld [vmem:[#allocation33_spill] sm:$0xff] }
 0x271   : > { %4829 = vmatprep.mubr.msk.f32.mxu0 %vm1860_vm9, %v1839_v30  ;;  %v1678_v20 = vsel %vm1657_vm3, %v1645_v62, %v8829_v55  ;;  %v1809_v36 = vsel %vm1789_vm7, %v1776_v9, %v8830_v50  ;;  %v8831_v45 = vld [vmem:[#allocation167_spill] sm:$0xff]  ;;  %v1712_v8 = vsel %vm1690_vm4, %v1679_v31, %v8832_v16  ;;  %v5029_v42 = vld [vmem:[%s5229_s17 + $0x110] sm:$0xff]  ;;  %v5030_v7 = vld [vmem:[%s5229_s17 + $0x108] sm:$0xff] }
 0x272   : > { %4830 = vmatmul.mubr.msk.f32.gmra.mrb[16].mxu0 %vm1860_vm9, %v1840_v57  ;;  %v1808_v27 = vsel %vm1789_vm7, %v1775_v26, %v8831_v45  ;;  %v1711_v21 = vsel %vm1690_vm4, %v1678_v20, %v8833_v41  ;;  %v8834_v47 = vld [vmem:[#allocation46_spill] sm:$0xff]  ;;  %v8835_v14 = vld [vmem:[#allocation47_spill] sm:$0xff]  ;;  %v8836_v10 = vld [vmem:[#allocation120_spill] sm:$0xff] }
 0x273   : > { %v1534_v37 = vpop.permute.xlu1 %1533  ;;  %v1532_v17 = vpop.permute.xlu0 %1531  ;;  %v1615_v2 = vsel %vm1591_vm1, %v5029_v42, %v8834_v47  ;;  %v1614_v3 = vsel %vm1591_vm1, %v5030_v7, %v8835_v14  ;;  %v1745_v63 = vsel %vm1723_vm5, %v1712_v8, %v8836_v10  ;;  %v8837_v5 = vld [vmem:[#allocation121_spill] sm:$0xff]  ;;  %v8838_v51 = vld [vmem:[#allocation86_spill] sm:$0xff]  ;;  %v8839_v18 = vld [vmem:[#allocation87_spill] sm:$0xff] }
 0x274   : > { %v1842_v61 = vsel %vm1822_vm8, %v1809_v36, %v1534_v37  ;;  %v1841_v28 = vsel %vm1822_vm8, %v1808_v27, %v1532_v17  ;;  %v1744_v49 = vsel %vm1723_vm5, %v1711_v21, %v8837_v5  ;;  %v1648_v4 = vsel %vm1624_vm2, %v1615_v2, %v8838_v51  ;;  %v8840_v59 = vld [vmem:[#allocation144_spill] sm:$0xff]  ;;  %v8841_v13 = vld [vmem:[#allocation145_spill] sm:$0xff]  ;;  %v8848_v23 = vld [vmem:[#allocation50_spill] sm:$0xff] }
 0x275   : > { %4832 = vmatprep.mubr.msk.f32.mxu0 %vm1860_vm9, %v1841_v28  ;;  %v1647_v24 = vsel %vm1624_vm2, %v1614_v3, %v8839_v18  ;;  %v1778_v25 = vsel %vm1756_vm6, %v1745_v63, %v8840_v59  ;;  %v1777_v33 = vsel %vm1756_vm6, %v1744_v49, %v8841_v13  ;;  %v8842_v58 = vld [vmem:[#allocation108_spill] sm:$0xff]  ;;  %v8843_v0 = vld [vmem:[#allocation109_spill] sm:$0xff]  ;;  %v8849_v43 = vld [vmem:[#allocation51_spill] sm:$0xff] }
 0x276   : > { %4833 = vmatmul.mubr.msk.f32.gmra.mrb[18].mxu0 %vm1860_vm9, %v1842_v61  ;;  %v1681_v34 = vsel %vm1657_vm3, %v1648_v4, %v8842_v58  ;;  %v1680_v44 = vsel %vm1657_vm3, %v1647_v24, %v8843_v0  ;;  %v8844_v12 = vld [vmem:[#allocation168_spill] sm:$0xff]  ;;  %v8845_v15 = vld [vmem:[#allocation169_spill] sm:$0xff]  ;;  %v8850_v32 = vld [vmem:[#allocation122_spill] sm:$0xff] }
 0x277   : > { %v1811_v11 = vsel %vm1789_vm7, %v1778_v25, %v8844_v12  ;;  %v1810_v29 = vsel %vm1789_vm7, %v1777_v33, %v8845_v15  ;;  %v1538_v57 = vpop.permute.xlu1 %1537  ;;  %v1536_v30 = vpop.permute.xlu0 %1535  ;;  %v8846_v52 = vld [vmem:[#allocation36_spill] sm:$0xff]  ;;  %v8847_v22 = vld [vmem:[#allocation37_spill] sm:$0xff]  ;;  %v8851_v40 = vld [vmem:[#allocation123_spill] sm:$0xff] }
 0x278   : > { %v1714_v48 = vsel %vm1690_vm4, %v1681_v34, %v8846_v52  ;;  %v1713_v35 = vsel %vm1690_vm4, %v1680_v44, %v8847_v22  ;;  %v1844_v19 = vsel %vm1822_vm8, %v1811_v11, %v1538_v57  ;;  %v1843_v56 = vsel %vm1822_vm8, %v1810_v29, %v1536_v30  ;;  %v5031_v53 = vld [vmem:[%s5229_s17 + $0x128] sm:$0xff]  ;;  %v5032_v38 = vld [vmem:[%s5229_s17 + $0x120] sm:$0xff]  ;;  %v8854_v55 = vld [vmem:[#allocation146_spill] sm:$0xff] }
 0x279   : > { %v1617_v6 = vsel %vm1591_vm1, %v5031_v53, %v8848_v23  ;;  %v1616_v1 = vsel %vm1591_vm1, %v5032_v38, %v8849_v43  ;;  %v1747_v62 = vsel %vm1723_vm5, %v1714_v48, %v8850_v32  ;;  %v1746_v9 = vsel %vm1723_vm5, %v1713_v35, %v8851_v40  ;;  %4835 = vmatprep.mubr.msk.f32.mxu0 %vm1860_vm9, %v1843_v56  ;;  %v8852_v46 = vld [vmem:[#allocation88_spill] sm:$0xff]  ;;  %v8853_v54 = vld [vmem:[#allocation89_spill] sm:$0xff]  ;;  %v8855_v50 = vld [vmem:[#allocation147_spill] sm:$0xff] }
 0x27a   : > { %v1650_v26 = vsel %vm1624_vm2, %v1617_v6, %v8852_v46  ;;  %v1649_v31 = vsel %vm1624_vm2, %v1616_v1, %v8853_v54  ;;  %v1780_v20 = vsel %vm1756_vm6, %v1747_v62, %v8854_v55  ;;  %v1779_v36 = vsel %vm1756_vm6, %v1746_v9, %v8855_v50  ;;  %4836 = vmatmul.mubr.msk.f32.gmra.mrb[20].mxu0 %vm1860_vm9, %v1844_v19  ;;  %v8856_v45 = vld [vmem:[#allocation110_spill] sm:$0xff]  ;;  %v8857_v37 = vld [vmem:[#allocation111_spill] sm:$0xff]  ;;  %v8860_v42 = vld [vmem:[#allocation40_spill] sm:$0xff] }
 0x27b   : > { %v1683_v27 = vsel %vm1657_vm3, %v1650_v26, %v8856_v45  ;;  %v1682_v17 = vsel %vm1657_vm3, %v1649_v31, %v8857_v37  ;;  %v8858_v16 = vld [vmem:[#allocation170_spill] sm:$0xff]  ;;  %v8859_v41 = vld [vmem:[#allocation171_spill] sm:$0xff]  ;;  %v1542_v61 = vpop.permute.xlu1 %1541  ;;  %v1540_v28 = vpop.permute.xlu0 %1539  ;;  %v8861_v2 = vld [vmem:[#allocation41_spill] sm:$0xff] }
 0x27c   : > { %v1813_v8 = vsel %vm1789_vm7, %v1780_v20, %v8858_v16  ;;  %v1812_v21 = vsel %vm1789_vm7, %v1779_v36, %v8859_v41  ;;  %v1716_v47 = vsel %vm1690_vm4, %v1683_v27, %v8860_v42  ;;  %v1715_v7 = vsel %vm1690_vm4, %v1682_v17, %v8861_v2  ;;  %v5033_v10 = vld [vmem:[%s5229_s17 + $0x140] sm:$0xff]  ;;  %v8862_v63 = vld [vmem:[#allocation54_spill] sm:$0xff]  ;;  %v5034_v49 = vld [vmem:[%s5229_s17 + $0x138] sm:$0xff] }
 0x27d   : > { %v1846_v14 = vsel %vm1822_vm8, %v1813_v8, %v1542_v61  ;;  %v1845_v3 = vsel %vm1822_vm8, %v1812_v21, %v1540_v28  ;;  %v1619_v5 = vsel %vm1591_vm1, %v5033_v10, %v8862_v63  ;;  %v8863_v51 = vld [vmem:[#allocation55_spill] sm:$0xff]  ;;  %v8864_v18 = vld [vmem:[#allocation124_spill] sm:$0xff]  ;;  %v8865_v59 = vld [vmem:[#allocation125_spill] sm:$0xff] }
 0x27e   : > { %v1618_v4 = vsel %vm1591_vm1, %v5034_v49, %v8863_v51  ;;  %v1749_v24 = vsel %vm1723_vm5, %v1716_v47, %v8864_v18  ;;  %v1748_v25 = vsel %vm1723_vm5, %v1715_v7, %v8865_v59  ;;  %4838 = vmatprep.mubr.msk.f32.mxu0 %vm1860_vm9, %v1845_v3  ;;  %v8866_v13 = vld [vmem:[#allocation90_spill] sm:$0xff]  ;;  %v8867_v58 = vld [vmem:[#allocation91_spill] sm:$0xff]  ;;  %v8868_v0 = vld [vmem:[#allocation148_spill] sm:$0xff] }
 0x27f   : > { %v1652_v33 = vsel %vm1624_vm2, %v1619_v5, %v8866_v13  ;;  %v1651_v34 = vsel %vm1624_vm2, %v1618_v4, %v8867_v58  ;;  %v1782_v44 = vsel %vm1756_vm6, %v1749_v24, %v8868_v0  ;;  %v8869_v12 = vld [vmem:[#allocation149_spill] sm:$0xff]  ;;  %4839 = vmatmul.mubr.msk.f32.gmra.mrb[22].mxu0 %vm1860_vm9, %v1846_v14  ;;  %v8870_v15 = vld [vmem:[#allocation112_spill] sm:$0xff]  ;;  %v1546_v19 = vpop.permute.xlu1 %1545  ;;  %v1544_v56 = vpop.permute.xlu0 %1543  ;;  %v5035_v32 = vld [vmem:[%s5229_s17 + $0x158] sm:$0xff] }
 0x280   : > { %v1781_v11 = vsel %vm1756_vm6, %v1748_v25, %v8869_v12  ;;  %v1685_v29 = vsel %vm1657_vm3, %v1652_v33, %v8870_v15  ;;  %v8871_v57 = vld [vmem:[#allocation113_spill] sm:$0xff]  ;;  %v8872_v52 = vld [vmem:[#allocation172_spill] sm:$0xff]  ;;  %v8876_v62 = vld [vmem:[#allocation58_spill] sm:$0xff] }
 0x281   : > { %v1684_v30 = vsel %vm1657_vm3, %v1651_v34, %v8871_v57  ;;  %v1815_v48 = vsel %vm1789_vm7, %v1782_v44, %v8872_v52  ;;  %v8873_v22 = vld [vmem:[#allocation173_spill] sm:$0xff]  ;;  %v8874_v53 = vld [vmem:[#allocation44_spill] sm:$0xff]  ;;  %v1621_v40 = vsel %vm1591_vm1, %v5035_v32, %v8876_v62  ;;  %v5036_v9 = vld [vmem:[%s5229_s17 + $0x150] sm:$0xff] }
 0x282   : > { %v1814_v35 = vsel %vm1789_vm7, %v1781_v11, %v8873_v22  ;;  %v1718_v23 = vsel %vm1690_vm4, %v1685_v29, %v8874_v53  ;;  %v8875_v6 = vld [vmem:[#allocation45_spill] sm:$0xff]  ;;  %v1848_v43 = vsel %vm1822_vm8, %v1815_v48, %v1546_v19  ;;  %v8877_v46 = vld [vmem:[#allocation59_spill] sm:$0xff]  ;;  %v8878_v54 = vld [vmem:[#allocation126_spill] sm:$0xff] }
 0x283   : > { %v1717_v38 = vsel %vm1690_vm4, %v1684_v30, %v8875_v6  ;;  %v1847_v1 = vsel %vm1822_vm8, %v1814_v35, %v1544_v56  ;;  %v1620_v26 = vsel %vm1591_vm1, %v5036_v9, %v8877_v46  ;;  %v1751_v31 = vsel %vm1723_vm5, %v1718_v23, %v8878_v54  ;;  %v8879_v55 = vld [vmem:[#allocation127_spill] sm:$0xff]  ;;  %v8880_v50 = vld [vmem:[#allocation92_spill] sm:$0xff]  ;;  %v8881_v45 = vld [vmem:[#allocation93_spill] sm:$0xff]  ;;  %v1550_v14 = vpop.permute.xlu1 %1549  ;;  %v1548_v3 = vpop.permute.xlu0 %1547 }
 0x284   : > { %v1750_v20 = vsel %vm1723_vm5, %v1717_v38, %v8879_v55  ;;  %4841 = vmatprep.mubr.msk.f32.mxu0 %vm1860_vm9, %v1847_v1  ;;  %v1654_v36 = vsel %vm1624_vm2, %v1621_v40, %v8880_v50  ;;  %v1653_v27 = vsel %vm1624_vm2, %v1620_v26, %v8881_v45  ;;  %v8882_v37 = vld [vmem:[#allocation150_spill] sm:$0xff]  ;;  %v8883_v16 = vld [vmem:[#allocation151_spill] sm:$0xff]  ;;  %v8888_v10 = vld [vmem:[#allocation48_spill] sm:$0xff] }
 0x285   : > { %v1784_v17 = vsel %vm1756_vm6, %v1751_v31, %v8882_v37  ;;  %v1783_v8 = vsel %vm1756_vm6, %v1750_v20, %v8883_v16  ;;  %4842 = vmatmul.mubr.msk.f32.gmra.mrb[24].mxu0 %vm1860_vm9, %v1848_v43  ;;  %v8884_v41 = vld [vmem:[#allocation114_spill] sm:$0xff]  ;;  %v8885_v61 = vld [vmem:[#allocation115_spill] sm:$0xff]  ;;  %v8889_v5 = vld [vmem:[#allocation49_spill] sm:$0xff] }
 0x286   : > { %v1687_v21 = vsel %vm1657_vm3, %v1654_v36, %v8884_v41  ;;  %v1686_v28 = vsel %vm1657_vm3, %v1653_v27, %v8885_v61  ;;  %v8886_v42 = vld [vmem:[#allocation174_spill] sm:$0xff]  ;;  %v8887_v2 = vld [vmem:[#allocation175_spill] sm:$0xff]  ;;  %v5038_v25 = vld [vmem:[%s5229_s17 + $0x168] sm:$0xff]  ;;  %v5129_v61 = vmov 0.0  }
 0x287   : > { %v1817_v47 = vsel %vm1789_vm7, %v1784_v17, %v8886_v42  ;;  %v1816_v7 = vsel %vm1789_vm7, %v1783_v8, %v8887_v2  ;;  %v1720_v63 = vsel %vm1690_vm4, %v1687_v21, %v8888_v10  ;;  %v1719_v49 = vsel %vm1690_vm4, %v1686_v28, %v8889_v5  ;;  %v5037_v18 = vld [vmem:[%s5229_s17 + $0x170] sm:$0xff]  ;;  %v8891_v13 = vld [vmem:[#allocation63_spill] sm:$0xff]  ;;  %v8892_v58 = vld [vmem:[#allocation128_spill] sm:$0xff]  ;;  %v1554_v43 = vpop.permute.xlu1 %1553  ;;  %v1552_v1 = vpop.permute.xlu0 %1551  ;;  %2301 = vst.msk [vmem:[#allocation2 + $0x20] sm:$0xff] %vm1624_vm2, %v5129_v61 }
 0x288   : > { %v1850_v51 = vsel %vm1822_vm8, %v1817_v47, %v1550_v14  ;;  %v1849_v4 = vsel %vm1822_vm8, %v1816_v7, %v1548_v3  ;;  %v8890_v24 = vld [vmem:[#allocation62_spill] sm:$0xff]  ;;  %v1622_v33 = vsel %vm1591_vm1, %v5038_v25, %v8891_v13  ;;  %v1753_v34 = vsel %vm1723_vm5, %v1720_v63, %v8892_v58  ;;  %v8893_v0 = vld [vmem:[#allocation129_spill] sm:$0xff]  ;;  %v8895_v15 = vld [vmem:[#allocation95_spill] sm:$0xff]  ;;  %2302 = vst.msk [vmem:[#allocation2 + $0x28] sm:$0x3] %vm2298_vm10, %v5129_v61 }
 0x289   : > { %v1623_v59 = vsel %vm1591_vm1, %v5037_v18, %v8890_v24  ;;  %v1752_v44 = vsel %vm1723_vm5, %v1719_v49, %v8893_v0  ;;  %4844 = vmatprep.mubr.msk.f32.mxu0 %vm1860_vm9, %v1849_v4  ;;  %v8894_v12 = vld [vmem:[#allocation94_spill] sm:$0xff]  ;;  %v1655_v29 = vsel %vm1624_vm2, %v1622_v33, %v8895_v15  ;;  %v8896_v57 = vld [vmem:[#allocation152_spill] sm:$0xff]  ;;  %v8897_v52 = vld [vmem:[#allocation153_spill] sm:$0xff]  ;;  %2296 = vst.msk [vmem:[#allocation2] sm:$0xff] %vm1624_vm2, %v5129_v61 }
 0x28a   : > { %v1656_v11 = vsel %vm1624_vm2, %v1623_v59, %v8894_v12  ;;  %v1786_v30 = vsel %vm1756_vm6, %v1753_v34, %v8896_v57  ;;  %v1785_v48 = vsel %vm1756_vm6, %v1752_v44, %v8897_v52  ;;  %4845 = vmatmul.mubr.msk.f32.gmra.mrb[26].mxu0 %vm1860_vm9, %v1850_v51  ;;  %v8898_v22 = vld [vmem:[#allocation116_spill] sm:$0xff]  ;;  %v8899_v19 = vld [vmem:[#allocation117_spill] sm:$0xff]  ;;  %v8904_v54 = vld [vmem:[#allocation130_spill] sm:$0xff]  ;;  %2297 = vst.msk [vmem:[#allocation2 + $0x8] sm:$0xff] %vm1624_vm2, %v5129_v61 }
 0x28b   : > { %v1689_v35 = vsel %vm1657_vm3, %v1656_v11, %v8898_v22  ;;  %v1688_v56 = vsel %vm1657_vm3, %v1655_v29, %v8899_v19  ;;  %v8900_v53 = vld [vmem:[#allocation176_spill] sm:$0xff]  ;;  %v8901_v6 = vld [vmem:[#allocation177_spill] sm:$0xff]  ;;  %v8905_v55 = vld [vmem:[#allocation131_spill] sm:$0xff]  ;;  %v1558_v16 = vpop.permute.xlu1 %1557  ;;  %v1556_v8 = vpop.permute.xlu0 %1555  ;;  %2299 = vst.msk [vmem:[#allocation2 + $0x10] sm:$0x3] %vm2298_vm10, %v5129_v61 }
 0x28c   : > { %v1819_v23 = vsel %vm1789_vm7, %v1786_v30, %v8900_v53  ;;  %v1818_v38 = vsel %vm1789_vm7, %v1785_v48, %v8901_v6  ;;  %v8902_v32 = vld [vmem:[#allocation52_spill] sm:$0xff]  ;;  %v8903_v40 = vld [vmem:[#allocation53_spill] sm:$0xff]  ;;  %v8906_v50 = vld [vmem:[#allocation154_spill] sm:$0xff]  ;;  %2300 = vst.msk [vmem:[#allocation2 + $0x18] sm:$0xff] %vm1624_vm2, %v5129_v61 }
 0x28d   : > { %v1722_v62 = vsel %vm1690_vm4, %v1689_v35, %v8902_v32  ;;  %v1721_v9 = vsel %vm1690_vm4, %v1688_v56, %v8903_v40  ;;  %v1852_v46 = vsel %vm1822_vm8, %v1819_v23, %v1554_v43  ;;  %v1851_v26 = vsel %vm1822_vm8, %v1818_v38, %v1552_v1  ;;  %v8907_v45 = vld [vmem:[#allocation155_spill] sm:$0xff]  ;;  %2303 = vst.msk [vmem:[#allocation2 + $0x30] sm:$0xff] %vm1624_vm2, %v5129_v61  ;;  %v7091_v28 = vld [vmem:[%s8459_s3] ss:$0 sm:$0xff] }
 0x28e   : > { %v1755_v31 = vsel %vm1723_vm5, %v1722_v62, %v8904_v54  ;;  %v1754_v20 = vsel %vm1723_vm5, %v1721_v9, %v8905_v55  ;;  %4847 = vmatprep.mubr.msk.f32.mxu0 %vm1860_vm9, %v1851_v26  ;;  %2304 = vst.msk [vmem:[#allocation2 + $0x38] sm:$0xff] %vm1624_vm2, %v5129_v61  ;;  %2306 = vst.msk [vmem:[#allocation2 + $0x48] sm:$0xff] %vm1624_vm2, %v5129_v61  ;;  %v7096_v47 = vld [vmem:[%s8460_s4] ss:$0 sm:$0xff] }
 0x28f   : > { %v1788_v36 = vsel %vm1756_vm6, %v1755_v31, %v8906_v50  ;;  %v1787_v27 = vsel %vm1756_vm6, %v1754_v20, %v8907_v45  ;;  %4848 = vmatmul.mubr.msk.f32.gmra.mrb[28].mxu0 %vm1860_vm9, %v1852_v46  ;;  %2305 = vst.msk [vmem:[#allocation2 + $0x40] sm:$0x3] %vm2298_vm10, %v5129_v61  ;;  %2308 = vst.msk [vmem:[#allocation2 + $0x58] sm:$0x3] %vm2298_vm10, %v5129_v61 }
 0x290   : > { %v1821_v37 = vsel %vm1789_vm7, %v1788_v36, %v6501_v39  ;;  %v1820_v17 = vsel %vm1789_vm7, %v1787_v27, %v6503_v60  ;;  %2307 = vst.msk [vmem:[#allocation2 + $0x50] sm:$0xff] %vm1624_vm2, %v5129_v61  ;;  %2309 = vst.msk [vmem:[#allocation2 + $0x60] sm:$0xff] %vm1624_vm2, %v5129_v61 }
 0x291   : > { %v1854_v41 = vsel %vm1822_vm8, %v1821_v37, %v1558_v16  ;;  %v1853_v21 = vsel %vm1822_vm8, %v1820_v17, %v1556_v8  ;;  %2310 = vst.msk [vmem:[#allocation2 + $0x68] sm:$0xff] %vm1624_vm2, %v5129_v61  ;;  %2312 = vst.msk [vmem:[#allocation2 + $0x78] sm:$0xff] %vm1624_vm2, %v5129_v61  ;;  %v2416_v60 = vld [vmem:[#allocation2 + $0x1] sm:$0xff] }
 0x292   : > { %4850 = vmatprep.mubr.msk.f32.mxu0 %vm1860_vm9, %v1853_v21  ;;  %2311 = vst.msk [vmem:[#allocation2 + $0x70] sm:$0x3] %vm2298_vm10, %v5129_v61  ;;  %2314 = vst.msk [vmem:[#allocation2 + $0x88] sm:$0x3] %vm2298_vm10, %v5129_v61  ;;  %v2417_v39 = vld [vmem:[#allocation2 + $0x9] sm:$0xff]  ;;  %2705 = vrot.lane.b32.xlu0 %v2416_v60, %s5122_s19 }
 0x293   : > { %4851 = vmatmul.mubr.msk.f32.gmra.mrb[30].mxu0 %vm1860_vm9, %v1854_v41  ;;  %2313 = vst.msk [vmem:[#allocation2 + $0x80] sm:$0xff] %vm1624_vm2, %v5129_v61  ;;  %2315 = vst.msk [vmem:[#allocation2 + $0x90] sm:$0xff] %vm1624_vm2, %v5129_v61  ;;  %2707 = vrot.lane.b32.xlu1 %v2417_v39, %s5122_s19 }
 0x294   : > { %2316 = vst.msk [vmem:[#allocation2 + $0x98] sm:$0xff] %vm1624_vm2, %v5129_v61  ;;  %2318 = vst.msk [vmem:[#allocation2 + $0xa8] sm:$0xff] %vm1624_vm2, %v5129_v61 }
 0x295   : > { %2317 = vst.msk [vmem:[#allocation2 + $0xa0] sm:$0x3] %vm2298_vm10, %v5129_v61  ;;  %2320 = vst.msk [vmem:[#allocation2 + $0xb8] sm:$0x3] %vm2298_vm10, %v5129_v61 }
 0x296   : > { %2319 = vst.msk [vmem:[#allocation2 + $0xb0] sm:$0xff] %vm1624_vm2, %v5129_v61  ;;  %2321 = vst.msk [vmem:[#allocation2 + $0xc0] sm:$0xff] %vm1624_vm2, %v5129_v61 }
 0x297   : > { %2322 = vst.msk [vmem:[#allocation2 + $0xc8] sm:$0xff] %vm1624_vm2, %v5129_v61  ;;  %2324 = vst.msk [vmem:[#allocation2 + $0xd8] sm:$0xff] %vm1624_vm2, %v5129_v61 }
 0x298   : > { %2323 = vst.msk [vmem:[#allocation2 + $0xd0] sm:$0x3] %vm2298_vm10, %v5129_v61  ;;  %2326 = vst.msk [vmem:[#allocation2 + $0xe8] sm:$0x3] %vm2298_vm10, %v5129_v61 }
 0x299   : > { %2325 = vst.msk [vmem:[#allocation2 + $0xe0] sm:$0xff] %vm1624_vm2, %v5129_v61  ;;  %2327 = vst.msk [vmem:[#allocation2 + $0xf0] sm:$0xff] %vm1624_vm2, %v5129_v61 }
 0x29a   : > { %2328 = vst.msk [vmem:[#allocation2 + $0xf8] sm:$0xff] %vm1624_vm2, %v5129_v61  ;;  %2330 = vst.msk [vmem:[#allocation2 + $0x108] sm:$0xff] %vm1624_vm2, %v5129_v61 }
 0x29b   : > { %2329 = vst.msk [vmem:[#allocation2 + $0x100] sm:$0x3] %vm2298_vm10, %v5129_v61  ;;  %2332 = vst.msk [vmem:[#allocation2 + $0x118] sm:$0x3] %vm2298_vm10, %v5129_v61 }
 0x29c   : > { %2331 = vst.msk [vmem:[#allocation2 + $0x110] sm:$0xff] %vm1624_vm2, %v5129_v61  ;;  %2333 = vst.msk [vmem:[#allocation2 + $0x120] sm:$0xff] %vm1624_vm2, %v5129_v61 }
 0x29d   : > { %2334 = vst.msk [vmem:[#allocation2 + $0x128] sm:$0xff] %vm1624_vm2, %v5129_v61  ;;  %2336 = vst.msk [vmem:[#allocation2 + $0x138] sm:$0xff] %vm1624_vm2, %v5129_v61 }
 0x29e   : > { %2335 = vst.msk [vmem:[#allocation2 + $0x130] sm:$0x3] %vm2298_vm10, %v5129_v61  ;;  %2338 = vst.msk [vmem:[#allocation2 + $0x148] sm:$0x3] %vm2298_vm10, %v5129_v61 }
 0x29f   : > { %2337 = vst.msk [vmem:[#allocation2 + $0x140] sm:$0xff] %vm1624_vm2, %v5129_v61  ;;  %2339 = vst.msk [vmem:[#allocation2 + $0x150] sm:$0xff] %vm1624_vm2, %v5129_v61 }
 0x2a0   : > { %2340 = vst.msk [vmem:[#allocation2 + $0x158] sm:$0xff] %vm1624_vm2, %v5129_v61  ;;  %2342 = vst.msk [vmem:[#allocation2 + $0x168] sm:$0xff] %vm1624_vm2, %v5129_v61 }
 0x2a1   : > { %2341 = vst.msk [vmem:[#allocation2 + $0x160] sm:$0x3] %vm2298_vm10, %v5129_v61  ;;  %2344 = vst.msk [vmem:[#allocation2 + $0x178] sm:$0x3] %vm2298_vm10, %v5129_v61 }
 0x2a2   : > { %2343 = vst.msk [vmem:[#allocation2 + $0x170] sm:$0xff] %vm1624_vm2, %v5129_v61  ;;  %2345 = vst.msk [vmem:[#allocation2 + $0x180] sm:$0xff] %vm1624_vm2, %v5129_v61 }
 0x2a3   : > { %2346 = vst.msk [vmem:[#allocation2 + $0x188] sm:$0xff] %vm1624_vm2, %v5129_v61  ;;  %2348 = vst.msk [vmem:[#allocation2 + $0x198] sm:$0xff] %vm1624_vm2, %v5129_v61 }
 0x2a4   : > { %2347 = vst.msk [vmem:[#allocation2 + $0x190] sm:$0x3] %vm2298_vm10, %v5129_v61  ;;  %2350 = vst.msk [vmem:[#allocation2 + $0x1a8] sm:$0x3] %vm2298_vm10, %v5129_v61 }
 0x2a5   : > { %2349 = vst.msk [vmem:[#allocation2 + $0x1a0] sm:$0xff] %vm1624_vm2, %v5129_v61 }
 0x325   : > { %v4807_v42 = vpop.f32.mrb[0].mxu0 }
 0x326   : > { %v2194_v2 = vmul.f32 %v4807_v42, %v7091_v28  ;;  %v2027_v7 = vpop.f32.mrb[1].mxu0 }
 0x327   : > { %v2193_v14 = vmul.f32 %v7091_v28, %v2027_v7 }
 0x328   : > { %v2233_v3 = vadd.f32 %v7096_v47, %v2194_v2 }
 0x329   : > { %v2232_v10 = vadd.f32 %v7096_v47, %v2193_v14  ;;  %v4810_v63 = vpop.f32.mrb[2].mxu0 }
 0x32a   : > { %v2265_v5 = vmax.f32 %v2233_v3, 0.0  ;;  %v2196_v49 = vmul.f32 %v4810_v63, %v7091_v28  ;;  %v2037_v51 = vpop.f32.mrb[3].mxu0 }
 0x32b   : > { %v2264_v4 = vmax.f32 %v2232_v10, 0.0  ;;  %v2195_v18 = vmul.f32 %v7091_v28, %v2037_v51 }
 0x32c   : > { %2353 = vst.msk [vmem:[#allocation2 + $0x21] sm:$0xff] %vm1624_vm2, %v2265_v5  ;;  %v2235_v24 = vadd.f32 %v7096_v47, %v2196_v49 }
 0x32d   : > { %2352 = vst.msk [vmem:[#allocation2 + $0x19] sm:$0xff] %vm1624_vm2, %v2264_v4  ;;  %v2234_v59 = vadd.f32 %v7096_v47, %v2195_v18  ;;  %v4813_v25 = vpop.f32.mrb[4].mxu0 }
 0x32e   : > { %v2267_v13 = vmax.f32 %v2235_v24, 0.0  ;;  %v2198_v33 = vmul.f32 %v4813_v25, %v7091_v28  ;;  %v2047_v58 = vpop.f32.mrb[5].mxu0 }
 0x32f   : > { %v2266_v34 = vmax.f32 %v2234_v59, 0.0  ;;  %v2197_v0 = vmul.f32 %v7091_v28, %v2047_v58 }
 0x330   : > { %2355 = vst.msk [vmem:[#allocation2 + $0x39] sm:$0xff] %vm1624_vm2, %v2267_v13  ;;  %v2237_v44 = vadd.f32 %v7096_v47, %v2198_v33 }
 0x331   : > { %2354 = vst.msk [vmem:[#allocation2 + $0x31] sm:$0xff] %vm1624_vm2, %v2266_v34  ;;  %v2236_v12 = vadd.f32 %v7096_v47, %v2197_v0  ;;  %v4816_v11 = vpop.f32.mrb[6].mxu0 }
 0x332   : > { %v2269_v15 = vmax.f32 %v2237_v44, 0.0  ;;  %v2200_v29 = vmul.f32 %v4816_v11, %v7091_v28  ;;  %v2057_v57 = vpop.f32.mrb[7].mxu0 }
 0x333   : > { %v2268_v30 = vmax.f32 %v2236_v12, 0.0  ;;  %v2199_v52 = vmul.f32 %v7091_v28, %v2057_v57  ;;  %v7116_v48 = vld [vmem:[#allocation2 + $0x21] sm:$0xff] }
 0x334   : > { %2357 = vst.msk [vmem:[#allocation2 + $0x51] sm:$0xff] %vm1624_vm2, %v2269_v15  ;;  %v2239_v22 = vadd.f32 %v7096_v47, %v2200_v29  ;;  %2711 = vrot.lane.b32.xlu1 %v7116_v48, %s5122_s19  ;;  %v7122_v35 = vld [vmem:[#allocation2 + $0x19] sm:$0xff] }
 0x335   : > { %2356 = vst.msk [vmem:[#allocation2 + $0x49] sm:$0xff] %vm1624_vm2, %v2268_v30  ;;  %v2238_v19 = vadd.f32 %v7096_v47, %v2199_v52  ;;  %2709 = vrot.lane.b32.xlu0 %v7122_v35, %s5122_s19  ;;  %v4819_v56 = vpop.f32.mrb[8].mxu0 }
 0x336   : > { %v2271_v53 = vmax.f32 %v2239_v22, 0.0  ;;  %v2202_v23 = vmul.f32 %v4819_v56, %v7091_v28  ;;  %v2067_v6 = vpop.f32.mrb[9].mxu0 }
 0x337   : > { %v2270_v38 = vmax.f32 %v2238_v19, 0.0  ;;  %v2201_v43 = vmul.f32 %v7091_v28, %v2067_v6  ;;  %v7130_v1 = vld [vmem:[#allocation2 + $0x39] sm:$0xff] }
 0x338   : > { %2359 = vst.msk [vmem:[#allocation2 + $0x69] sm:$0xff] %vm1624_vm2, %v2271_v53  ;;  %v2241_v32 = vadd.f32 %v7096_v47, %v2202_v23  ;;  %2715 = vrot.lane.b32.xlu1 %v7130_v1, %s5122_s19  ;;  %v7136_v62 = vld [vmem:[#allocation2 + $0x31] sm:$0xff] }
 0x339   : > { %2358 = vst.msk [vmem:[#allocation2 + $0x61] sm:$0xff] %vm1624_vm2, %v2270_v38  ;;  %v2240_v40 = vadd.f32 %v7096_v47, %v2201_v43  ;;  %2713 = vrot.lane.b32.xlu0 %v7136_v62, %s5122_s19  ;;  %v4822_v9 = vpop.f32.mrb[10].mxu0 }
 0x33a   : > { %v2273_v46 = vmax.f32 %v2241_v32, 0.0  ;;  %v2204_v26 = vmul.f32 %v4822_v9, %v7091_v28  ;;  %v2077_v54 = vpop.f32.mrb[11].mxu0 }
 0x33b   : > { %v2272_v31 = vmax.f32 %v2240_v40, 0.0  ;;  %v2203_v55 = vmul.f32 %v7091_v28, %v2077_v54  ;;  %v7144_v20 = vld [vmem:[#allocation2 + $0x51] sm:$0xff] }
 0x33c   : > { %2361 = vst.msk [vmem:[#allocation2 + $0x81] sm:$0xff] %vm1624_vm2, %v2273_v46  ;;  %v2243_v50 = vadd.f32 %v7096_v47, %v2204_v26  ;;  %2719 = vrot.lane.b32.xlu1 %v7144_v20, %s5122_s19  ;;  %v7150_v36 = vld [vmem:[#allocation2 + $0x49] sm:$0xff] }
 0x33d   : > { %2360 = vst.msk [vmem:[#allocation2 + $0x79] sm:$0xff] %vm1624_vm2, %v2272_v31  ;;  %v2242_v45 = vadd.f32 %v7096_v47, %v2203_v55  ;;  %2717 = vrot.lane.b32.xlu0 %v7150_v36, %s5122_s19  ;;  %v4825_v27 = vpop.f32.mrb[12].mxu0 }
 0x33e   : > { %v2275_v37 = vmax.f32 %v2243_v50, 0.0  ;;  %v2206_v17 = vmul.f32 %v4825_v27, %v7091_v28  ;;  %v2087_v16 = vpop.f32.mrb[13].mxu0 }
 0x33f   : > { %v2274_v8 = vmax.f32 %v2242_v45, 0.0  ;;  %v2205_v41 = vmul.f32 %v7091_v28, %v2087_v16  ;;  %v7158_v21 = vld [vmem:[#allocation2 + $0x69] sm:$0xff] }
 0x340   : > { %2363 = vst.msk [vmem:[#allocation2 + $0x99] sm:$0xff] %vm1624_vm2, %v2275_v37  ;;  %v2245_v61 = vadd.f32 %v7096_v47, %v2206_v17  ;;  %2723 = vrot.lane.b32.xlu1 %v7158_v21, %s5122_s19  ;;  %v7164_v39 = vld [vmem:[#allocation2 + $0x61] sm:$0xff] }
 0x341   : > { %2362 = vst.msk [vmem:[#allocation2 + $0x91] sm:$0xff] %vm1624_vm2, %v2274_v8  ;;  %v2244_v60 = vadd.f32 %v7096_v47, %v2205_v41  ;;  %2721 = vrot.lane.b32.xlu0 %v7164_v39, %s5122_s19  ;;  %v4828_v42 = vpop.f32.mrb[14].mxu0 }
 0x342   : > { %v2277_v2 = vmax.f32 %v2245_v61, 0.0  ;;  %v2208_v7 = vmul.f32 %v4828_v42, %v7091_v28  ;;  %v2097_v14 = vpop.f32.mrb[15].mxu0 }
 0x343   : > { %v2276_v3 = vmax.f32 %v2244_v60, 0.0  ;;  %v2207_v10 = vmul.f32 %v7091_v28, %v2097_v14  ;;  %v7172_v63 = vld [vmem:[#allocation2 + $0x81] sm:$0xff] }
 0x344   : > { %2365 = vst.msk [vmem:[#allocation2 + $0xb1] sm:$0xff] %vm1624_vm2, %v2277_v2  ;;  %v2247_v5 = vadd.f32 %v7096_v47, %v2208_v7  ;;  %2727 = vrot.lane.b32.xlu1 %v7172_v63, %s5122_s19  ;;  %v7178_v49 = vld [vmem:[#allocation2 + $0x79] sm:$0xff] }
 0x345   : > { %2364 = vst.msk [vmem:[#allocation2 + $0xa9] sm:$0xff] %vm1624_vm2, %v2276_v3  ;;  %v2246_v51 = vadd.f32 %v7096_v47, %v2207_v10  ;;  %2725 = vrot.lane.b32.xlu0 %v7178_v49, %s5122_s19  ;;  %v4831_v4 = vpop.f32.mrb[16].mxu0 }
 0x346   : > { %v2279_v18 = vmax.f32 %v2247_v5, 0.0  ;;  %v2210_v24 = vmul.f32 %v4831_v4, %v7091_v28  ;;  %v2107_v59 = vpop.f32.mrb[17].mxu0 }
 0x347   : > { %v2278_v25 = vmax.f32 %v2246_v51, 0.0  ;;  %v2209_v13 = vmul.f32 %v7091_v28, %v2107_v59  ;;  %v7186_v33 = vld [vmem:[#allocation2 + $0x99] sm:$0xff] }
 0x348   : > { %2367 = vst.msk [vmem:[#allocation2 + $0xc9] sm:$0xff] %vm1624_vm2, %v2279_v18  ;;  %v2249_v58 = vadd.f32 %v7096_v47, %v2210_v24  ;;  %2731 = vrot.lane.b32.xlu1 %v7186_v33, %s5122_s19  ;;  %v7192_v34 = vld [vmem:[#allocation2 + $0x91] sm:$0xff] }
 0x349   : > { %2366 = vst.msk [vmem:[#allocation2 + $0xc1] sm:$0xff] %vm1624_vm2, %v2278_v25  ;;  %v2248_v0 = vadd.f32 %v7096_v47, %v2209_v13  ;;  %2729 = vrot.lane.b32.xlu0 %v7192_v34, %s5122_s19  ;;  %v4834_v44 = vpop.f32.mrb[18].mxu0 }
 0x34a   : > { %v2281_v12 = vmax.f32 %v2249_v58, 0.0  ;;  %v2212_v11 = vmul.f32 %v4834_v44, %v7091_v28  ;;  %v2117_v15 = vpop.f32.mrb[19].mxu0 }
 0x34b   : > { %v2280_v29 = vmax.f32 %v2248_v0, 0.0  ;;  %v2211_v57 = vmul.f32 %v7091_v28, %v2117_v15  ;;  %v7200_v30 = vld [vmem:[#allocation2 + $0xb1] sm:$0xff] }
 0x34c   : > { %2369 = vst.msk [vmem:[#allocation2 + $0xe1] sm:$0xff] %vm1624_vm2, %v2281_v12  ;;  %v2251_v52 = vadd.f32 %v7096_v47, %v2212_v11  ;;  %2735 = vrot.lane.b32.xlu1 %v7200_v30, %s5122_s19  ;;  %v7206_v22 = vld [vmem:[#allocation2 + $0xa9] sm:$0xff] }
 0x34d   : > { %2368 = vst.msk [vmem:[#allocation2 + $0xd9] sm:$0xff] %vm1624_vm2, %v2280_v29  ;;  %v2250_v19 = vadd.f32 %v7096_v47, %v2211_v57  ;;  %2733 = vrot.lane.b32.xlu0 %v7206_v22, %s5122_s19  ;;  %v4837_v56 = vpop.f32.mrb[20].mxu0 }
 0x34e   : > { %v2283_v53 = vmax.f32 %v2251_v52, 0.0  ;;  %v2214_v23 = vmul.f32 %v4837_v56, %v7091_v28  ;;  %v2127_v6 = vpop.f32.mrb[21].mxu0 }
 0x34f   : > { %v2282_v38 = vmax.f32 %v2250_v19, 0.0  ;;  %v2213_v43 = vmul.f32 %v7091_v28, %v2127_v6  ;;  %v7214_v32 = vld [vmem:[#allocation2 + $0xc9] sm:$0xff] }
 0x350   : > { %2371 = vst.msk [vmem:[#allocation2 + $0xf9] sm:$0xff] %vm1624_vm2, %v2283_v53  ;;  %v2253_v40 = vadd.f32 %v7096_v47, %v2214_v23  ;;  %2739 = vrot.lane.b32.xlu1 %v7214_v32, %s5122_s19  ;;  %v7220_v9 = vld [vmem:[#allocation2 + $0xc1] sm:$0xff] }
 0x351   : > { %2370 = vst.msk [vmem:[#allocation2 + $0xf1] sm:$0xff] %vm1624_vm2, %v2282_v38  ;;  %v2252_v46 = vadd.f32 %v7096_v47, %v2213_v43  ;;  %2737 = vrot.lane.b32.xlu0 %v7220_v9, %s5122_s19 }
 0x352   : > { %v4840_v26 = vpop.f32.mrb[22].mxu0  ;;  %v2285_v54 = vmax.f32 %v2253_v40, 0.0 }
 0x353   : > { %v2216_v31 = vmul.f32 %v4840_v26, %v7091_v28  ;;  %v2137_v55 = vpop.f32.mrb[23].mxu0  ;;  %v2284_v50 = vmax.f32 %v2252_v46, 0.0  ;;  %v7228_v27 = vld [vmem:[#allocation2 + $0xe1] sm:$0xff] }
 0x354   : > { %v2215_v45 = vmul.f32 %v7091_v28, %v2137_v55  ;;  %2373 = vst.msk [vmem:[#allocation2 + $0x111] sm:$0xff] %vm1624_vm2, %v2285_v54  ;;  %2743 = vrot.lane.b32.xlu1 %v7228_v27, %s5122_s19  ;;  %v7234_v17 = vld [vmem:[#allocation2 + $0xd9] sm:$0xff] }
 0x355   : > { %v2255_v37 = vadd.f32 %v7096_v47, %v2216_v31  ;;  %2372 = vst.msk [vmem:[#allocation2 + $0x109] sm:$0xff] %vm1624_vm2, %v2284_v50  ;;  %2741 = vrot.lane.b32.xlu0 %v7234_v17, %s5122_s19 }
 0x356   : > { %v2254_v16 = vadd.f32 %v7096_v47, %v2215_v45 }
 0x357   : > { %v2287_v41 = vmax.f32 %v2255_v37, 0.0  ;;  %v7242_v7 = vld [vmem:[#allocation2 + $0xf9] sm:$0xff] }
 0x358   : > { %v4843_v8 = vpop.f32.mrb[24].mxu0  ;;  %v2286_v42 = vmax.f32 %v2254_v16, 0.0  ;;  %2747 = vrot.lane.b32.xlu1 %v7242_v7, %s5122_s19  ;;  %v7248_v3 = vld [vmem:[#allocation2 + $0xf1] sm:$0xff] }
 0x359   : > { %v2218_v61 = vmul.f32 %v4843_v8, %v7091_v28  ;;  %v2147_v60 = vpop.f32.mrb[25].mxu0  ;;  %2375 = vst.msk [vmem:[#allocation2 + $0x129] sm:$0xff] %vm1624_vm2, %v2287_v41  ;;  %2745 = vrot.lane.b32.xlu0 %v7248_v3, %s5122_s19  ;;  %v2448_v41 = vld [vmem:[#allocation2 + $0x2] sm:$0xff] }
 0x35a   : > { %v2217_v2 = vmul.f32 %v7091_v28, %v2147_v60  ;;  %2374 = vst.msk [vmem:[#allocation2 + $0x121] sm:$0xff] %vm1624_vm2, %v2286_v42  ;;  %v2450_v60 = vld [vmem:[#allocation2 + $0x1a] sm:$0xff] }
 0x35b   : > { %v2257_v14 = vadd.f32 %v7096_v47, %v2218_v61  ;;  %v7256_v25 = vld [vmem:[#allocation2 + $0x111] sm:$0xff]  ;;  %v2451_v61 = vld [vmem:[#allocation2 + $0x22] sm:$0xff]  ;;  %v7297_v42 = vld [vmem:[#allocation2 + $0x3a] sm:$0xff] }
 0x35c   : > { %v2256_v10 = vadd.f32 %v7096_v47, %v2217_v2  ;;  %2751 = vrot.lane.b32.xlu1 %v7256_v25, %s5122_s19  ;;  %v7262_v58 = vld [vmem:[#allocation2 + $0x109] sm:$0xff]  ;;  %v7301_v2 = vld [vmem:[#allocation2 + $0x32] sm:$0xff] }
 0x35d   : > { %v4846_v5 = vpop.f32.mrb[26].mxu0  ;;  %v2289_v51 = vmax.f32 %v2257_v14, 0.0  ;;  %2749 = vrot.lane.b32.xlu0 %v7262_v58, %s5122_s19  ;;  %v7305_v14 = vld [vmem:[#allocation2 + $0x52] sm:$0xff] }
 0x35e   : > { %v2220_v4 = vmul.f32 %v4846_v5, %v7091_v28  ;;  %v2157_v18 = vpop.f32.mrb[27].mxu0  ;;  %v2288_v24 = vmax.f32 %v2256_v10, 0.0  ;;  %v7309_v10 = vld [vmem:[#allocation2 + $0x4a] sm:$0xff] }
 0x35f   : > { %v2219_v59 = vmul.f32 %v7091_v28, %v2157_v18  ;;  %2377 = vst.msk [vmem:[#allocation2 + $0x141] sm:$0xff] %vm1624_vm2, %v2289_v51  ;;  %v7313_v5 = vld [vmem:[#allocation2 + $0x6a] sm:$0xff]  ;;  %v7317_v51 = vld [vmem:[#allocation2 + $0x62] sm:$0xff]  ;;  %v7325_v18 = vld [vmem:[#allocation2 + $0x7a] sm:$0xff] }
 0x360   : > { %v2259_v13 = vadd.f32 %v7096_v47, %v2220_v4  ;;  %2376 = vst.msk [vmem:[#allocation2 + $0x139] sm:$0xff] %vm1624_vm2, %v2288_v24  ;;  %v2441_v52 = vld [vmem:[#allocation2 + $0x129] sm:$0xff]  ;;  %v7329_v24 = vld [vmem:[#allocation2 + $0x9a] sm:$0xff] }
 0x361   : > { %v2258_v0 = vadd.f32 %v7096_v47, %v2219_v59  ;;  %2755 = vrot.lane.b32.xlu1 %v2441_v52, %s5122_s19  ;;  %v7273_v56 = vld [vmem:[#allocation2 + $0x121] sm:$0xff]  ;;  %v7333_v59 = vld [vmem:[#allocation2 + $0x92] sm:$0xff] }
 0x362   : > { %v4849_v44 = vpop.f32.mrb[28].mxu0  ;;  %v2291_v12 = vmax.f32 %v2259_v13, 0.0  ;;  %2753 = vrot.lane.b32.xlu0 %v7273_v56, %s5122_s19  ;;  %v7321_v4 = vld [vmem:[#allocation2 + $0x82] sm:$0xff]  ;;  %v7337_v13 = vld [vmem:[#allocation2 + $0xb2] sm:$0xff] }
 0x363   : > { %v2222_v11 = vmul.f32 %v4849_v44, %v7091_v28  ;;  %v2167_v15 = vpop.f32.mrb[29].mxu0  ;;  %v2290_v29 = vmax.f32 %v2258_v0, 0.0  ;;  %v7341_v0 = vld [vmem:[#allocation2 + $0xaa] sm:$0xff]  ;;  %v2471_v52 = vld [vmem:[#allocation2 + $0x112] sm:$0xff] }
 0x364   : > { %v2221_v57 = vmul.f32 %v7091_v28, %v2167_v15  ;;  %2379 = vst.msk [vmem:[#allocation2 + $0x159] sm:$0xff] %vm1624_vm2, %v2291_v12  ;;  %v7345_v44 = vld [vmem:[#allocation2 + $0xca] sm:$0xff]  ;;  %v7349_v12 = vld [vmem:[#allocation2 + $0xc2] sm:$0xff]  ;;  %v7354_v15 = vld [vmem:[#allocation2 + $0xda] sm:$0xff] }
 0x365   : > { %v2261_v19 = vadd.f32 %v7096_v47, %v2222_v11  ;;  %2378 = vst.msk [vmem:[#allocation2 + $0x151] sm:$0xff] %vm1624_vm2, %v2290_v29  ;;  %v2467_v11 = vld [vmem:[#allocation2 + $0xe2] sm:$0xff]  ;;  %v2469_v29 = vld [vmem:[#allocation2 + $0xfa] sm:$0xff] }
 0x366   : > { %v2260_v53 = vadd.f32 %v7096_v47, %v2221_v57  ;;  %v4852_v23 = vpop.f32.mrb[30].mxu0  ;;  %v2443_v26 = vld [vmem:[#allocation2 + $0x141] sm:$0xff]  ;;  %v2468_v57 = vld [vmem:[#allocation2 + $0xf2] sm:$0xff] }
 0x367   : > { %v2293_v6 = vmax.f32 %v2261_v19, 0.0  ;;  %v2224_v38 = vmul.f32 %v4852_v23, %v7091_v28  ;;  %v2177_v43 = vpop.f32.mrb[31].mxu0  ;;  %2759 = vrot.lane.b32.xlu1 %v2443_v26, %s5122_s19  ;;  %v2442_v31 = vld [vmem:[#allocation2 + $0x139] sm:$0xff]  ;;  %v2470_v19 = vld [vmem:[#allocation2 + $0x10a] sm:$0xff]  ;;  %v2472_v23 = vld [vmem:[#allocation2 + $0x122] sm:$0xff] }
 0x368   : > { %v2292_v40 = vmax.f32 %v2260_v53, 0.0  ;;  %v2223_v46 = vmul.f32 %v7091_v28, %v2177_v43  ;;  %2757 = vrot.lane.b32.xlu0 %v2442_v31, %s5122_s19  ;;  %v2473_v53 = vld [vmem:[#allocation2 + $0x12a] sm:$0xff]  ;;  %v2475_v43 = vld [vmem:[#allocation2 + $0x142] sm:$0xff] }
 0x369   : > { %2381 = vst.msk [vmem:[#allocation2 + $0x171] sm:$0xff] %vm1624_vm2, %v2293_v6  ;;  %v2263_v54 = vadd.f32 %v7096_v47, %v2224_v38  ;;  %v7363_v6 = vpop.permute.xlu1 %2707  ;;  %v7366_v38 = vpop.permute.xlu0 %2705 }
 0x36a   : > { %2380 = vst.msk [vmem:[#allocation2 + $0x169] sm:$0xff] %vm1624_vm2, %v2292_v40  ;;  %v2262_v55 = vadd.f32 %v7096_v47, %v2223_v46  ;;  %v2449_v47 = vld [vmem:[#allocation2 + $0xa] sm:$0xff]  ;;  %8908 = vst [vmem:[#allocation7_spill] sm:$0xff] %v7363_v6  ;;  %v2474_v40 = vld [vmem:[#allocation2 + $0x13a] sm:$0xff] }
 0x36b   : > { %v2295_v50 = vmax.f32 %v2263_v54, 0.0  ;;  %v2445_v37 = vld [vmem:[#allocation2 + $0x159] sm:$0xff]  ;;  %8909 = vst [vmem:[#allocation11_spill] sm:$0xff] %v7366_v38 }
 0x36c   : > { %v2294_v45 = vmax.f32 %v2262_v55, 0.0  ;;  %2763 = vrot.lane.b32.xlu1 %v2445_v37, %s5122_s19  ;;  %v2444_v28 = vld [vmem:[#allocation2 + $0x151] sm:$0xff]  ;;  %v2477_v54 = vld [vmem:[#allocation2 + $0x15a] sm:$0xff] }
 0x36d   : > { %2383 = vst.msk [vmem:[#allocation2 + $0x189] sm:$0xff] %vm1624_vm2, %v2295_v50  ;;  %2761 = vrot.lane.b32.xlu0 %v2444_v28, %s5122_s19  ;;  %v2476_v31 = vld [vmem:[#allocation2 + $0x152] sm:$0xff] }
 0x36e   : > { %2382 = vst.msk [vmem:[#allocation2 + $0x181] sm:$0xff] %vm1624_vm2, %v2294_v45  ;;  %v7444_v38 = vld [vmem:[#allocation2 + $0x98] sm:$0xff] }
 0x370   : > { %v2447_v16 = vld [vmem:[#allocation2 + $0x171] sm:$0xff] }
 0x371   : > { %2767 = vrot.lane.b32.xlu1 %v2447_v16, %s5122_s19  ;;  %v2446_v8 = vld [vmem:[#allocation2 + $0x169] sm:$0xff]  ;;  %v2479_v45 = vld [vmem:[#allocation2 + $0x172] sm:$0xff]  ;;  %v7384_v16 = vld [vmem:[#allocation2 + $0x20] sm:$0xff] }
 0x372   : > { %2765 = vrot.lane.b32.xlu0 %v2446_v8, %s5122_s19  ;;  %v2478_v37 = vld [vmem:[#allocation2 + $0x16a] sm:$0xff]  ;;  %8914 = vst [vmem:[#allocation70_spill] sm:$0xff] %v7384_v16  ;;  %s4450_s19 = sshll.u32 %s269_s14, 4 }
 0x375   : > { %2835 = vrot.lane.b32.xlu1 %v2449_v47, %s5124_s21  ;;  %v7388_v47 = vld [vmem:[#allocation2 + $0x18] sm:$0xff] }
 0x376   : > { %2833 = vrot.lane.b32.xlu0 %v2448_v41, %s5124_s21 }
 0x379   : > { %2839 = vrot.lane.b32.xlu1 %v2451_v61, %s5124_s21  ;;  %v7396_v61 = vld [vmem:[#allocation2 + $0x38] sm:$0xff] }
 0x37a   : > { %2837 = vrot.lane.b32.xlu0 %v2450_v60, %s5124_s21  ;;  %8917 = vst [vmem:[#allocation15_spill] sm:$0xff] %v7396_v61 }
 0x37d   : > { %2843 = vrot.lane.b32.xlu1 %v7297_v42, %s5124_s21 }
 0x37e   : > { %2841 = vrot.lane.b32.xlu0 %v7301_v2, %s5124_s21 }
 0x381   : > { %2847 = vrot.lane.b32.xlu1 %v7305_v14, %s5124_s21 }
 0x382   : > { %2845 = vrot.lane.b32.xlu0 %v7309_v10, %s5124_s21 }
 0x385   : > { %2851 = vrot.lane.b32.xlu1 %v7313_v5, %s5124_s21 }
 0x386   : > { %2849 = vrot.lane.b32.xlu0 %v7317_v51, %s5124_s21 }
 0x389   : > { %2855 = vrot.lane.b32.xlu1 %v7321_v4, %s5124_s21 }
 0x38a   : > { %2853 = vrot.lane.b32.xlu0 %v7325_v18, %s5124_s21 }
 0x38d   : > { %2859 = vrot.lane.b32.xlu1 %v7329_v24, %s5124_s21 }
 0x38e   : > { %2857 = vrot.lane.b32.xlu0 %v7333_v59, %s5124_s21 }
 0x391   : > { %2863 = vrot.lane.b32.xlu1 %v7337_v13, %s5124_s21 }
 0x392   : > { %2861 = vrot.lane.b32.xlu0 %v7341_v0, %s5124_s21 }
 0x395   : > { %2867 = vrot.lane.b32.xlu1 %v7345_v44, %s5124_s21 }
 0x396   : > { %2865 = vrot.lane.b32.xlu0 %v7349_v12, %s5124_s21 }
 0x399   : > { %2871 = vrot.lane.b32.xlu1 %v2467_v11, %s5124_s21  ;;  %v7400_v11 = vld [vmem:[#allocation2 + $0x30] sm:$0xff] }
 0x39a   : > { %2869 = vrot.lane.b32.xlu0 %v7354_v15, %s5124_s21  ;;  %8919 = vst [vmem:[#allocation73_spill] sm:$0xff] %v7400_v11 }
 0x39d   : > { %2875 = vrot.lane.b32.xlu1 %v2469_v29, %s5124_s21 }
 0x39e   : > { %2873 = vrot.lane.b32.xlu0 %v2468_v57, %s5124_s21  ;;  %v7408_v57 = vld [vmem:[#allocation2 + $0x50] sm:$0xff] }
 0x3a1   : > { %2879 = vrot.lane.b32.xlu1 %v2471_v52, %s5124_s21 }
 0x3a2   : > { %2877 = vrot.lane.b32.xlu0 %v2470_v19, %s5124_s21  ;;  %v7412_v19 = vld [vmem:[#allocation2 + $0x48] sm:$0xff] }
 0x3a5   : > { %2883 = vrot.lane.b32.xlu1 %v2473_v53, %s5124_s21 }
 0x3a6   : > { %2881 = vrot.lane.b32.xlu0 %v2472_v23, %s5124_s21  ;;  %v7370_v46 = vpop.permute.xlu1 %2711  ;;  %v7420_v23 = vld [vmem:[#allocation2 + $0x68] sm:$0xff] }
 0x3a7   : > { %8910 = vst [vmem:[#allocation66_spill] sm:$0xff] %v7370_v46  ;;  %v7372_v26 = vpop.permute.xlu0 %2709 }
 0x3a9   : > { %2887 = vrot.lane.b32.xlu1 %v2475_v43, %s5124_s21 }
 0x3aa   : > { %2885 = vrot.lane.b32.xlu0 %v2474_v40, %s5124_s21  ;;  %v7376_v55 = vpop.permute.xlu1 %2715  ;;  %v7424_v40 = vld [vmem:[#allocation2 + $0x60] sm:$0xff] }
 0x3ab   : > { %8911 = vst [vmem:[#allocation67_spill] sm:$0xff] %v7376_v55  ;;  %v7378_v50 = vpop.permute.xlu0 %2713  ;;  %v7496_v55 = vld [vmem:[#allocation2 + $0xf0] sm:$0xff] }
 0x3ac   : > { %8912 = vst [vmem:[#allocation6_spill] sm:$0xff] %v7378_v50  ;;  %8937 = vst [vmem:[#allocation27_spill] sm:$0xff] %v7496_v55 }
 0x3ad   : > { %2891 = vrot.lane.b32.xlu1 %v2477_v54, %s5124_s21 }
 0x3ae   : > { %2889 = vrot.lane.b32.xlu0 %v2476_v31, %s5124_s21  ;;  %v7382_v28 = vpop.permute.xlu1 %2719  ;;  %v7432_v31 = vld [vmem:[#allocation2 + $0x80] sm:$0xff] }
 0x3af   : > { %8913 = vst [vmem:[#allocation10_spill] sm:$0xff] %v7382_v28  ;;  %v7386_v8 = vpop.permute.xlu0 %2717 }
 0x3b0   : > { %8915 = vst [vmem:[#allocation71_spill] sm:$0xff] %v7386_v8  ;;  %v7484_v8 = vld [vmem:[#allocation2 + $0xd8] sm:$0xff] }
 0x3b1   : > { %2895 = vrot.lane.b32.xlu1 %v2479_v45, %s5124_s21 }
 0x3b2   : > { %2893 = vrot.lane.b32.xlu0 %v2478_v37, %s5124_s21  ;;  %v7394_v41 = vpop.permute.xlu1 %2723  ;;  %v7436_v37 = vld [vmem:[#allocation2 + $0x78] sm:$0xff]  ;;  %s271_s21 = scalar_lea.vmem [#allocation3], %s4450_s19 }
 0x3b3   : > { %8916 = vst [vmem:[#allocation14_spill] sm:$0xff] %v7394_v41  ;;  %v7398_v60 = vpop.permute.xlu0 %2721 }
 0x3b4   : > { %8918 = vst [vmem:[#allocation72_spill] sm:$0xff] %v7398_v60  ;;  %v7472_v60 = vld [vmem:[#allocation2 + $0xc0] sm:$0xff] }
 0x3b5   : > { %2963 = vrot.lane.b32.xlu1 %v7384_v16, %s5126_s23  ;;  %v7508_v16 = vld [vmem:[#allocation2 + $0x108] sm:$0xff] }
 0x3b6   : > { %2961 = vrot.lane.b32.xlu0 %v7388_v47, %s5126_s23  ;;  %v7406_v29 = vpop.permute.xlu1 %2727  ;;  %8941 = vst [vmem:[#allocation77_spill] sm:$0xff] %v7508_v16 }
 0x3b7   : > { %8920 = vst [vmem:[#allocation16_spill] sm:$0xff] %v7406_v29  ;;  %v7410_v52 = vpop.permute.xlu0 %2725 }
 0x3b8   : > { %8921 = vst [vmem:[#allocation17_spill] sm:$0xff] %v7410_v52  ;;  %v7460_v52 = vld [vmem:[#allocation2 + $0xa8] sm:$0xff] }
 0x3b9   : > { %2967 = vrot.lane.b32.xlu1 %v7396_v61, %s5126_s23 }
 0x3ba   : > { %2965 = vrot.lane.b32.xlu0 %v7400_v11, %s5126_s23  ;;  %v7418_v53 = vpop.permute.xlu1 %2731  ;;  %v2410_v11 = vld [vmem:[#allocation2 + $0x138] sm:$0xff] }
 0x3bb   : > { %8922 = vst [vmem:[#allocation74_spill] sm:$0xff] %v7418_v53  ;;  %v7422_v43 = vpop.permute.xlu0 %2729 }
 0x3bc   : > { %8923 = vst [vmem:[#allocation75_spill] sm:$0xff] %v7422_v43  ;;  %v7448_v43 = vld [vmem:[#allocation2 + $0x90] sm:$0xff] }
 0x3bd   : > { %2971 = vrot.lane.b32.xlu1 %v7408_v57, %s5126_s23 }
 0x3be   : > { %2969 = vrot.lane.b32.xlu0 %v7412_v19, %s5126_s23  ;;  %v7430_v54 = vpop.permute.xlu1 %2735 }
 0x3bf   : > { %8924 = vst [vmem:[#allocation18_spill] sm:$0xff] %v7430_v54  ;;  %v7434_v45 = vpop.permute.xlu0 %2733 }
 0x3c0   : > { %8925 = vst [vmem:[#allocation19_spill] sm:$0xff] %v7434_v45  ;;  %v7456_v45 = vld [vmem:[#allocation2 + $0xb0] sm:$0xff] }
 0x3c1   : > { %2975 = vrot.lane.b32.xlu1 %v7420_v23, %s5126_s23 }
 0x3c2   : > { %2973 = vrot.lane.b32.xlu0 %v7424_v40, %s5126_s23  ;;  %v7442_v6 = vpop.permute.xlu1 %2739 }
 0x3c3   : > { %8926 = vst [vmem:[#allocation22_spill] sm:$0xff] %v7442_v6  ;;  %v7446_v53 = vpop.permute.xlu0 %2737 }
 0x3c4   : > { %8927 = vst [vmem:[#allocation23_spill] sm:$0xff] %v7446_v53  ;;  %v7468_v53 = vld [vmem:[#allocation2 + $0xc8] sm:$0xff] }
 0x3c5   : > { %2979 = vrot.lane.b32.xlu1 %v7432_v31, %s5126_s23 }
 0x3c6   : > { %2977 = vrot.lane.b32.xlu0 %v7436_v37, %s5126_s23  ;;  %v7454_v54 = vpop.permute.xlu1 %2743 }
 0x3c7   : > { %8928 = vst [vmem:[#allocation132_spill] sm:$0xff] %v7454_v54  ;;  %v7458_v29 = vpop.permute.xlu0 %2741 }
 0x3c8   : > { %8929 = vst [vmem:[#allocation133_spill] sm:$0xff] %v7458_v29  ;;  %v7480_v29 = vld [vmem:[#allocation2 + $0xe0] sm:$0xff] }
 0x3c9   : > { %2983 = vrot.lane.b32.xlu1 %v7444_v38, %s5126_s23 }
 0x3ca   : > { %2981 = vrot.lane.b32.xlu0 %v7448_v43, %s5126_s23  ;;  %v7466_v6 = vpop.permute.xlu1 %2747 }
 0x3cb   : > { %8930 = vst [vmem:[#allocation96_spill] sm:$0xff] %v7466_v6  ;;  %v7470_v41 = vpop.permute.xlu0 %2745 }
 0x3cc   : > { %8931 = vst [vmem:[#allocation97_spill] sm:$0xff] %v7470_v41  ;;  %v7492_v41 = vld [vmem:[#allocation2 + $0xf8] sm:$0xff] }
 0x3cd   : > { %2987 = vrot.lane.b32.xlu1 %v7456_v45, %s5126_s23  ;;  %8935 = vst [vmem:[#allocation9_spill] sm:$0xff] %v7492_v41 }
 0x3ce   : > { %2985 = vrot.lane.b32.xlu0 %v7460_v52, %s5126_s23  ;;  %v7478_v54 = vpop.permute.xlu1 %2751 }
 0x3cf   : > { %8932 = vst [vmem:[#allocation156_spill] sm:$0xff] %v7478_v54  ;;  %v7482_v28 = vpop.permute.xlu0 %2749 }
 0x3d0   : > { %8933 = vst [vmem:[#allocation157_spill] sm:$0xff] %v7482_v28  ;;  %v7504_v28 = vld [vmem:[#allocation2 + $0x110] sm:$0xff] }
 0x3d1   : > { %2991 = vrot.lane.b32.xlu1 %v7468_v53, %s5126_s23  ;;  %8939 = vst [vmem:[#allocation57_spill] sm:$0xff] %v7504_v28 }
 0x3d2   : > { %2989 = vrot.lane.b32.xlu0 %v7472_v60, %s5126_s23 }
 0x3d3   : > { %v7490_v6 = vpop.permute.xlu1 %2755 }
 0x3d4   : > { %8934 = vst [vmem:[#allocation8_spill] sm:$0xff] %v7490_v6  ;;  %v7494_v61 = vpop.permute.xlu0 %2753 }
 0x3d5   : > { %2995 = vrot.lane.b32.xlu1 %v7480_v29, %s5126_s23  ;;  %8936 = vst [vmem:[#allocation26_spill] sm:$0xff] %v7494_v61  ;;  %v2409_v61 = vld [vmem:[#allocation2 + $0x128] sm:$0xff] }
 0x3d6   : > { %2993 = vrot.lane.b32.xlu0 %v7484_v8, %s5126_s23 }
 0x3d9   : > { %2999 = vrot.lane.b32.xlu1 %v7492_v41, %s5126_s23  ;;  %v7502_v54 = vpop.permute.xlu1 %2759 }
 0x3da   : > { %2997 = vrot.lane.b32.xlu0 %v7496_v55, %s5126_s23  ;;  %8938 = vst [vmem:[#allocation56_spill] sm:$0xff] %v7502_v54  ;;  %v7506_v50 = vpop.permute.xlu0 %2757  ;;  %v2408_v55 = vld [vmem:[#allocation2 + $0x120] sm:$0xff] }
 0x3db   : > { %8940 = vst [vmem:[#allocation76_spill] sm:$0xff] %v7506_v50  ;;  %v2411_v50 = vld [vmem:[#allocation2 + $0x140] sm:$0xff] }
 0x3dd   : > { %3003 = vrot.lane.b32.xlu1 %v7504_v28, %s5126_s23 }
 0x3de   : > { %3001 = vrot.lane.b32.xlu0 %v7508_v16, %s5126_s23  ;;  %v7514_v6 = vpop.permute.xlu1 %2763 }
 0x3df   : > { %8942 = vst [vmem:[#allocation134_spill] sm:$0xff] %v7514_v6  ;;  %v7516_v41 = vpop.permute.xlu0 %2761  ;;  %v2413_v6 = vld [vmem:[#allocation2 + $0x158] sm:$0xff] }
 0x3e0   : > { %8943 = vst [vmem:[#allocation135_spill] sm:$0xff] %v7516_v41  ;;  %v2412_v41 = vld [vmem:[#allocation2 + $0x150] sm:$0xff] }
 0x3e1   : > { %3007 = vrot.lane.b32.xlu1 %v2409_v61, %s5126_s23  ;;  %v2415_v61 = vld [vmem:[#allocation2 + $0x170] sm:$0xff] }
 0x3e2   : > { %3005 = vrot.lane.b32.xlu0 %v2408_v55, %s5126_s23 }
 0x3e3   : > { %v7520_v54 = vpop.permute.xlu1 %2767 }
 0x3e4   : > { %8944 = vst [vmem:[#allocation98_spill] sm:$0xff] %v7520_v54  ;;  %v7522_v46 = vpop.permute.xlu0 %2765 }
 0x3e5   : > { %8945 = vst [vmem:[#allocation99_spill] sm:$0xff] %v7522_v46  ;;  %3011 = vrot.lane.b32.xlu1 %v2411_v50, %s5126_s23  ;;  %v2414_v46 = vld [vmem:[#allocation2 + $0x168] sm:$0xff] }
 0x3e6   : > { %3009 = vrot.lane.b32.xlu0 %v2410_v11, %s5126_s23 }
 0x3e7   : > { %v7526_v28 = vpop.permute.xlu1 %2835 }
 0x3e8   : > { %8946 = vst [vmem:[#allocation158_spill] sm:$0xff] %v7526_v28  ;;  %v7528_v16 = vpop.permute.xlu0 %2833  ;;  %v2511_v28 = vld [vmem:[#allocation2 + $0x188] sm:$0xff] }
 0x3e9   : > { %8947 = vst [vmem:[#allocation159_spill] sm:$0xff] %v7528_v16  ;;  %3015 = vrot.lane.b32.xlu1 %v2413_v6, %s5126_s23  ;;  %v2510_v6 = vld [vmem:[#allocation2 + $0x180] sm:$0xff] }
 0x3ea   : > { %3013 = vrot.lane.b32.xlu0 %v2412_v41, %s5126_s23 }
 0x3eb   : > { %v7532_v55 = vpop.permute.xlu1 %2839 }
 0x3ec   : > { %v7534_v54 = vpop.permute.xlu0 %2837 }
 0x3ed   : > { %3019 = vrot.lane.b32.xlu1 %v2415_v61, %s5126_s23 }
 0x3ee   : > { %3017 = vrot.lane.b32.xlu0 %v2414_v46, %s5126_s23 }
 0x3ef   : > { %v7538_v50 = vpop.permute.xlu1 %2843 }
 0x3f0   : > { %v7540_v11 = vpop.permute.xlu0 %2841 }
 0x3f1   : > { %3023 = vrot.lane.b32.xlu1 %v2511_v28, %s5126_s23 }
 0x3f2   : > { %3021 = vrot.lane.b32.xlu0 %v2510_v6, %s5126_s23  ;;  %s4716_s23 = sshll.u32 %s5197_s28, 8  ;;  %s5135_s28 = smov [#allocation3]  }
 0x3f3   : > { %v7544_v41 = vpop.permute.xlu1 %2847 }
 0x3f4   : > { %v7546_v16 = vpop.permute.xlu0 %2845 }
 0x3f5   : > { %3091 = vrot.lane.b32.xlu1 %v7116_v48, %s5128_s9 }
 0x3f6   : > { %3089 = vrot.lane.b32.xlu0 %v7122_v35, %s5128_s9 }
 0x3f7   : > { %v7552_v46 = vpop.permute.xlu1 %2851 }
 0x3f8   : > { %v7554_v61 = vpop.permute.xlu0 %2849 }
 0x3f9   : > { %3095 = vrot.lane.b32.xlu1 %v7130_v1, %s5128_s9 }
 0x3fa   : > { %3093 = vrot.lane.b32.xlu0 %v7136_v62, %s5128_s9 }
 0x3fb   : > { %v7560_v28 = vpop.permute.xlu1 %2855 }
 0x3fc   : > { %8948 = vst [vmem:[#allocation12_spill] sm:$0xff] %v7560_v28  ;;  %v7562_v6 = vpop.permute.xlu0 %2853 }
 0x3fd   : > { %3099 = vrot.lane.b32.xlu1 %v7144_v20, %s5128_s9 }
 0x3fe   : > { %3097 = vrot.lane.b32.xlu0 %v7150_v36, %s5128_s9 }
 0x3ff   : > { %v7568_v48 = vpop.permute.xlu1 %2859 }
 0x400   : > { %8949 = vst [vmem:[#allocation13_spill] sm:$0xff] %v7568_v48  ;;  %v7570_v35 = vpop.permute.xlu0 %2857 }
 0x401   : > { %3103 = vrot.lane.b32.xlu1 %v7158_v21, %s5128_s9 }
 0x402   : > { %3101 = vrot.lane.b32.xlu0 %v7164_v39, %s5128_s9 }
 0x403   : > { %v7576_v1 = vpop.permute.xlu1 %2863 }
 0x404   : > { %v7578_v62 = vpop.permute.xlu0 %2861 }
 0x405   : > { %3107 = vrot.lane.b32.xlu1 %v7172_v63, %s5128_s9 }
 0x406   : > { %3105 = vrot.lane.b32.xlu0 %v7178_v49, %s5128_s9 }
 0x407   : > { %v7584_v28 = vpop.permute.xlu1 %2867 }
 0x408   : > { %8950 = vst [vmem:[#allocation30_spill] sm:$0xff] %v7584_v28  ;;  %v7586_v48 = vpop.permute.xlu0 %2865  ;;  %v2560_v28 = vld [vmem:[#allocation2 + $0xda] sm:$0xff] }
 0x409   : > { %8951 = vst [vmem:[#allocation31_spill] sm:$0xff] %v7586_v48  ;;  %3111 = vrot.lane.b32.xlu1 %v7186_v33, %s5128_s9  ;;  %v3957_v33 = vld [vmem:[%s8458_s2] sm:$0xff]  ;;  %v8994_v48 = vld [vmem:[#allocation70_spill] sm:$0xff] }
 0x40a   : > { %3109 = vrot.lane.b32.xlu0 %v7192_v34, %s5128_s9  ;;  %v3958_v34 = vld [vmem:[%s8458_s2 + $0x8] sm:$0xff] }
 0x40b   : > { %v7592_v21 = vpop.permute.xlu1 %2871 }
 0x40c   : > { %8952 = vst [vmem:[#allocation60_spill] sm:$0xff] %v7592_v21  ;;  %v7594_v39 = vpop.permute.xlu0 %2869 }
 0x40d   : > { %8953 = vst [vmem:[#allocation61_spill] sm:$0xff] %v7594_v39  ;;  %3115 = vrot.lane.b32.xlu1 %v7200_v30, %s5128_s9  ;;  %v4927_v30 = vpack.c.bf16 %v3958_v34, %v3957_v33 }
 0x40e   : > { %3113 = vrot.lane.b32.xlu0 %v7206_v22, %s5128_s9 }
 0x40f   : > { %v7600_v63 = vpop.permute.xlu1 %2875  ;;  %4943 = vmatprep.subr.bf16.mxu1 %v4927_v30  ;;  %4928 = vmatprep.subr.bf16.mxu0 %v4927_v30 }
 0x410   : > { %8954 = vst [vmem:[#allocation78_spill] sm:$0xff] %v7600_v63  ;;  %v7602_v49 = vpop.permute.xlu0 %2873  ;;  %4948 = vmatpush3.bf16.msra.mxu1 %v4927_v30  ;;  %4930 = vmatpush3.bf16.msra.mxu0 %v4927_v30 }
 0x411   : > { %8955 = vst [vmem:[#allocation79_spill] sm:$0xff] %v7602_v49  ;;  %3119 = vrot.lane.b32.xlu1 %v7214_v32, %s5128_s9  ;;  %v3959_v32 = vld [vmem:[%s8458_s2 + $0x10] sm:$0xff]  ;;  %v2616_v49 = vld [vmem:[#allocation2 + $0x81] sm:$0xff] }
 0x412   : > { %3117 = vrot.lane.b32.xlu0 %v7220_v9, %s5128_s9  ;;  %v3960_v9 = vld [vmem:[%s8458_s2 + $0x18] sm:$0xff] }
 0x413   : > { %v7614_v22 = vpop.permute.xlu1 %2879  ;;  %v4931_v34 = vpack.c.bf16 %v3960_v9, %v3959_v32 }
 0x414   : > { %8956 = vst [vmem:[#allocation136_spill] sm:$0xff] %v7614_v22  ;;  %v7616_v63 = vpop.permute.xlu0 %2877 }
 0x415   : > { %8957 = vst [vmem:[#allocation137_spill] sm:$0xff] %v7616_v63  ;;  %3123 = vrot.lane.b32.xlu1 %v7228_v27, %s5128_s9  ;;  %4944 = vmatprep.subr.bf16.mxu1 %v4931_v34  ;;  %v3961_v27 = vld [vmem:[%s8458_s2 + $0x20] sm:$0xff] }
 0x416   : > { %3121 = vrot.lane.b32.xlu0 %v7234_v17, %s5128_s9  ;;  %4949 = vmatpush3.bf16.msra.mxu1 %v4931_v34  ;;  %v3962_v17 = vld [vmem:[%s8458_s2 + $0x28] sm:$0xff] }
 0x417   : > { %v7628_v33 = vpop.permute.xlu1 %2883  ;;  %v4935_v32 = vpack.c.bf16 %v3962_v17, %v3961_v27  ;;  %4932 = vmatprep.subr.bf16.mxu0 %v4931_v34 }
 0x418   : > { %8958 = vst [vmem:[#allocation100_spill] sm:$0xff] %v7628_v33  ;;  %v7630_v22 = vpop.permute.xlu0 %2881  ;;  %4934 = vmatpush3.bf16.msra.mxu0 %v4931_v34 }
 0x419   : > { %8959 = vst [vmem:[#allocation101_spill] sm:$0xff] %v7630_v22  ;;  %3127 = vrot.lane.b32.xlu1 %v7242_v7, %s5128_s9  ;;  %4945 = vmatprep.subr.bf16.mxu1 %v4935_v32  ;;  %v3963_v7 = vld [vmem:[%s8458_s2 + $0x30] sm:$0xff]  ;;  %v2615_v22 = vld [vmem:[#allocation2 + $0x79] sm:$0xff] }
 0x41a   : > { %3125 = vrot.lane.b32.xlu0 %v7248_v3, %s5128_s9  ;;  %4950 = vmatpush3.bf16.msra.mxu1 %v4935_v32  ;;  %v3964_v3 = vld [vmem:[%s8458_s2 + $0x38] sm:$0xff] }
 0x41b   : > { %v7642_v30 = vpop.permute.xlu1 %2887  ;;  %v4939_v17 = vpack.c.bf16 %v3964_v3, %v3963_v7  ;;  %4936 = vmatprep.subr.bf16.mxu0 %v4935_v32 }
 0x41c   : > { %8960 = vst [vmem:[#allocation160_spill] sm:$0xff] %v7642_v30  ;;  %v7644_v9 = vpop.permute.xlu0 %2885  ;;  %4938 = vmatpush3.bf16.msra.mxu0 %v4935_v32 }
 0x41d   : > { %8961 = vst [vmem:[#allocation161_spill] sm:$0xff] %v7644_v9  ;;  %3131 = vrot.lane.b32.xlu1 %v7256_v25, %s5128_s9  ;;  %4946 = vmatprep.subr.bf16.mxu1 %v4939_v17  ;;  %v3965_v25 = vld [vmem:[%s8458_s2 + $0x40] sm:$0xff] }
 0x41e   : > { %3129 = vrot.lane.b32.xlu0 %v7262_v58, %s5128_s9  ;;  %4951 = vmatpush3.bf16.msra.mxu1 %v4939_v17 }
 0x41f   : > { %v7656_v27 = vpop.permute.xlu1 %2891  ;;  %4947 = vmatprep.subr.mxu1 %v3965_v25  ;;  %4940 = vmatprep.subr.bf16.mxu0 %v4939_v17 }
 0x420   : > { %8962 = vst [vmem:[#allocation20_spill] sm:$0xff] %v7656_v27  ;;  %v7658_v34 = vpop.permute.xlu0 %2889  ;;  %4942 = vmatpush3.bf16.msra.mxu0 %v4939_v17 }
 0x421   : > { %8963 = vst [vmem:[#allocation21_spill] sm:$0xff] %v7658_v34  ;;  %3221 = vrot.lane.b32.xlu1 %v7301_v2, %s5130_s15  ;;  %4869 = vmatprep.subr.mxu0 %v3965_v25  ;;  %v2614_v34 = vld [vmem:[#allocation2 + $0x69] sm:$0xff] }
 0x422   : > { %3133 = vrot.lane.b32.xlu0 %v7273_v56, %s5128_s9  ;;  %4952 = vmatpush3.msra.mxu1 %v3965_v25 }
 0x423   : > { %v7667_v58 = vpop.permute.xlu1 %2895 }
 0x424   : > { %8964 = vst [vmem:[#allocation34_spill] sm:$0xff] %v7667_v58  ;;  %v7669_v7 = vpop.permute.xlu0 %2893  ;;  %4870 = vmatpush3.msra.mxu0 %v3965_v25 }
 0x425   : > { %8965 = vst [vmem:[#allocation35_spill] sm:$0xff] %v7669_v7  ;;  %3349 = vrot.lane.b32.xlu1 %v7412_v19, %s5131_s20  ;;  %v2613_v7 = vld [vmem:[#allocation2 + $0x61] sm:$0xff] }
 0x426   : > { %3223 = vrot.lane.b32.xlu0 %v7297_v42, %s5130_s15 }
 0x427   : > { %v7675_v56 = vpop.permute.xlu1 %2963 }
 0x428   : > { %8966 = vst [vmem:[#allocation64_spill] sm:$0xff] %v7675_v56  ;;  %v7677_v2 = vpop.permute.xlu0 %2961  ;;  %v2623_v56 = vld [vmem:[#allocation2 + $0xd9] sm:$0xff] }
 0x429   : > { %3477 = vrot.lane.b32.xlu1 %v7150_v36, %s5132_s22 }
 0x42a   : > { %3351 = vrot.lane.b32.xlu0 %v7408_v57, %s5131_s20 }
 0x42b   : > { %v7683_v32 = vpop.permute.xlu1 %2967 }
 0x42c   : > { %v7685_v3 = vpop.permute.xlu0 %2965 }
 0x42d   : > { %3605 = vrot.lane.b32.xlu1 %v7309_v10, %s5133_s8 }
 0x42e   : > { %3479 = vrot.lane.b32.xlu0 %v7144_v20, %s5132_s22 }
 0x42f   : > { %v7691_v42 = vpop.permute.xlu1 %2971 }
 0x430   : > { %v7693_v17 = vpop.permute.xlu0 %2969 }
 0x431   : > { %3607 = vrot.lane.b32.xlu1 %v7305_v14, %s5133_s8 }
 0x432   : > { %3225 = vrot.lane.b32.xlu0 %v7309_v10, %s5130_s15 }
 0x433   : > { %v7699_v36 = vpop.permute.xlu1 %2975 }
 0x434   : > { %v7701_v25 = vpop.permute.xlu0 %2973 }
 0x435   : > { %3353 = vrot.lane.b32.xlu1 %v7424_v40, %s5131_s20 }
 0x436   : > { %3227 = vrot.lane.b32.xlu0 %v7305_v14, %s5130_s15 }
 0x437   : > { %v7707_v20 = vpop.permute.xlu1 %2979 }
 0x438   : > { %v7709_v58 = vpop.permute.xlu0 %2977 }
 0x439   : > { %3481 = vrot.lane.b32.xlu1 %v2613_v7, %s5132_s22 }
 0x43a   : > { %3355 = vrot.lane.b32.xlu0 %v7420_v23, %s5131_s20 }
 0x43b   : > { %v7714_v10 = vpop.permute.xlu1 %2983 }
 0x43c   : > { %v7716_v27 = vpop.permute.xlu0 %2981 }
 0x43d   : > { %3609 = vrot.lane.b32.xlu1 %v7317_v51, %s5133_s8 }
 0x43e   : > { %3483 = vrot.lane.b32.xlu0 %v2614_v34, %s5132_s22 }
 0x43f   : > { %v7721_v14 = vpop.permute.xlu1 %2987 }
 0x440   : > { %v7723_v30 = vpop.permute.xlu0 %2985 }
 0x441   : > { %3611 = vrot.lane.b32.xlu1 %v7313_v5, %s5133_s8 }
 0x442   : > { %3229 = vrot.lane.b32.xlu0 %v7317_v51, %s5130_s15 }
 0x443   : > { %v7729_v7 = vpop.permute.xlu1 %2991 }
 0x444   : > { %v7731_v9 = vpop.permute.xlu0 %2989 }
 0x445   : > { %3357 = vrot.lane.b32.xlu1 %v7436_v37, %s5131_s20 }
 0x446   : > { %3231 = vrot.lane.b32.xlu0 %v7313_v5, %s5130_s15 }
 0x447   : > { %v7737_v34 = vpop.permute.xlu1 %2995 }
 0x448   : > { %8967 = vst [vmem:[#allocation65_spill] sm:$0xff] %v7737_v34  ;;  %v7739_v33 = vpop.permute.xlu0 %2993 }
 0x449   : > { %8968 = vst [vmem:[#allocation80_spill] sm:$0xff] %v7739_v33  ;;  %3485 = vrot.lane.b32.xlu1 %v2615_v22, %s5132_s22 }
 0x44a   : > { %3359 = vrot.lane.b32.xlu0 %v7432_v31, %s5131_s20 }
 0x44b   : > { %v7744_v51 = vpop.permute.xlu1 %2999 }
 0x44c   : > { %8969 = vst [vmem:[#allocation81_spill] sm:$0xff] %v7744_v51  ;;  %v7746_v63 = vpop.permute.xlu0 %2997 }
 0x44d   : > { %8970 = vst [vmem:[#allocation138_spill] sm:$0xff] %v7746_v63  ;;  %3613 = vrot.lane.b32.xlu1 %v7325_v18, %s5133_s8 }
 0x44e   : > { %3487 = vrot.lane.b32.xlu0 %v2616_v49, %s5132_s22 }
 0x44f   : > { %v7751_v5 = vpop.permute.xlu1 %3003 }
 0x450   : > { %8971 = vst [vmem:[#allocation139_spill] sm:$0xff] %v7751_v5  ;;  %v7753_v21 = vpop.permute.xlu0 %3001 }
 0x451   : > { %8972 = vst [vmem:[#allocation102_spill] sm:$0xff] %v7753_v21  ;;  %3615 = vrot.lane.b32.xlu1 %v7321_v4, %s5133_s8  ;;  %v2617_v21 = vld [vmem:[#allocation2 + $0x91] sm:$0xff] }
 0x452   : > { %3233 = vrot.lane.b32.xlu0 %v7325_v18, %s5130_s15 }
 0x453   : > { %v7759_v22 = vpop.permute.xlu1 %3007 }
 0x454   : > { %8973 = vst [vmem:[#allocation103_spill] sm:$0xff] %v7759_v22  ;;  %v7761_v51 = vpop.permute.xlu0 %3005 }
 0x455   : > { %8974 = vst [vmem:[#allocation162_spill] sm:$0xff] %v7761_v51  ;;  %3361 = vrot.lane.b32.xlu1 %v7448_v43, %s5131_s20  ;;  %v2618_v51 = vld [vmem:[#allocation2 + $0x99] sm:$0xff] }
 0x456   : > { %3235 = vrot.lane.b32.xlu0 %v7321_v4, %s5130_s15 }
 0x457   : > { %v7767_v49 = vpop.permute.xlu1 %3011 }
 0x458   : > { %8975 = vst [vmem:[#allocation163_spill] sm:$0xff] %v7767_v49  ;;  %v7769_v5 = vpop.permute.xlu0 %3009 }
 0x459   : > { %8976 = vst [vmem:[#allocation24_spill] sm:$0xff] %v7769_v5  ;;  %3489 = vrot.lane.b32.xlu1 %v2617_v21, %s5132_s22  ;;  %v2621_v5 = vld [vmem:[#allocation2 + $0xc1] sm:$0xff] }
 0x45a   : > { %3363 = vrot.lane.b32.xlu0 %v7444_v38, %s5131_s20 }
 0x45b   : > { %v7774_v18 = vpop.permute.xlu1 %3015 }
 0x45c   : > { %8977 = vst [vmem:[#allocation25_spill] sm:$0xff] %v7774_v18  ;;  %v7776_v22 = vpop.permute.xlu0 %3013 }
 0x45d   : > { %8978 = vst [vmem:[#allocation38_spill] sm:$0xff] %v7776_v22  ;;  %3617 = vrot.lane.b32.xlu1 %v7333_v59, %s5133_s8 }
 0x45e   : > { %3491 = vrot.lane.b32.xlu0 %v2618_v51, %s5132_s22 }
 0x45f   : > { %v7781_v4 = vpop.permute.xlu1 %3019 }
 0x460   : > { %8979 = vst [vmem:[#allocation39_spill] sm:$0xff] %v7781_v4  ;;  %v7783_v49 = vpop.permute.xlu0 %3017 }
 0x461   : > { %8980 = vst [vmem:[#allocation68_spill] sm:$0xff] %v7783_v49  ;;  %3619 = vrot.lane.b32.xlu1 %v7329_v24, %s5133_s8  ;;  %v2619_v49 = vld [vmem:[#allocation2 + $0xa9] sm:$0xff] }
 0x462   : > { %3237 = vrot.lane.b32.xlu0 %v7333_v59, %s5130_s15 }
 0x463   : > { %v7789_v21 = vpop.permute.xlu1 %3023 }
 0x464   : > { %8981 = vst [vmem:[#allocation69_spill] sm:$0xff] %v7789_v21  ;;  %v7791_v18 = vpop.permute.xlu0 %3021 }
 0x465   : > { %8982 = vst [vmem:[#allocation82_spill] sm:$0xff] %v7791_v18  ;;  %3365 = vrot.lane.b32.xlu1 %v7460_v52, %s5131_s20  ;;  %v2620_v52 = vld [vmem:[#allocation2 + $0xb1] sm:$0xff] }
 0x466   : > { %3239 = vrot.lane.b32.xlu0 %v7329_v24, %s5130_s15 }
 0x467   : > { %v7797_v51 = vpop.permute.xlu1 %3091 }
 0x468   : > { %8983 = vst [vmem:[#allocation83_spill] sm:$0xff] %v7797_v51  ;;  %v7799_v4 = vpop.permute.xlu0 %3089 }
 0x469   : > { %8984 = vst [vmem:[#allocation140_spill] sm:$0xff] %v7799_v4  ;;  %3493 = vrot.lane.b32.xlu1 %v2619_v49, %s5132_s22 }
 0x46a   : > { %3367 = vrot.lane.b32.xlu0 %v7456_v45, %s5131_s20 }
 0x46b   : > { %v7804_v59 = vpop.permute.xlu1 %3095 }
 0x46c   : > { %v7806_v21 = vpop.permute.xlu0 %3093 }
 0x46d   : > { %3621 = vrot.lane.b32.xlu1 %v7341_v0, %s5133_s8 }
 0x46e   : > { %3495 = vrot.lane.b32.xlu0 %v2620_v52, %s5132_s22 }
 0x46f   : > { %v7811_v24 = vpop.permute.xlu1 %3099 }
 0x470   : > { %v7813_v18 = vpop.permute.xlu0 %3097 }
 0x471   : > { %3623 = vrot.lane.b32.xlu1 %v7337_v13, %s5133_s8 }
 0x472   : > { %3241 = vrot.lane.b32.xlu0 %v7341_v0, %s5130_s15 }
 0x473   : > { %v7819_v45 = vpop.permute.xlu1 %3103 }
 0x474   : > { %v7821_v49 = vpop.permute.xlu0 %3101 }
 0x475   : > { %3369 = vrot.lane.b32.xlu1 %v7472_v60, %s5131_s20  ;;  %v2622_v60 = vld [vmem:[#allocation2 + $0xc9] sm:$0xff] }
 0x476   : > { %3243 = vrot.lane.b32.xlu0 %v7337_v13, %s5130_s15 }
 0x477   : > { %v7827_v52 = vpop.permute.xlu1 %3107 }
 0x478   : > { %v7829_v22 = vpop.permute.xlu0 %3105 }
 0x479   : > { %3497 = vrot.lane.b32.xlu1 %v2621_v5, %s5132_s22 }
 0x47a   : > { %3371 = vrot.lane.b32.xlu0 %v7468_v53, %s5131_s20 }
 0x47b   : > { %v7834_v0 = vpop.permute.xlu1 %3111 }
 0x47c   : > { %v7836_v63 = vpop.permute.xlu0 %3109 }
 0x47d   : > { %3625 = vrot.lane.b32.xlu1 %v7349_v12, %s5133_s8 }
 0x47e   : > { %3499 = vrot.lane.b32.xlu0 %v2622_v60, %s5132_s22 }
 0x47f   : > { %v7841_v13 = vpop.permute.xlu1 %3115 }
 0x480   : > { %v7843_v39 = vpop.permute.xlu0 %3113 }
 0x481   : > { %3627 = vrot.lane.b32.xlu1 %v7345_v44, %s5133_s8 }
 0x482   : > { %3245 = vrot.lane.b32.xlu0 %v7349_v12, %s5130_s15 }
 0x483   : > { %v7849_v53 = vpop.permute.xlu1 %3119 }
 0x484   : > { %v7851_v5 = vpop.permute.xlu0 %3117 }
 0x485   : > { %3373 = vrot.lane.b32.xlu1 %v7484_v8, %s5131_s20  ;;  %v2624_v8 = vld [vmem:[#allocation2 + $0xe1] sm:$0xff] }
 0x486   : > { %3247 = vrot.lane.b32.xlu0 %v7345_v44, %s5130_s15 }
 0x487   : > { %v7857_v60 = vpop.permute.xlu1 %3123 }
 0x488   : > { %8985 = vst [vmem:[#allocation141_spill] sm:$0xff] %v7857_v60  ;;  %v7859_v51 = vpop.permute.xlu0 %3121 }
 0x489   : > { %8986 = vst [vmem:[#allocation104_spill] sm:$0xff] %v7859_v51  ;;  %3501 = vrot.lane.b32.xlu1 %v2623_v56, %s5132_s22  ;;  %v2544_v56 = vld [vmem:[#allocation2 + $0x1a] sm:$0xff] }
 0x48a   : > { %3375 = vrot.lane.b32.xlu0 %v7480_v29, %s5131_s20 }
 0x48b   : > { %v7864_v12 = vpop.permute.xlu1 %3127 }
 0x48c   : > { %8987 = vst [vmem:[#allocation105_spill] sm:$0xff] %v7864_v12  ;;  %v7866_v34 = vpop.permute.xlu0 %3125 }
 0x48d   : > { %8988 = vst [vmem:[#allocation164_spill] sm:$0xff] %v7866_v34  ;;  %3629 = vrot.lane.b32.xlu1 %v7354_v15, %s5133_s8  ;;  %v2545_v34 = vld [vmem:[#allocation2 + $0x22] sm:$0xff] }
 0x48e   : > { %3503 = vrot.lane.b32.xlu0 %v2624_v8, %s5132_s22  ;;  %v2656_v15 = vld [vmem:[#allocation2 + $0xe2] sm:$0xff] }
 0x48f   : > { %v7871_v44 = vpop.permute.xlu1 %3131 }
 0x490   : > { %8989 = vst [vmem:[#allocation165_spill] sm:$0xff] %v7871_v44  ;;  %v7873_v60 = vpop.permute.xlu0 %3129  ;;  %v3699_v44 = vsel %vm1624_vm2, %v7388_v47, %v7372_v26  ;;  %v2578_v26 = vld [vmem:[#allocation2 + $0x38] sm:$0xff]  ;;  %v8993_v47 = vld [vmem:[#allocation66_spill] sm:$0xff] }
 0x491   : > { %8990 = vst [vmem:[#allocation28_spill] sm:$0xff] %v7873_v60  ;;  %3249 = vrot.lane.b32.xlu1 %v2560_v28, %s5130_s15  ;;  %v8992_v28 = vld [vmem:[#allocation73_spill] sm:$0xff]  ;;  %v3700_v4 = vsel %vm1624_vm2, %v8994_v48, %v8993_v47 }
 0x492   : > { %3217 = vrot.lane.b32.xlu0 %v2544_v56, %s5130_s15  ;;  %v3731_v56 = vsel %vm1690_vm4, %v3699_v44, %v7534_v54 }
 0x493   : > { %v3222_v29 = vpop.permute.xlu1 %3221 }
 0x494   : > { %v7877_v12 = vpop.permute.xlu0 %3133 }
 0x495   : > { %8991 = vst [vmem:[#allocation29_spill] sm:$0xff] %v7877_v12  ;;  %3219 = vrot.lane.b32.xlu1 %v2545_v34, %s5130_s15  ;;  %v3763_v34 = vsel %vm1756_vm6, %v3731_v56, %v7685_v3  ;;  %v3732_v3 = vsel %vm1690_vm4, %v3700_v4, %v7532_v55 }
 0x496   : > { %3631 = vrot.lane.b32.xlu0 %v2656_v15, %s5133_s8  ;;  %v3795_v60 = vsel %vm1822_vm8, %v3763_v34, %v7806_v21  ;;  %v3764_v21 = vsel %vm1756_vm6, %v3732_v3, %v7683_v32  ;;  %v2609_v34 = vld [vmem:[#allocation2 + $0x31] sm:$0xff]  ;;  %v8996_v32 = vld [vmem:[#allocation9_spill] sm:$0xff] }
 0x497   : > { %v3350_v8 = vpop.permute.xlu1 %3349  ;;  %v3828_v54 = vsel %vm3825_vm11, %v3795_v60, %v3222_v29  ;;  %v3796_v60 = vsel %vm1822_vm8, %v3764_v21, %v7804_v59 }
 0x498   : > { %v3224_v51 = vpop.permute.xlu0 %3223  ;;  %v3861_v44 = vsel %vm3858_vm12, %v3828_v54, %v3350_v8  ;;  %v2610_v54 = vld [vmem:[#allocation2 + $0x39] sm:$0xff] }
 0x499   : > { %3345 = vrot.lane.b32.xlu1 %v8992_v28, %s5131_s20  ;;  %v3829_v55 = vsel %vm3825_vm11, %v3796_v60, %v3224_v51  ;;  %v2625_v51 = vld [vmem:[#allocation2 + $0xf1] sm:$0xff] }
 0x49a   : > { %3251 = vrot.lane.b32.xlu0 %v2656_v15, %s5130_s15  ;;  %v8995_v15 = vld [vmem:[#allocation27_spill] sm:$0xff] }
 0x49b   : > { %v3478_v12 = vpop.permute.xlu1 %3477 }
 0x49c   : > { %v3352_v33 = vpop.permute.xlu0 %3351  ;;  %v3894_v56 = vsel %vm3891_vm13, %v3861_v44, %v3478_v12 }
 0x49d   : > { %3347 = vrot.lane.b32.xlu1 %v2578_v26, %s5131_s20  ;;  %v3862_v4 = vsel %vm3858_vm12, %v3829_v55, %v3352_v33  ;;  %v2641_v33 = vld [vmem:[#allocation2 + $0x32] sm:$0xff] }
 0x49e   : > { %3377 = vrot.lane.b32.xlu0 %v8995_v15, %s5131_s20  ;;  %v8997_v15 = vld [vmem:[#allocation6_spill] sm:$0xff] }
 0x49f   : > { %v3606_v48 = vpop.permute.xlu1 %3605  ;;  %v3701_v21 = vsel %vm1624_vm2, %v8992_v28, %v8997_v15  ;;  %v2562_v55 = vld [vmem:[#allocation2 + $0xf2] sm:$0xff] }
 0x4a0   : > { %v3480_v29 = vpop.permute.xlu0 %3479  ;;  %v3927_v26 = vsel %vm3924_vm14, %v3894_v56, %v3606_v48  ;;  %v2626_v56 = vld [vmem:[#allocation2 + $0xf9] sm:$0xff]  ;;  %v3733_v48 = vsel %vm1690_vm4, %v3701_v21, %v7540_v11 }
 0x4a1   : > { %3473 = vrot.lane.b32.xlu1 %v2609_v34, %s5132_s22  ;;  %4874 = vmatprep.mubr.msk.f32.mxu1 %vm3966_vm15, %v3927_v26  ;;  %v3895_v12 = vsel %vm3891_vm13, %v3862_v4, %v3480_v29  ;;  %v3765_v60 = vsel %vm1756_vm6, %v3733_v48, %v7693_v17  ;;  %v8998_v4 = vld [vmem:[#allocation67_spill] sm:$0xff]  ;;  %v9000_v48 = vld [vmem:[#allocation77_spill] sm:$0xff] }
 0x4a2   : > { %3379 = vrot.lane.b32.xlu0 %v8996_v32, %s5131_s20  ;;  %v3797_v34 = vsel %vm1822_vm8, %v3765_v60, %v7813_v18  ;;  %v8999_v32 = vld [vmem:[#allocation15_spill] sm:$0xff] }
 0x4a3   : > { %v3608_v8 = vpop.permute.xlu1 %3607  ;;  %v3702_v28 = vsel %vm1624_vm2, %v8999_v32, %v8998_v4  ;;  %v9002_v4 = vld [vmem:[#allocation57_spill] sm:$0xff] }
 0x4a4   : > { %v3928_v59 = vsel %vm3924_vm14, %v3895_v12, %v3608_v8  ;;  %v3226_v47 = vpop.permute.xlu0 %3225  ;;  %v3734_v11 = vsel %vm1690_vm4, %v3702_v28, %v7538_v50  ;;  %v2642_v50 = vld [vmem:[#allocation2 + $0x3a] sm:$0xff] }
 0x4a5   : > { %3475 = vrot.lane.b32.xlu1 %v2610_v54, %s5132_s22  ;;  %4875 = vmatmul.mubr.msk.f32.vlgmr.msra.gmra.mrb[0].mxu1 %vm3966_vm15, %v3928_v59  ;;  %v3830_v12 = vsel %vm3825_vm11, %v3797_v34, %v3226_v47  ;;  %v3766_v17 = vsel %vm1756_vm6, %v3734_v11, %v7691_v42  ;;  %v9001_v34 = vld [vmem:[#allocation71_spill] sm:$0xff] }
 0x4a6   : > { %3505 = vrot.lane.b32.xlu0 %v2625_v51, %s5132_s22  ;;  %v3798_v54 = vsel %vm1822_vm8, %v3766_v17, %v7811_v24  ;;  %v9003_v17 = vld [vmem:[#allocation10_spill] sm:$0xff] }
 0x4a7   : > { %v3354_v3 = vpop.permute.xlu1 %3353 }
 0x4a8   : > { %v3228_v44 = vpop.permute.xlu0 %3227  ;;  %v3863_v8 = vsel %vm3858_vm12, %v3830_v12, %v3354_v3 }
 0x4a9   : > { %3601 = vrot.lane.b32.xlu1 %v2641_v33, %s5133_s8  ;;  %v2658_v33 = vld [vmem:[#allocation2 + $0xfa] sm:$0xff]  ;;  %v3831_v15 = vsel %vm3825_vm11, %v3798_v54, %v3228_v44 }
 0x4aa   : > { %3507 = vrot.lane.b32.xlu0 %v2626_v56, %s5132_s22 }
 0x4ab   : > { %v3482_v29 = vpop.permute.xlu1 %3481 }
 0x4ac   : > { %v3356_v26 = vpop.permute.xlu0 %3355  ;;  %v3896_v18 = vsel %vm3891_vm13, %v3863_v8, %v3482_v29  ;;  %v2627_v29 = vld [vmem:[#allocation2 + $0x109] sm:$0xff] }
 0x4ad   : > { %3253 = vrot.lane.b32.xlu1 %v2562_v55, %s5130_s15  ;;  %v3864_v3 = vsel %vm3858_vm12, %v3831_v15, %v3356_v26  ;;  %v3703_v26 = vsel %vm1624_vm2, %v7412_v19, %v9001_v34  ;;  %v2659_v8 = vld [vmem:[#allocation2 + $0x10a] sm:$0xff]  ;;  %v3704_v19 = vsel %vm1624_vm2, %v7408_v57, %v9003_v17  ;;  %v2660_v15 = vld [vmem:[#allocation2 + $0x112] sm:$0xff] }
 0x4ae   : > { %3633 = vrot.lane.b32.xlu0 %v2562_v55, %s5133_s8  ;;  %v3735_v55 = vsel %vm1690_vm4, %v3703_v26, %v7546_v16  ;;  %v2628_v16 = vld [vmem:[#allocation2 + $0x111] sm:$0xff] }
 0x4af   : > { %v3610_v59 = vpop.permute.xlu1 %3609  ;;  %v3767_v32 = vsel %vm1756_vm6, %v3735_v55, %v7701_v25 }
 0x4b0   : > { %v3929_v47 = vsel %vm3924_vm14, %v3896_v18, %v3610_v59  ;;  %v3484_v51 = vpop.permute.xlu0 %3483  ;;  %v3799_v12 = vsel %vm1822_vm8, %v3767_v32, %v7821_v49  ;;  %v3736_v59 = vsel %vm1690_vm4, %v3704_v19, %v7544_v41 }
 0x4b1   : > { %3635 = vrot.lane.b32.xlu1 %v2658_v33, %s5133_s8  ;;  %4877 = vmatprep.mubr.msk.f32.mxu1 %vm3966_vm15, %v3929_v47  ;;  %v3897_v42 = vsel %vm3891_vm13, %v3864_v3, %v3484_v51  ;;  %v3768_v49 = vsel %vm1756_vm6, %v3736_v59, %v7699_v36 }
 0x4b2   : > { %3603 = vrot.lane.b32.xlu0 %v2642_v50, %s5133_s8  ;;  %v3800_v57 = vsel %vm1822_vm8, %v3768_v49, %v7819_v45 }
 0x4b3   : > { %v3612_v21 = vpop.permute.xlu1 %3611 }
 0x4b4   : > { %v3930_v24 = vsel %vm3924_vm14, %v3897_v42, %v3612_v21  ;;  %v3230_v56 = vpop.permute.xlu0 %3229  ;;  %v2597_v21 = vld [vmem:[#allocation2 + $0x120] sm:$0xff] }
 0x4b5   : > { %3381 = vrot.lane.b32.xlu1 %v9000_v48, %s5131_s20  ;;  %4878 = vmatmul.mubr.msk.f32.gmra.mrb[2].mxu1 %vm3966_vm15, %v3930_v24  ;;  %v3832_v18 = vsel %vm3825_vm11, %v3799_v12, %v3230_v56  ;;  %v2629_v48 = vld [vmem:[#allocation2 + $0x121] sm:$0xff]  ;;  %v9005_v12 = vld [vmem:[#allocation14_spill] sm:$0xff] }
 0x4b6   : > { %3255 = vrot.lane.b32.xlu0 %v2658_v33, %s5130_s15 }
 0x4b7   : > { %v3358_v44 = vpop.permute.xlu1 %3357 }
 0x4b8   : > { %v3232_v60 = vpop.permute.xlu0 %3231  ;;  %v3865_v25 = vsel %vm3858_vm12, %v3832_v18, %v3358_v44  ;;  %v9004_v44 = vld [vmem:[#allocation72_spill] sm:$0xff] }
 0x4b9   : > { %3509 = vrot.lane.b32.xlu1 %v2627_v29, %s5132_s22  ;;  %v3833_v50 = vsel %vm3825_vm11, %v3800_v57, %v3232_v60  ;;  %v3705_v60 = vsel %vm1624_vm2, %v7424_v40, %v9004_v44  ;;  %v2598_v29 = vld [vmem:[#allocation2 + $0x128] sm:$0xff]  ;;  %v3706_v40 = vsel %vm1624_vm2, %v7420_v23, %v9005_v12 }
 0x4ba   : > { %3383 = vrot.lane.b32.xlu0 %v9002_v4, %s5131_s20  ;;  %v3737_v34 = vsel %vm1690_vm4, %v3705_v60, %v7554_v61  ;;  %v2630_v61 = vld [vmem:[#allocation2 + $0x129] sm:$0xff] }
 0x4bb   : > { %v3486_v28 = vpop.permute.xlu1 %3485  ;;  %v3769_v26 = vsel %vm1756_vm6, %v3737_v34, %v7709_v58 }
 0x4bc   : > { %v3360_v11 = vpop.permute.xlu0 %3359  ;;  %v3898_v54 = vsel %vm3891_vm13, %v3865_v25, %v3486_v28  ;;  %v3801_v4 = vsel %vm1822_vm8, %v3769_v26, %v7829_v22  ;;  %v2661_v28 = vld [vmem:[#allocation2 + $0x122] sm:$0xff]  ;;  %v2663_v26 = vld [vmem:[#allocation2 + $0x13a] sm:$0xff] }
 0x4bd   : > { %3637 = vrot.lane.b32.xlu1 %v2659_v8, %s5133_s8  ;;  %v3866_v41 = vsel %vm3858_vm12, %v3833_v50, %v3360_v11  ;;  %v2599_v50 = vld [vmem:[#allocation2 + $0x138] sm:$0xff] }
 0x4be   : > { %3511 = vrot.lane.b32.xlu0 %v2628_v16, %s5132_s22 }
 0x4bf   : > { %v3614_v47 = vpop.permute.xlu1 %3613 }
 0x4c0   : > { %v3931_v51 = vsel %vm3924_vm14, %v3898_v54, %v3614_v47  ;;  %v3488_v33 = vpop.permute.xlu0 %3487 }
 0x4c1   : > { %3639 = vrot.lane.b32.xlu1 %v2660_v15, %s5133_s8  ;;  %4880 = vmatprep.mubr.msk.f32.mxu1 %vm3966_vm15, %v3931_v51  ;;  %v3899_v36 = vsel %vm3891_vm13, %v3866_v41, %v3488_v33  ;;  %v2600_v51 = vld [vmem:[#allocation2 + $0x140] sm:$0xff]  ;;  %v9006_v33 = vld [vmem:[#allocation17_spill] sm:$0xff] }
 0x4c2   : > { %3257 = vrot.lane.b32.xlu0 %v2659_v8, %s5130_s15  ;;  %v3738_v8 = vsel %vm1690_vm4, %v3706_v40, %v7552_v46 }
 0x4c3   : > { %v3616_v3 = vpop.permute.xlu1 %3615  ;;  %v3770_v22 = vsel %vm1756_vm6, %v3738_v8, %v7707_v20  ;;  %v9009_v8 = vld [vmem:[#allocation75_spill] sm:$0xff] }
 0x4c4   : > { %v3932_v42 = vsel %vm3924_vm14, %v3899_v36, %v3616_v3  ;;  %v3234_v45 = vpop.permute.xlu0 %3233  ;;  %v3802_v23 = vsel %vm1822_vm8, %v3770_v22, %v7827_v52  ;;  %v2567_v52 = vld [vmem:[#allocation2 + $0x12a] sm:$0xff] }
 0x4c5   : > { %3385 = vrot.lane.b32.xlu1 %v2597_v21, %s5131_s20  ;;  %4881 = vmatmul.mubr.msk.f32.gmra.mrb[4].mxu1 %vm3966_vm15, %v3932_v42  ;;  %v3834_v11 = vsel %vm3825_vm11, %v3801_v4, %v3234_v45  ;;  %v2536_v21 = vld [vmem:[#allocation2 + $0x139] sm:$0xff]  ;;  %v2632_v4 = vld [vmem:[#allocation2 + $0x141] sm:$0xff] }
 0x4c6   : > { %3259 = vrot.lane.b32.xlu0 %v2660_v15, %s5130_s15  ;;  %v3707_v15 = vsel %vm1624_vm2, %v7436_v37, %v9006_v33 }
 0x4c7   : > { %v3362_v24 = vpop.permute.xlu1 %3361  ;;  %v3739_v41 = vsel %vm1690_vm4, %v3707_v15, %v7562_v6  ;;  %v9008_v6 = vld [vmem:[#allocation12_spill] sm:$0xff] }
 0x4c8   : > { %v3236_v56 = vpop.permute.xlu0 %3235  ;;  %v3867_v58 = vsel %vm3858_vm12, %v3834_v11, %v3362_v24  ;;  %v3771_v36 = vsel %vm1756_vm6, %v3739_v41, %v7716_v27  ;;  %v9007_v24 = vld [vmem:[#allocation16_spill] sm:$0xff]  ;;  %v2665_v41 = vld [vmem:[#allocation2 + $0x152] sm:$0xff] }
 0x4c9   : > { %3513 = vrot.lane.b32.xlu1 %v2629_v48, %s5132_s22  ;;  %v3835_v59 = vsel %vm3825_vm11, %v3802_v23, %v3236_v56  ;;  %v3803_v42 = vsel %vm1822_vm8, %v3771_v36, %v7836_v63  ;;  %v3708_v37 = vsel %vm1624_vm2, %v7432_v31, %v9007_v24  ;;  %v2634_v36 = vld [vmem:[#allocation2 + $0x159] sm:$0xff] }
 0x4ca   : > { %3387 = vrot.lane.b32.xlu0 %v2598_v29, %s5131_s20  ;;  %v3740_v48 = vsel %vm1690_vm4, %v3708_v37, %v9008_v6 }
 0x4cb   : > { %v3490_v55 = vpop.permute.xlu1 %3489  ;;  %v3772_v63 = vsel %vm1756_vm6, %v3740_v48, %v7714_v10 }
 0x4cc   : > { %v3364_v32 = vpop.permute.xlu0 %3363  ;;  %v3900_v17 = vsel %vm3891_vm13, %v3867_v58, %v3490_v55  ;;  %v3804_v31 = vsel %vm1822_vm8, %v3772_v63, %v7834_v0  ;;  %v3709_v58 = vsel %vm1624_vm2, %v7448_v43, %v9009_v8  ;;  %v2571_v63 = vld [vmem:[#allocation2 + $0x15a] sm:$0xff] }
 0x4cd   : > { %3641 = vrot.lane.b32.xlu1 %v2661_v28, %s5133_s8  ;;  %v3868_v46 = vsel %vm3858_vm12, %v3835_v59, %v3364_v32  ;;  %v3741_v22 = vsel %vm1690_vm4, %v3709_v58, %v7570_v35  ;;  %v9010_v59 = vld [vmem:[#allocation74_spill] sm:$0xff] }
 0x4ce   : > { %3515 = vrot.lane.b32.xlu0 %v2630_v61, %s5132_s22  ;;  %v3710_v43 = vsel %vm1624_vm2, %v7444_v38, %v9010_v59  ;;  %v2601_v35 = vld [vmem:[#allocation2 + $0x150] sm:$0xff]  ;;  %v2384_v59 = vld [vmem:[#allocation2] sm:$0xff] }
 0x4cf   : > { %v3618_v19 = vpop.permute.xlu1 %3617 }
 0x4d0   : > { %v3933_v18 = vsel %vm3924_vm14, %v3900_v17, %v3618_v19  ;;  %v3492_v16 = vpop.permute.xlu0 %3491  ;;  %v3773_v17 = vsel %vm1756_vm6, %v3741_v22, %v7723_v30  ;;  %v2667_v22 = vld [vmem:[#allocation2 + $0x16a] sm:$0xff] }
 0x4d1   : > { %3261 = vrot.lane.b32.xlu1 %v2661_v28, %s5130_s15  ;;  %4883 = vmatprep.mubr.msk.f32.mxu1 %vm3966_vm15, %v3933_v18  ;;  %v3901_v20 = vsel %vm3891_vm13, %v3868_v46, %v3492_v16  ;;  %v3805_v23 = vsel %vm1822_vm8, %v3773_v17, %v7843_v39  ;;  %v2602_v16 = vld [vmem:[#allocation2 + $0x158] sm:$0xff] }
 0x4d2   : > { %3135 = vrot.lane.b32.xlu0 %v2630_v61, %s5128_s9  ;;  %v2569_v61 = vld [vmem:[#allocation2 + $0x142] sm:$0xff]  ;;  %v2636_v17 = vld [vmem:[#allocation2 + $0x171] sm:$0xff] }
 0x4d3   : > { %v3620_v25 = vpop.permute.xlu1 %3619 }
 0x4d4   : > { %v3934_v49 = vsel %vm3924_vm14, %v3901_v20, %v3620_v25  ;;  %v3238_v54 = vpop.permute.xlu0 %3237  ;;  %v9011_v20 = vld [vmem:[#allocation13_spill] sm:$0xff] }
 0x4d5   : > { %3263 = vrot.lane.b32.xlu1 %v2567_v52, %s5130_s15  ;;  %4884 = vmatmul.mubr.msk.f32.gmra.mrb[6].mxu1 %vm3966_vm15, %v3934_v49  ;;  %v3836_v56 = vsel %vm3825_vm11, %v3803_v42, %v3238_v54  ;;  %v3742_v25 = vsel %vm1690_vm4, %v3710_v43, %v9011_v20  ;;  %v9014_v20 = vld [vmem:[#allocation11_spill] sm:$0xff] }
 0x4d6   : > { %3643 = vrot.lane.b32.xlu0 %v2567_v52, %s5133_s8  ;;  %v3774_v39 = vsel %vm1756_vm6, %v3742_v25, %v7721_v14  ;;  %v3697_v25 = vsel %vm1624_vm2, %v2384_v59, %v9014_v20  ;;  %v2575_v20 = vld [vmem:[#allocation2 + $0x18a] sm:$0xff] }
 0x4d7   : > { %v3366_v47 = vpop.permute.xlu1 %3365  ;;  %v3806_v38 = vsel %vm1822_vm8, %v3774_v39, %v7841_v13  ;;  %v9015_v39 = vld [vmem:[#allocation159_spill] sm:$0xff] }
 0x4d8   : > { %v3240_v57 = vpop.permute.xlu0 %3239  ;;  %v3869_v44 = vsel %vm3858_vm12, %v3836_v56, %v3366_v47 }
 0x4d9   : > { %3391 = vrot.lane.b32.xlu1 %v2600_v51, %s5131_s20  ;;  %v3837_v55 = vsel %vm3825_vm11, %v3804_v31, %v3240_v57  ;;  %v2538_v57 = vld [vmem:[#allocation2 + $0x151] sm:$0xff] }
 0x4da   : > { %3389 = vrot.lane.b32.xlu0 %v2599_v50, %s5131_s20 }
 0x4db   : > { %v3494_v3 = vpop.permute.xlu1 %3493 }
 0x4dc   : > { %v3368_v45 = vpop.permute.xlu0 %3367  ;;  %v3902_v27 = vsel %vm3891_vm13, %v3869_v44, %v3494_v3 }
 0x4dd   : > { %3137 = vrot.lane.b32.xlu1 %v2536_v21, %s5128_s9  ;;  %v3870_v32 = vsel %vm3858_vm12, %v3837_v55, %v3368_v45  ;;  %v5039_v45 = vld [vmem:[#allocation2 + $0xa8] sm:$0xff]  ;;  %v9013_v55 = vld [vmem:[#allocation18_spill] sm:$0xff] }
 0x4de   : > { %3517 = vrot.lane.b32.xlu0 %v2536_v21, %s5132_s22  ;;  %v9012_v21 = vld [vmem:[#allocation19_spill] sm:$0xff] }
 0x4df   : > { %v3622_v60 = vpop.permute.xlu1 %3621  ;;  %v3711_v24 = vsel %vm1624_vm2, %v5039_v45, %v9012_v21  ;;  %v9019_v45 = vld [vmem:[#allocation80_spill] sm:$0xff] }
 0x4e0   : > { %v3935_v29 = vsel %vm3924_vm14, %v3902_v27, %v3622_v60  ;;  %v3496_v34 = vpop.permute.xlu0 %3495  ;;  %v3743_v37 = vsel %vm1690_vm4, %v3711_v24, %v7578_v62 }
 0x4e1   : > { %3645 = vrot.lane.b32.xlu1 %v2663_v26, %s5133_s8  ;;  %4886 = vmatprep.mubr.msk.f32.mxu1 %vm3966_vm15, %v3935_v29  ;;  %v3903_v10 = vsel %vm3891_vm13, %v3870_v32, %v3496_v34  ;;  %v3775_v56 = vsel %vm1756_vm6, %v3743_v37, %v7731_v9  ;;  %v2604_v34 = vld [vmem:[#allocation2 + $0x170] sm:$0xff] }
 0x4e2   : > { %3519 = vrot.lane.b32.xlu0 %v2632_v4, %s5132_s22  ;;  %v3807_v48 = vsel %vm1822_vm8, %v3775_v56, %v7851_v5  ;;  %v2603_v5 = vld [vmem:[#allocation2 + $0x168] sm:$0xff] }
 0x4e3   : > { %v3624_v28 = vpop.permute.xlu1 %3623  ;;  %v2669_v56 = vld [vmem:[#allocation2 + $0x182] sm:$0xff] }
 0x4e4   : > { %v3936_v0 = vsel %vm3924_vm14, %v3903_v10, %v3624_v28  ;;  %v3242_v12 = vpop.permute.xlu0 %3241 }
 0x4e5   : > { %3265 = vrot.lane.b32.xlu1 %v2663_v26, %s5130_s15  ;;  %4887 = vmatmul.mubr.msk.f32.gmra.mrb[8].mxu1 %vm3966_vm15, %v3936_v0  ;;  %v3838_v46 = vsel %vm3825_vm11, %v3805_v23, %v3242_v12  ;;  %v5040_v26 = vld [vmem:[#allocation2 + $0xb0] sm:$0xff] }
 0x4e6   : > { %3139 = vrot.lane.b32.xlu0 %v2632_v4, %s5128_s9  ;;  %v3712_v4 = vsel %vm1624_vm2, %v5040_v26, %v9013_v55  ;;  %v2540_v12 = vld [vmem:[#allocation2 + $0x169] sm:$0xff] }
 0x4e7   : > { %v3370_v40 = vpop.permute.xlu1 %3369  ;;  %v3744_v32 = vsel %vm1690_vm4, %v3712_v4, %v7576_v1  ;;  %v9025_v55 = vld [vmem:[#allocation65_spill] sm:$0xff] }
 0x4e8   : > { %v3244_v11 = vpop.permute.xlu0 %3243  ;;  %v3871_v30 = vsel %vm3858_vm12, %v3838_v46, %v3370_v40  ;;  %v3776_v28 = vsel %vm1756_vm6, %v3744_v32, %v7729_v7 }
 0x4e9   : > { %3267 = vrot.lane.b32.xlu1 %v2569_v61, %s5130_s15  ;;  %v3839_v51 = vsel %vm3825_vm11, %v3806_v38, %v3244_v11  ;;  %v3808_v40 = vsel %vm1822_vm8, %v3776_v28, %v7849_v53 }
 0x4ea   : > { %3647 = vrot.lane.b32.xlu0 %v2569_v61, %s5133_s8 }
 0x4eb   : > { %v3498_v19 = vpop.permute.xlu1 %3497 }
 0x4ec   : > { %v3372_v18 = vpop.permute.xlu0 %3371  ;;  %v3904_v49 = vsel %vm3891_vm13, %v3871_v30, %v3498_v19  ;;  %v2605_v30 = vld [vmem:[#allocation2 + $0x180] sm:$0xff] }
 0x4ed   : > { %3395 = vrot.lane.b32.xlu1 %v2602_v16, %s5131_s20  ;;  %v3872_v33 = vsel %vm3858_vm12, %v3839_v51, %v3372_v18  ;;  %v2573_v16 = vld [vmem:[#allocation2 + $0x172] sm:$0xff]  ;;  %v2542_v51 = vld [vmem:[#allocation2 + $0x181] sm:$0xff] }
 0x4ee   : > { %3393 = vrot.lane.b32.xlu0 %v2601_v35, %s5131_s20  ;;  %v2606_v35 = vld [vmem:[#allocation2 + $0x188] sm:$0xff] }
 0x4ef   : > { %v3626_v54 = vpop.permute.xlu1 %3625 }
 0x4f0   : > { %v3937_v52 = vsel %vm3924_vm14, %v3904_v49, %v3626_v54  ;;  %v3500_v47 = vpop.permute.xlu0 %3499  ;;  %v3729_v49 = vsel %vm1690_vm4, %v3697_v25, %v9015_v39  ;;  %v5043_v39 = vld [vmem:[#allocation2 + $0xd8] sm:$0xff] }
 0x4f1   : > { %3141 = vrot.lane.b32.xlu1 %v2538_v57, %s5128_s9  ;;  %4889 = vmatprep.mubr.msk.f32.mxu1 %vm3966_vm15, %v3937_v52  ;;  %v3905_v14 = vsel %vm3891_vm13, %v3872_v33, %v3500_v47  ;;  %v3761_v54 = vsel %vm1756_vm6, %v3729_v49, %v7677_v2  ;;  %v9016_v52 = vld [vmem:[#allocation140_spill] sm:$0xff]  ;;  %v9018_v2 = vld [vmem:[#allocation31_spill] sm:$0xff]  ;;  %v9029_v49 = vld [vmem:[#allocation133_spill] sm:$0xff] }
 0x4f2   : > { %3521 = vrot.lane.b32.xlu0 %v2538_v57, %s5132_s22  ;;  %v3793_v47 = vsel %vm1822_vm8, %v3761_v54, %v9016_v52  ;;  %v3715_v54 = vsel %vm1624_vm2, %v5043_v39, %v9029_v49  ;;  %v9044_v39 = vld [vmem:[#allocation165_spill] sm:$0xff] }
 0x4f3   : > { %v3628_v15 = vpop.permute.xlu1 %3627 }
 0x4f4   : > { %v3938_v50 = vsel %vm3924_vm14, %v3905_v14, %v3628_v15  ;;  %v3246_v13 = vpop.permute.xlu0 %3245  ;;  %v5041_v14 = vld [vmem:[#allocation2 + $0xc0] sm:$0xff]  ;;  %v9017_v15 = vld [vmem:[#allocation23_spill] sm:$0xff] }
 0x4f5   : > { %3649 = vrot.lane.b32.xlu1 %v2665_v41, %s5133_s8  ;;  %4890 = vmatmul.mubr.msk.f32.gmra.mrb[10].mxu1 %vm3966_vm15, %v3938_v50  ;;  %v3840_v27 = vsel %vm3825_vm11, %v3807_v48, %v3246_v13  ;;  %v3713_v50 = vsel %vm1624_vm2, %v5041_v14, %v9017_v15  ;;  %v9020_v48 = vld [vmem:[#allocation22_spill] sm:$0xff]  ;;  %v2639_v14 = vld [vmem:[#allocation2 + $0x199] sm:$0xff] }
 0x4f6   : > { %3523 = vrot.lane.b32.xlu0 %v2634_v36, %s5132_s22  ;;  %v9032_v15 = vld [vmem:[#allocation164_spill] sm:$0xff] }
 0x4f7   : > { %v3374_v3 = vpop.permute.xlu1 %3373 }
 0x4f8   : > { %v3248_v42 = vpop.permute.xlu0 %3247  ;;  %v3873_v60 = vsel %vm3858_vm12, %v3840_v27, %v3374_v3 }
 0x4f9   : > { %3269 = vrot.lane.b32.xlu1 %v2665_v41, %s5130_s15  ;;  %v3841_v11 = vsel %vm3825_vm11, %v3808_v40, %v3248_v42  ;;  %v2385_v41 = vld [vmem:[#allocation2 + $0x8] sm:$0xff] }
 0x4fa   : > { %3143 = vrot.lane.b32.xlu0 %v2634_v36, %s5128_s9  ;;  %v3745_v36 = vsel %vm1690_vm4, %v3713_v50, %v9018_v2  ;;  %v9027_v40 = vld [vmem:[#allocation141_spill] sm:$0xff]  ;;  %v9033_v2 = vld [vmem:[#allocation132_spill] sm:$0xff] }
 0x4fb   : > { %v3502_v6 = vpop.permute.xlu1 %3501  ;;  %v3777_v21 = vsel %vm1756_vm6, %v3745_v36, %v9019_v45 }
 0x4fc   : > { %v3376_v44 = vpop.permute.xlu0 %3375  ;;  %v3906_v62 = vsel %vm3891_vm13, %v3873_v60, %v3502_v6  ;;  %v5042_v6 = vld [vmem:[#allocation2 + $0xc8] sm:$0xff] }
 0x4fd   : > { %3271 = vrot.lane.b32.xlu1 %v2571_v63, %s5130_s15  ;;  %v3874_v61 = vsel %vm3858_vm12, %v3841_v11, %v3376_v44  ;;  %v3714_v44 = vsel %vm1624_vm2, %v5042_v6, %v9020_v48  ;;  %v2638_v60 = vld [vmem:[#allocation2 + $0x189] sm:$0xff] }
 0x4fe   : > { %3651 = vrot.lane.b32.xlu0 %v2571_v63, %s5133_s8  ;;  %v9021_v63 = vld [vmem:[#allocation104_spill] sm:$0xff] }
 0x4ff   : > { %v3630_v31 = vpop.permute.xlu1 %3629  ;;  %v3809_v27 = vsel %vm1822_vm8, %v3777_v21, %v9021_v63  ;;  %v9036_v63 = vld [vmem:[#allocation105_spill] sm:$0xff] }
 0x500   : > { %v3939_v29 = vsel %vm3924_vm14, %v3906_v62, %v3630_v31  ;;  %v3504_v9 = vpop.permute.xlu0 %3503  ;;  %v9022_v62 = vld [vmem:[#allocation7_spill] sm:$0xff] }
 0x501   : > { %3399 = vrot.lane.b32.xlu1 %v2604_v34, %s5131_s20  ;;  %4892 = vmatprep.mubr.msk.f32.mxu1 %vm3966_vm15, %v3939_v29  ;;  %v3907_v1 = vsel %vm3891_vm13, %v3874_v61, %v3504_v9  ;;  %v3698_v31 = vsel %vm1624_vm2, %v2385_v41, %v9022_v62  ;;  %v9023_v29 = vld [vmem:[#allocation30_spill] sm:$0xff]  ;;  %v5044_v41 = vld [vmem:[#allocation2 + $0xe0] sm:$0xff] }
 0x502   : > { %3397 = vrot.lane.b32.xlu0 %v2603_v5, %s5131_s20  ;;  %v3746_v9 = vsel %vm1690_vm4, %v3714_v44, %v9023_v29  ;;  %v9024_v5 = vld [vmem:[#allocation158_spill] sm:$0xff]  ;;  %v3716_v36 = vsel %vm1624_vm2, %v5044_v41, %v9033_v2  ;;  %v2671_v44 = vld [vmem:[#allocation2 + $0x19a] sm:$0xff]  ;;  %v5047_v41 = vld [vmem:[#allocation2 + $0x108] sm:$0xff] }
 0x503   : > { %v8125_v10 = vpop.permute.xlu1 %3249  ;;  %v3730_v26 = vsel %vm1690_vm4, %v3698_v31, %v9024_v5  ;;  %v3778_v4 = vsel %vm1756_vm6, %v3746_v9, %v9025_v55  ;;  %v9045_v2 = vld [vmem:[#allocation157_spill] sm:$0xff] }
 0x504   : > { %v3218_v0 = vpop.permute.xlu0 %3217  ;;  %v3842_v34 = vsel %vm3825_vm11, %v3809_v27, %v8125_v10  ;;  %v3810_v11 = vsel %vm1822_vm8, %v3778_v4, %v9027_v40 }
 0x505   : > { %3145 = vrot.lane.b32.xlu1 %v2540_v12, %s5128_s9  ;;  %v3826_v33 = vsel %vm3825_vm11, %v3793_v47, %v3218_v0  ;;  %v9026_v0 = vld [vmem:[#allocation64_spill] sm:$0xff] }
 0x506   : > { %3525 = vrot.lane.b32.xlu0 %v2540_v12, %s5132_s22  ;;  %v3762_v12 = vsel %vm1756_vm6, %v3730_v26, %v9026_v0  ;;  %v2640_v47 = vld [vmem:[#allocation2 + $0x1a1] sm:$0xff] }
 0x507   : > { %v8135_v8 = vpop.permute.xlu1 %3219 }
 0x508   : > { %v3632_v58 = vpop.permute.xlu0 %3631 }
 0x509   : > { %v3940_v7 = vsel %vm3924_vm14, %v3907_v1, %v3632_v58  ;;  %3653 = vrot.lane.b32.xlu1 %v2667_v22, %s5133_s8  ;;  %v9028_v1 = vld [vmem:[#allocation83_spill] sm:$0xff] }
 0x50a   : > { %3527 = vrot.lane.b32.xlu0 %v2636_v17, %s5132_s22  ;;  %4893 = vmatmul.mubr.msk.f32.gmra.mrb[12].mxu1 %vm3966_vm15, %v3940_v7  ;;  %v3794_v58 = vsel %vm1822_vm8, %v3762_v12, %v9028_v1  ;;  %v9038_v12 = vld [vmem:[#allocation79_spill] sm:$0xff]  ;;  %v9040_v1 = vld [vmem:[#allocation28_spill] sm:$0xff] }
 0x50b   : > { %v3346_v53 = vpop.permute.xlu1 %3345 }
 0x50c   : > { %v3252_v19 = vpop.permute.xlu0 %3251  ;;  %v3859_v13 = vsel %vm3858_vm12, %v3826_v33, %v3346_v53 }
 0x50d   : > { %3273 = vrot.lane.b32.xlu1 %v2667_v22, %s5130_s15  ;;  %v3843_v22 = vsel %vm3825_vm11, %v3810_v11, %v3252_v19  ;;  %v9039_v11 = vld [vmem:[#allocation102_spill] sm:$0xff] }
 0x50e   : > { %3147 = vrot.lane.b32.xlu0 %v2636_v17, %s5128_s9  ;;  %v3827_v17 = vsel %vm3825_vm11, %v3794_v58, %v8135_v8  ;;  %v2608_v8 = vld [vmem:[#allocation2 + $0x1a0] sm:$0xff] }
 0x50f   : > { %v3348_v23 = vpop.permute.xlu1 %3347 }
 0x510   : > { %v3378_v18 = vpop.permute.xlu0 %3377 }
 0x511   : > { %3275 = vrot.lane.b32.xlu1 %v2573_v16, %s5130_s15  ;;  %v3875_v32 = vsel %vm3858_vm12, %v3842_v34, %v3378_v18  ;;  %v3860_v18 = vsel %vm3858_vm12, %v3827_v17, %v3348_v23 }
 0x512   : > { %3655 = vrot.lane.b32.xlu0 %v2573_v16, %s5133_s8 }
 0x513   : > { %v3474_v43 = vpop.permute.xlu1 %3473 }
 0x514   : > { %v3380_v46 = vpop.permute.xlu0 %3379  ;;  %v3892_v3 = vsel %vm3891_vm13, %v3859_v13, %v3474_v43 }
 0x515   : > { %3403 = vrot.lane.b32.xlu1 %v2606_v35, %s5131_s20  ;;  %v3876_v53 = vsel %vm3858_vm12, %v3843_v22, %v3380_v46  ;;  %v2607_v46 = vld [vmem:[#allocation2 + $0x198] sm:$0xff] }
 0x516   : > { %3401 = vrot.lane.b32.xlu0 %v2605_v30, %s5131_s20 }
 0x517   : > { %v3476_v38 = vpop.permute.xlu1 %3475 }
 0x518   : > { %v3506_v57 = vpop.permute.xlu0 %3505  ;;  %v3893_v19 = vsel %vm3891_vm13, %v3860_v18, %v3476_v38  ;;  %v9030_v38 = vld [vmem:[#allocation61_spill] sm:$0xff] }
 0x519   : > { %3149 = vrot.lane.b32.xlu1 %v2542_v51, %s5128_s9  ;;  %v3908_v61 = vsel %vm3891_vm13, %v3875_v32, %v3506_v57  ;;  %v3747_v52 = vsel %vm1690_vm4, %v3715_v54, %v9030_v38  ;;  %v9031_v57 = vld [vmem:[#allocation138_spill] sm:$0xff] }
 0x51a   : > { %3529 = vrot.lane.b32.xlu0 %v2542_v51, %s5132_s22  ;;  %v3779_v51 = vsel %vm1756_vm6, %v3747_v52, %v9031_v57  ;;  %v5045_v32 = vld [vmem:[#allocation2 + $0xf0] sm:$0xff] }
 0x51b   : > { %v3602_v42 = vpop.permute.xlu1 %3601  ;;  %v3811_v50 = vsel %vm1822_vm8, %v3779_v51, %v9032_v15 }
 0x51c   : > { %v3925_v24 = vsel %vm3924_vm14, %v3892_v3, %v3602_v42  ;;  %v3508_v37 = vpop.permute.xlu0 %3507  ;;  %v9034_v42 = vld [vmem:[#allocation60_spill] sm:$0xff] }
 0x51d   : > { %3657 = vrot.lane.b32.xlu1 %v2669_v56, %s5133_s8  ;;  %4871 = vmatprep.mubr.msk.f32.mxu0 %vm3966_vm15, %v3925_v24  ;;  %v3909_v16 = vsel %vm3891_vm13, %v3876_v53, %v3508_v37  ;;  %v3748_v45 = vsel %vm1690_vm4, %v3716_v36, %v9034_v42  ;;  %v2672_v24 = vld [vmem:[#allocation2 + $0x1a2] sm:$0xff]  ;;  %v3719_v36 = vsel %vm1624_vm2, %v5047_v41, %v9045_v2 }
 0x51e   : > { %3531 = vrot.lane.b32.xlu0 %v2638_v60, %s5132_s22  ;;  %v9035_v37 = vld [vmem:[#allocation81_spill] sm:$0xff] }
 0x51f   : > { %v3254_v28 = vpop.permute.xlu1 %3253 }
 0x520   : > { %v3634_v10 = vpop.permute.xlu0 %3633  ;;  %v3844_v3 = vsel %vm3825_vm11, %v3811_v50, %v3254_v28  ;;  %v9037_v28 = vld [vmem:[#allocation97_spill] sm:$0xff] }
 0x521   : > { %v3941_v7 = vsel %vm3924_vm14, %v3908_v61, %v3634_v10  ;;  %3277 = vrot.lane.b32.xlu1 %v2669_v56, %s5130_s15  ;;  %v3780_v56 = vsel %vm1756_vm6, %v3748_v45, %v9035_v37  ;;  %v3717_v0 = vsel %vm1624_vm2, %v5045_v32, %v9037_v28  ;;  %v9047_v45 = vld [vmem:[#allocation162_spill] sm:$0xff]  ;;  %v9048_v37 = vld [vmem:[#allocation29_spill] sm:$0xff] }
 0x522   : > { %3151 = vrot.lane.b32.xlu0 %v2638_v60, %s5128_s9  ;;  %4895 = vmatprep.mubr.msk.f32.mxu1 %vm3966_vm15, %v3941_v7  ;;  %v3812_v27 = vsel %vm1822_vm8, %v3780_v56, %v9036_v63  ;;  %v3749_v40 = vsel %vm1690_vm4, %v3717_v0, %v9038_v12  ;;  %s5061_s9 = sshll.u32 %s5135_s28, 4  ;;  %s5062_s9 = int_to_ptr.vmem [resolvable:$false] %s5061_s9 }
 0x523   : > { %v3636_v59 = vpop.permute.xlu1 %3635  ;;  %v3781_v61 = vsel %vm1756_vm6, %v3749_v40, %v9039_v11  ;;  %s5063_s17 = scalar_lea.vmem %s5062_s9, 512 }
 0x524   : > { %v3942_v43 = vsel %vm3924_vm14, %v3909_v16, %v3636_v59  ;;  %v3604_v35 = vpop.permute.xlu0 %3603  ;;  %v3813_v58 = vsel %vm1822_vm8, %v3781_v61, %v9040_v1 }
 0x525   : > { %v3926_v25 = vsel %vm3924_vm14, %v3893_v19, %v3604_v35  ;;  %3279 = vrot.lane.b32.xlu1 %v2575_v20, %s5130_s15  ;;  %4896 = vmatmul.mubr.msk.f32.gmra.mrb[14].mxu1 %vm3966_vm15, %v3942_v43  ;;  %v5046_v19 = vld [vmem:[#allocation2 + $0xf8] sm:$0xff]  ;;  %v9041_v43 = vld [vmem:[#allocation96_spill] sm:$0xff]  ;;  %s4387_s15 = sshll.u32 %s271_s21, 4  ;;  %s8416_s15 = int_to_ptr.vmem [resolvable:$true] %s4387_s15 }
 0x526   : > { %3659 = vrot.lane.b32.xlu0 %v2575_v20, %s5133_s8  ;;  %4872 = vmatmul.mubr.msk.f32.vlgmr.msra.gmra.mrb[32].mxu0 %vm3966_vm15, %v3926_v25  ;;  %v3718_v35 = vsel %vm1624_vm2, %v5046_v19, %v9041_v43  ;;  %v9042_v20 = vld [vmem:[#allocation78_spill] sm:$0xff]  ;;  %p5064_p0 = scmp.lt.s32.totalorder %s8416_s15, %s5062_s9 }
 0x527   : > { %v3382_v23 = vpop.permute.xlu1 %3381  ;;  %v3750_v25 = vsel %vm1690_vm4, %v3718_v35, %v9042_v20 }
 0x528   : > { %v3256_v30 = vpop.permute.xlu0 %3255  ;;  %v3877_v21 = vsel %vm3858_vm12, %v3844_v3, %v3382_v23  ;;  %v9043_v23 = vld [vmem:[#allocation139_spill] sm:$0xff]  ;;  %v9046_v3 = vld [vmem:[#allocation137_spill] sm:$0xff] }
 0x529   : > { %3407 = vrot.lane.b32.xlu1 %v2608_v8, %s5131_s20  ;;  %v3845_v31 = vsel %vm3825_vm11, %v3812_v27, %v3256_v30  ;;  %v3751_v42 = vsel %vm1690_vm4, %v3719_v36, %v9046_v3 }
 0x52a   : > { %3405 = vrot.lane.b32.xlu0 %v2607_v46, %s5131_s20  ;;  %v3782_v46 = vsel %vm1756_vm6, %v3750_v25, %v9043_v23  ;;  %s8414_s20 = scalar_lea.hbm %s8463_s7, %s4716_s23 }
 0x52b   : > { %v3510_v33 = vpop.permute.xlu1 %3509  ;;  %v3814_v49 = vsel %vm1822_vm8, %v3782_v46, %v9044_v39  ;;  %v5050_v39 = vld [vmem:[#allocation2 + $0x128] sm:$0xff] }
 0x52c   : > { %v3384_v13 = vpop.permute.xlu0 %3383  ;;  %v3910_v6 = vsel %vm3891_vm13, %v3877_v21, %v3510_v33  ;;  %v4352_v33 = vld [vmem:[%s8461_s5] sm:$0xff]  ;;  %v3783_v21 = vsel %vm1756_vm6, %v3751_v42, %v9047_v45 }
 0x52d   : > { %3535 = vrot.lane.b32.xlu1 %v2640_v47, %s5132_s22  ;;  %v3878_v29 = vsel %vm3858_vm12, %v3845_v31, %v3384_v13  ;;  %v4360_v13 = vld [vmem:[%s8462_s6] sm:$0xff]  ;;  %v3815_v56 = vsel %vm1822_vm8, %v3783_v21, %v9048_v37  ;;  %v5048_v31 = vld [vmem:[#allocation2 + $0x110] sm:$0xff]  ;;  %v5051_v21 = vld [vmem:[#allocation2 + $0x138] sm:$0xff] }
 0x52e   : > { %3533 = vrot.lane.b32.xlu0 %v2639_v14, %s5132_s22  ;;  %v5134_v14 = vmov 0   ;;  %s4373_s22 = scalar_lea.sflag [#allocation4], %s269_s14 }
 0x52f   : > { %v3638_v48 = vpop.permute.xlu1 %3637  ;;  %5007 = vset.pattern.permute.xlu1 %v5134_v14 }
 0x530   : > { %v3943_v60 = vsel %vm3924_vm14, %v3910_v6, %v3638_v48  ;;  %v3512_v62 = vpop.permute.xlu0 %3511 }
 0x531   : > { %3663 = vrot.lane.b32.xlu1 %v2672_v24, %s5133_s8  ;;  %4898 = vmatprep.mubr.msk.f32.mxu1 %vm3966_vm15, %v3943_v60  ;;  %v3911_v9 = vsel %vm3891_vm13, %v3878_v29, %v3512_v62  ;;  %v9049_v29 = vld [vmem:[#allocation156_spill] sm:$0xff] }
 0x532   : > { %3661 = vrot.lane.b32.xlu0 %v2671_v44, %s5133_s8  ;;  %s5057_s8 = scalar_lea.vmem %s8416_s15, 256 }
 0x533   : > { %v3640_v34 = vpop.permute.xlu1 %3639  ;;  %p5058_p11 = scmp.ne.s32.totalorder %s8416_s15, %s5057_s8  ;;  %p5065_p1 = scmp.lt.s32.totalorder %s5063_s17, %s5057_s8 }
 0x534   : > { %v3944_v5 = vsel %vm3924_vm14, %v3911_v9, %v3640_v34  ;;  %v3258_v26 = vpop.permute.xlu0 %3257  ;;  %v3720_v9 = vsel %vm1624_vm2, %v5048_v31, %v9049_v29  ;;  %v9050_v34 = vld [vmem:[#allocation136_spill] sm:$0xff] }
 0x535   : > { %4899 = vmatmul.mubr.msk.f32.gmra.mrb[16].mxu1 %vm3966_vm15, %v3944_v5  ;;  %v3846_v7 = vsel %vm3825_vm11, %v3813_v58, %v3258_v26  ;;  %4355 = vperm.xlu1 %5007, %v4352_v33   ;;  %v3752_v5 = vsel %vm1690_vm4, %v3720_v9, %v9050_v34  ;;  %p5059_p12 = pnand %p5058_p11, %p5214_p5  ;;  %p5066_p2 = por %p5065_p1, %p5064_p0 }
 0x537   : > { %v3386_v55 = vpop.permute.xlu1 %3385  ;;  %p5060_p13 = pneg %p5059_p12 }
 0x538   : > { %v3260_v4 = vpop.permute.xlu0 %3259  ;;  %v3879_v17 = vsel %vm3858_vm12, %v3846_v7, %v3386_v55  ;;  %v9051_v55 = vld [vmem:[#allocation103_spill] sm:$0xff]  ;;  %v9052_v7 = vld [vmem:[#allocation26_spill] sm:$0xff] }
 0x539   : > { %v3847_v54 = vsel %vm3825_vm11, %v3814_v49, %v3260_v4  ;;  %4363 = vperm.xlu1 %5007, %v4360_v13   ;;  %v3784_v4 = vsel %vm1756_vm6, %v3752_v5, %v9051_v55  ;;  %v9055_v49 = vld [vmem:[#allocation8_spill] sm:$0xff]  ;;  %p5067_p3 = pnand %p5066_p2, %p5060_p13 }
 0x53b   : > { %v3514_v10 = vpop.permute.xlu1 %3513 }
 0x53c   : > { %v3388_v22 = vpop.permute.xlu0 %3387  ;;  %v3912_v53 = vsel %vm3891_vm13, %v3879_v17, %v3514_v10 }
 0x53d   : > { %v3880_v38 = vsel %vm3858_vm12, %v3847_v54, %v3388_v22  ;;  %v5049_v22 = vld [vmem:[#allocation2 + $0x120] sm:$0xff]  ;;  %v3722_v54 = vsel %vm1624_vm2, %v5050_v39, %v9055_v49 }
 0x53e   : > { %v3721_v17 = vsel %vm1624_vm2, %v5049_v22, %v9052_v7 }
 0x53f   : > { %v3642_v18 = vpop.permute.xlu1 %3641 }
 0x540   : > { %v3945_v16 = vsel %vm3924_vm14, %v3912_v53, %v3642_v18  ;;  %v3516_v59 = vpop.permute.xlu0 %3515  ;;  %v9053_v53 = vld [vmem:[#allocation101_spill] sm:$0xff] }
 0x541   : > { %4901 = vmatprep.mubr.msk.f32.mxu1 %vm3966_vm15, %v3945_v16  ;;  %v3913_v47 = vsel %vm3891_vm13, %v3880_v38, %v3516_v59  ;;  %v3753_v18 = vsel %vm1690_vm4, %v3721_v17, %v9053_v53  ;;  %v9054_v16 = vld [vmem:[#allocation24_spill] sm:$0xff] }
 0x542   : > { %v3785_v59 = vsel %vm1756_vm6, %v3753_v18, %v9054_v16  ;;  %v9056_v38 = vld [vmem:[#allocation100_spill] sm:$0xff] }
 0x543   : > { %v3262_v8 = vpop.permute.xlu1 %3261 }
 0x544   : > { %v3136_v30 = vpop.permute.xlu0 %3135  ;;  %v3848_v48 = vsel %vm3825_vm11, %v3815_v56, %v3262_v8  ;;  %v9059_v56 = vld [vmem:[#allocation161_spill] sm:$0xff] }
 0x545   : > { %v3816_v28 = vsel %vm1822_vm8, %v3784_v4, %v3136_v30  ;;  %v5052_v4 = vld [vmem:[#allocation2 + $0x140] sm:$0xff] }
 0x547   : > { %v3264_v52 = vpop.permute.xlu1 %3263 }
 0x548   : > { %v3644_v57 = vpop.permute.xlu0 %3643  ;;  %v3849_v0 = vsel %vm3825_vm11, %v3816_v28, %v3264_v52  ;;  %v3754_v52 = vsel %vm1690_vm4, %v3722_v54, %v9056_v38 }
 0x549   : > { %v3946_v51 = vsel %vm3924_vm14, %v3913_v47, %v3644_v57  ;;  %v9057_v57 = vld [vmem:[#allocation163_spill] sm:$0xff] }
 0x54a   : > { %4902 = vmatmul.mubr.msk.f32.gmra.mrb[18].mxu1 %vm3966_vm15, %v3946_v51  ;;  %v3786_v51 = vsel %vm1756_vm6, %v3754_v52, %v9057_v57 }
 0x54b   : > { %v3392_v15 = vpop.permute.xlu1 %3391 }
 0x54c   : > { %v3390_v50 = vpop.permute.xlu0 %3389  ;;  %v3882_v12 = vsel %vm3858_vm12, %v3849_v0, %v3392_v15  ;;  %v9062_v0 = vld [vmem:[#allocation160_spill] sm:$0xff] }
 0x54d   : > { %v3881_v44 = vsel %vm3858_vm12, %v3848_v48, %v3390_v50  ;;  %v9060_v48 = vld [vmem:[#allocation38_spill] sm:$0xff] }
 0x54f   : > { %v3138_v24 = vpop.permute.xlu1 %3137 }
 0x550   : > { %v3518_v6 = vpop.permute.xlu0 %3517  ;;  %v3817_v43 = vsel %vm1822_vm8, %v3785_v59, %v3138_v24  ;;  %v9058_v24 = vld [vmem:[#allocation76_spill] sm:$0xff] }
 0x551   : > { %v3914_v63 = vsel %vm3891_vm13, %v3881_v44, %v3518_v6  ;;  %v3723_v37 = vsel %vm1624_vm2, %v5051_v21, %v9058_v24 }
 0x552   : > { %v3755_v6 = vsel %vm1690_vm4, %v3723_v37, %v9059_v56 }
 0x553   : > { %v3646_v27 = vpop.permute.xlu1 %3645  ;;  %v3787_v44 = vsel %vm1756_vm6, %v3755_v6, %v9060_v48 }
 0x554   : > { %v3947_v60 = vsel %vm3924_vm14, %v3914_v63, %v3646_v27  ;;  %v3520_v62 = vpop.permute.xlu0 %3519 }
 0x555   : > { %4904 = vmatprep.mubr.msk.f32.mxu1 %vm3966_vm15, %v3947_v60  ;;  %v3915_v11 = vsel %vm3891_vm13, %v3882_v12, %v3520_v62 }
 0x557   : > { %v3266_v26 = vpop.permute.xlu1 %3265 }
 0x558   : > { %v3140_v32 = vpop.permute.xlu0 %3139  ;;  %v3850_v20 = vsel %vm3825_vm11, %v3817_v43, %v3266_v26  ;;  %v5053_v43 = vld [vmem:[#allocation2 + $0x150] sm:$0xff] }
 0x559   : > { %v3818_v15 = vsel %vm1822_vm8, %v3786_v51, %v3140_v32  ;;  %v9061_v32 = vld [vmem:[#allocation56_spill] sm:$0xff] }
 0x55a   : > { %v3724_v28 = vsel %vm1624_vm2, %v5052_v4, %v9061_v32  ;;  %v9072_v32 = vld [vmem:[#allocation35_spill] sm:$0xff] }
 0x55b   : > { %v3268_v40 = vpop.permute.xlu1 %3267  ;;  %v3756_v12 = vsel %vm1690_vm4, %v3724_v28, %v9062_v0 }
 0x55c   : > { %v3648_v61 = vpop.permute.xlu0 %3647  ;;  %v3851_v50 = vsel %vm3825_vm11, %v3818_v15, %v3268_v40  ;;  %v5054_v15 = vld [vmem:[#allocation2 + $0x158] sm:$0xff] }
 0x55d   : > { %v3948_v10 = vsel %vm3924_vm14, %v3915_v11, %v3648_v61  ;;  %v9063_v11 = vld [vmem:[#allocation25_spill] sm:$0xff] }
 0x55e   : > { %4905 = vmatmul.mubr.msk.f32.gmra.mrb[20].mxu1 %vm3966_vm15, %v3948_v10  ;;  %v3788_v61 = vsel %vm1756_vm6, %v3756_v12, %v9063_v11  ;;  %v9073_v12 = vld [vmem:[#allocation34_spill] sm:$0xff] }
 0x55f   : > { %v3396_v1 = vpop.permute.xlu1 %3395  ;;  %v9074_v11 = vld [vmem:[#allocation82_spill] sm:$0xff] }
 0x560   : > { %v3394_v58 = vpop.permute.xlu0 %3393  ;;  %v3884_v13 = vsel %vm3858_vm12, %v3851_v50, %v3396_v1  ;;  %v9067_v50 = vld [vmem:[#allocation134_spill] sm:$0xff] }
 0x561   : > { %v3883_v25 = vsel %vm3858_vm12, %v3850_v20, %v3394_v58 }
 0x563   : > { %v3142_v19 = vpop.permute.xlu1 %3141 }
 0x564   : > { %v3522_v35 = vpop.permute.xlu0 %3521  ;;  %v3819_v27 = vsel %vm1822_vm8, %v3787_v44, %v3142_v19 }
 0x565   : > { %v3916_v8 = vsel %vm3891_vm13, %v3883_v25, %v3522_v35  ;;  %v9064_v35 = vld [vmem:[#allocation135_spill] sm:$0xff] }
 0x566   : > { %v3725_v20 = vsel %vm1624_vm2, %v5053_v43, %v9064_v35 }
 0x567   : > { %v3650_v23 = vpop.permute.xlu1 %3649 }
 0x568   : > { %v3949_v46 = vsel %vm3924_vm14, %v3916_v8, %v3650_v23  ;;  %v3524_v30 = vpop.permute.xlu0 %3523  ;;  %v9065_v8 = vld [vmem:[#allocation21_spill] sm:$0xff] }
 0x569   : > { %4907 = vmatprep.mubr.msk.f32.mxu1 %vm3966_vm15, %v3949_v46  ;;  %v3917_v2 = vsel %vm3891_vm13, %v3884_v13, %v3524_v30  ;;  %v3757_v23 = vsel %vm1690_vm4, %v3725_v20, %v9065_v8  ;;  %v9066_v46 = vld [vmem:[#allocation68_spill] sm:$0xff]  ;;  %v3726_v13 = vsel %vm1624_vm2, %v5054_v15, %v9067_v50 }
 0x56a   : > { %v3789_v30 = vsel %vm1756_vm6, %v3757_v23, %v9066_v46 }
 0x56b   : > { %v3270_v47 = vpop.permute.xlu1 %3269 }
 0x56c   : > { %v3144_v33 = vpop.permute.xlu0 %3143  ;;  %v3852_v31 = vsel %vm3825_vm11, %v3819_v27, %v3270_v47 }
 0x56d   : > { %v3820_v1 = vsel %vm1822_vm8, %v3788_v61, %v3144_v33 }
 0x56f   : > { %v3272_v41 = vpop.permute.xlu1 %3271 }
 0x570   : > { %v3652_v36 = vpop.permute.xlu0 %3651  ;;  %v3853_v58 = vsel %vm3825_vm11, %v3820_v1, %v3272_v41  ;;  %v9068_v41 = vld [vmem:[#allocation20_spill] sm:$0xff]  ;;  %v9075_v1 = vld [vmem:[#allocation69_spill] sm:$0xff] }
 0x571   : > { %v3950_v3 = vsel %vm3924_vm14, %v3917_v2, %v3652_v36  ;;  %v3758_v2 = vsel %vm1690_vm4, %v3726_v13, %v9068_v41 }
 0x572   : > { %4908 = vmatmul.mubr.msk.f32.gmra.mrb[22].mxu1 %vm3966_vm15, %v3950_v3  ;;  %v9069_v3 = vld [vmem:[#allocation39_spill] sm:$0xff] }
 0x573   : > { %v3400_v42 = vpop.permute.xlu1 %3399 }
 0x574   : > { %v3398_v45 = vpop.permute.xlu0 %3397  ;;  %v3886_v22 = vsel %vm3858_vm12, %v3853_v58, %v3400_v42  ;;  %v3790_v42 = vsel %vm1756_vm6, %v3758_v2, %v9069_v3 }
 0x575   : > { %v3885_v9 = vsel %vm3858_vm12, %v3852_v31, %v3398_v45 }
 0x577   : > { %v3146_v63 = vpop.permute.xlu1 %3145 }
 0x578   : > { %v8331_v60 = vpop.f32.mrb[0].mxu1  ;;  %v3526_v62 = vpop.permute.xlu0 %3525  ;;  %v3821_v49 = vsel %vm1822_vm8, %v3789_v30, %v3146_v63 }
 0x579   : > { %v8334_v29 = vpop.f32.mrb[1].mxu1  ;;  %v3918_v34 = vsel %vm3891_vm13, %v3885_v9, %v3526_v62  ;;  %v5055_v9 = vld [vmem:[#allocation2 + $0x168] sm:$0xff] }
 0x57b   : > { %v3654_v5 = vpop.permute.xlu1 %3653 }
 0x57c   : > { %v3951_v26 = vsel %vm3924_vm14, %v3918_v34, %v3654_v5  ;;  %v3528_v55 = vpop.permute.xlu0 %3527  ;;  %v9070_v34 = vld [vmem:[#allocation99_spill] sm:$0xff] }
 0x57d   : > { %4910 = vmatprep.mubr.msk.f32.mxu1 %vm3966_vm15, %v3951_v26  ;;  %v3919_v17 = vsel %vm3891_vm13, %v3886_v22, %v3528_v55  ;;  %v3727_v5 = vsel %vm1624_vm2, %v5055_v9, %v9070_v34  ;;  %v5056_v26 = vld [vmem:[#allocation2 + $0x170] sm:$0xff] }
 0x57e   : > { %v9071_v55 = vld [vmem:[#allocation98_spill] sm:$0xff]  ;;  %v3759_v28 = vsel %vm1690_vm4, %v3727_v5, %v9072_v32 }
 0x57f   : > { %v3274_v40 = vpop.permute.xlu1 %3273  ;;  %v3728_v4 = vsel %vm1624_vm2, %v5056_v26, %v9071_v55  ;;  %v3791_v61 = vsel %vm1756_vm6, %v3759_v28, %v9074_v11 }
 0x580   : > { %v3148_v10 = vpop.permute.xlu0 %3147  ;;  %v3854_v38 = vsel %vm3825_vm11, %v3821_v49, %v3274_v40  ;;  %v3760_v40 = vsel %vm1690_vm4, %v3728_v4, %v9073_v12 }
 0x581   : > { %v3822_v21 = vsel %vm1822_vm8, %v3790_v42, %v3148_v10  ;;  %v3792_v58 = vsel %vm1756_vm6, %v3760_v40, %v9075_v1 }
 0x583   : > { %v3276_v7 = vpop.permute.xlu1 %3275 }
 0x584   : > { %v3656_v53 = vpop.permute.xlu0 %3655  ;;  %v3855_v24 = vsel %vm3825_vm11, %v3822_v21, %v3276_v7 }
 0x585   : > { %v3952_v18 = vsel %vm3924_vm14, %v3919_v17, %v3656_v53 }
 0x586   : > { %4911 = vmatmul.mubr.msk.f32.gmra.mrb[24].mxu1 %vm3966_vm15, %v3952_v18 }
 0x587   : > { %v3404_v16 = vpop.permute.xlu1 %3403 }
 0x588   : > { %v8352_v59 = vpop.f32.mrb[2].mxu1  ;;  %v3402_v19 = vpop.permute.xlu0 %3401  ;;  %v3888_v37 = vsel %vm3858_vm12, %v3855_v24, %v3404_v16 }
 0x589   : > { %v8356_v25 = vpop.f32.mrb[3].mxu1  ;;  %v3887_v52 = vsel %vm3858_vm12, %v3854_v38, %v3402_v19 }
 0x58b   : > { %v3150_v39 = vpop.permute.xlu1 %3149 }
 0x58c   : > { %v3530_v54 = vpop.permute.xlu0 %3529  ;;  %v3823_v22 = vsel %vm1822_vm8, %v3791_v61, %v3150_v39 }
 0x58d   : > { %v3920_v47 = vsel %vm3891_vm13, %v3887_v52, %v3530_v54 }
 0x58f   : > { %v3658_v57 = vpop.permute.xlu1 %3657 }
 0x590   : > { %v3953_v51 = vsel %vm3924_vm14, %v3920_v47, %v3658_v57  ;;  %v3532_v33 = vpop.permute.xlu0 %3531 }
 0x591   : > { %4913 = vmatprep.mubr.msk.f32.mxu1 %vm3966_vm15, %v3953_v51  ;;  %v3921_v6 = vsel %vm3891_vm13, %v3888_v37, %v3532_v33 }
 0x593   : > { %v3278_v36 = vpop.permute.xlu1 %3277 }
 0x594   : > { %v3152_v45 = vpop.permute.xlu0 %3151  ;;  %v3856_v7 = vsel %vm3825_vm11, %v3823_v22, %v3278_v36 }
 0x595   : > { %v3824_v17 = vsel %vm1822_vm8, %v3792_v58, %v3152_v45 }
 0x597   : > { %v3280_v56 = vpop.permute.xlu1 %3279 }
 0x598   : > { %v4882_v48 = vpop.f32.mrb[4].mxu1  ;;  %v3660_v44 = vpop.permute.xlu0 %3659  ;;  %v3857_v53 = vsel %vm3825_vm11, %v3824_v17, %v3280_v56 }
 0x599   : > { %v3954_v63 = vsel %vm3924_vm14, %v3921_v6, %v3660_v44  ;;  %v4159_v27 = vpop.f32.mrb[5].mxu1 }
 0x59a   : > { %4914 = vmatmul.mubr.msk.f32.gmra.mrb[26].mxu1 %vm3966_vm15, %v3954_v63 }
 0x59b   : > { %v3408_v62 = vpop.permute.xlu1 %3407 }
 0x59c   : > { %v3406_v31 = vpop.permute.xlu0 %3405  ;;  %v3890_v19 = vsel %vm3858_vm12, %v3857_v53, %v3408_v62 }
 0x59d   : > { %v3889_v18 = vsel %vm3858_vm12, %v3856_v7, %v3406_v31 }
 0x59f   : > { %v3536_v0 = vpop.permute.xlu1 %3535 }
 0x5a0   : > { %v3534_v10 = vpop.permute.xlu0 %3533  ;;  %v3923_v20 = vsel %vm3891_vm13, %v3890_v19, %v3536_v0 }
 0x5a1   : > { %v3922_v43 = vsel %vm3891_vm13, %v3889_v18, %v3534_v10 }
 0x5a3   : > { %v3664_v16 = vpop.permute.xlu1 %3663 }
 0x5a4   : > { %v3662_v35 = vpop.permute.xlu0 %3661  ;;  %v3956_v23 = vsel %vm3924_vm14, %v3923_v20, %v3664_v16 }
 0x5a5   : > { %v3955_v8 = vsel %vm3924_vm14, %v3922_v43, %v3662_v35 }
 0x5a6   : > { %4916 = vmatprep.mubr.msk.f32.mxu1 %vm3966_vm15, %v3955_v8 }
 0x5a7   : > { %4917 = vmatmul.mubr.msk.f32.gmra.mrb[28].mxu1 %vm3966_vm15, %v3956_v23 }
 0x5a8   : > { %v4885_v46 = vpop.f32.mrb[6].mxu1 }
 0x5a9   : > { %v4169_v30 = vpop.f32.mrb[7].mxu1 }
 0x5b4   : > { %v4356_v21 = vpop.permute.xlu1 %4355 }
 0x5b8   : > { %v4888_v39 = vpop.f32.mrb[8].mxu1  ;;  %v4364_v37 = vpop.permute.xlu1 %4363 }
 0x5b9   : > { %v4179_v49 = vpop.f32.mrb[9].mxu1 }
 0x5c8   : > { %v4891_v54 = vpop.f32.mrb[10].mxu1 }
 0x5c9   : > { %v4189_v38 = vpop.f32.mrb[11].mxu1 }
 0x5dd   : > { %v4894_v52 = vpop.f32.mrb[12].mxu1 }
 0x5de   : > { %v4199_v47 = vpop.f32.mrb[13].mxu1 }
 0x5f8   : > { %v4897_v57 = vpop.f32.mrb[14].mxu1 }
 0x5f9   : > { %v4873_v51 = vpop.f32.mrb[32].mxu0  ;;  %v4209_v33 = vpop.f32.mrb[15].mxu1 }
 0x5fa   : > { %4320 = vxpose.xlu1.b32.start [1/16] (narrow) %v4209_v33, 8  ;;  %v4129_v15 = vpop.f32.mrb[33].mxu0 }
 0x5fb   : > { %4288 = vxpose.xlu0.b32.start [1/16] (narrow) %v4129_v15, 8 }
 0x5fe   : > { %4321 = vxpose.xlu1.b32.cont [2/16] (narrow) %v4897_v57, 8 }
 0x5ff   : > { %4289 = vxpose.xlu0.b32.cont [2/16] (narrow) %v4873_v51, 8 }
 0x603   : > { %4290 = vxpose.xlu0.b32.cont [3/16] (narrow) %v8334_v29, 8 }
 0x607   : > { %4291 = vxpose.xlu0.b32.cont [4/16] (narrow) %v8331_v60, 8 }
 0x608   : > { %v4900_v50 = vpop.f32.mrb[16].mxu1 }
 0x609   : > { %v4219_v13 = vpop.f32.mrb[17].mxu1 }
 0x60a   : > { %4322 = vxpose.xlu1.b32.cont [3/16] (narrow) %v4219_v13, 8 }
 0x60b   : > { %4292 = vxpose.xlu0.b32.cont [5/16] (narrow) %v8356_v25, 8 }
 0x60e   : > { %4323 = vxpose.xlu1.b32.cont [4/16] (narrow) %v4900_v50, 8 }
 0x60f   : > { %4293 = vxpose.xlu0.b32.cont [6/16] (narrow) %v8352_v59, 8 }
 0x613   : > { %4294 = vxpose.xlu0.b32.cont [7/16] (narrow) %v4159_v27, 8 }
 0x617   : > { %4295 = vxpose.xlu0.b32.cont [8/16] (narrow) %v4882_v48, 8 }
 0x61b   : > { %4296 = vxpose.xlu0.b32.cont [9/16] (narrow) %v4169_v30, 8 }
 0x61d   : > { %v4903_v41 = vpop.f32.mrb[18].mxu1 }
 0x61e   : > { %v4229_v2 = vpop.f32.mrb[19].mxu1 }
 0x61f   : > { %4297 = vxpose.xlu0.b32.cont [10/16] (narrow) %v4885_v46, 8  ;;  %4324 = vxpose.xlu1.b32.cont [5/16] (narrow) %v4229_v2, 8 }
 0x623   : > { %4298 = vxpose.xlu0.b32.cont [11/16] (narrow) %v4179_v49, 8  ;;  %4325 = vxpose.xlu1.b32.cont [6/16] (narrow) %v4903_v41, 8 }
 0x627   : > { %4299 = vxpose.xlu0.b32.cont [12/16] (narrow) %v4888_v39, 8 }
 0x62b   : > { %4300 = vxpose.xlu0.b32.cont [13/16] (narrow) %v4189_v38, 8 }
 0x62f   : > { %4301 = vxpose.xlu0.b32.cont [14/16] (narrow) %v4891_v54, 8 }
 0x631   : > { %v4906_v60 = vpop.f32.mrb[20].mxu1 }
 0x632   : > { %v4239_v29 = vpop.f32.mrb[21].mxu1 }
 0x633   : > { %4302 = vxpose.xlu0.b32.cont [15/16] (narrow) %v4199_v47, 8  ;;  %4326 = vxpose.xlu1.b32.cont [7/16] (narrow) %v4239_v29, 8 }
 0x637   : > { %4303 = vxpose.xlu0.b32.end [16/16] (narrow) %v4894_v52, 8  ;;  %4327 = vxpose.xlu1.b32.cont [8/16] (narrow) %v4906_v60, 8 }
 0x645   : > { %v4909_v59 = vpop.f32.mrb[22].mxu1 }
 0x646   : > { %v4249_v25 = vpop.f32.mrb[23].mxu1 }
 0x647   : > { %4328 = vxpose.xlu1.b32.cont [9/16] (narrow) %v4249_v25, 8 }
 0x64b   : > { %4329 = vxpose.xlu1.b32.cont [10/16] (narrow) %v4909_v59, 8 }
 0x659   : > { %v4912_v36 = vpop.f32.mrb[24].mxu1 }
 0x65a   : > { %v4259_v3 = vpop.f32.mrb[25].mxu1 }
 0x65b   : > { %4330 = vxpose.xlu1.b32.cont [11/16] (narrow) %v4259_v3, 8 }
 0x65f   : > { %4331 = vxpose.xlu1.b32.cont [12/16] (narrow) %v4912_v36, 8 }
 0x660   : > { %5008 = vset.pattern.permute.xlu0 %v5134_v14 }
 0x66d   : > { %v4915_v42 = vpop.f32.mrb[26].mxu1 }
 0x66e   : > { %v4269_v45 = vpop.f32.mrb[27].mxu1 }
 0x66f   : > { %4332 = vxpose.xlu1.b32.cont [13/16] (narrow) %v4269_v45, 8 }
 0x673   : > { %4333 = vxpose.xlu1.b32.cont [14/16] (narrow) %v4915_v42, 8 }
 0x67a   : > { %v4918_v24 = vpop.f32.mrb[28].mxu1 }
 0x67b   : > { %v4279_v56 = vpop.f32.mrb[29].mxu1  ;;  %v4304_v6 = vpop.trf.xlu0 }
 0x67c   : > { %4334 = vxpose.xlu1.b32.cont [15/16] (narrow) %v4279_v56, 8  ;;  %v4358_v48 = vmul.f32 %v4356_v21, %v4304_v6 }
 0x67e   : > { %v4366_v44 = vadd.f32 %v4364_v37, %v4358_v48 }
 0x680   : > { %4335 = vxpose.xlu1.b32.end [16/16] (narrow) %v4918_v24, 8  ;;  %v4368_v63 = vmax.f32 %v4366_v44, 0.0 }
 0x682   : > { %4370 = vst [vmem:[%s271_s21] sm:$0xff] %v4368_v63 }
 0x6c4   : > { %v4336_v14 = vpop.trf.xlu1 }
 0x6c5   : > { %v4359_v27 = vmul.f32 %v4356_v21, %v4336_v14 }
 0x6c7   : > { %v4367_v62 = vadd.f32 %v4364_v37, %v4359_v27 }
 0x6c9   : > { %v4369_v31 = vmax.f32 %v4367_v62, 0.0 }
 0x6cb   : > { %4371 = vst [vmem:[%s271_s21 + $0x8] sm:$0xff] %v4369_v31 }
 0x6cc   : > { %5070 = shalt.err (!%p5067_p3)
}
 0x6cd   : > { %s5071_s29 = scalar_lea.hbm %s8414_s20, 256  ;;  %s5075_s19 = scalar_lea.hbm %s8463_s7, 512 }
 0x6ce   : > { %p5072_p4 = scmp.ne.s32.totalorder %s8414_s20, %s5071_s29  ;;  %p5076_p9 = scmp.lt.u32.totalorder %s8414_s20, %s8463_s7 }
 0x6cf   : > { %p5077_p10 = scmp.lt.u32.totalorder %s5075_s19, %s5071_s29  ;;  %p5079_p12 = scmp.lt.u32.totalorder %s5071_s29, %s8414_s20 }
 0x6d0   : > { %p5073_p7 = pnand %p5072_p4, %p5214_p5 }
 0x6d1   : > { %p5078_p11 = por %p5077_p10, %p5076_p9 }
 0x6d2   : > { %p5074_p8 = pneg %p5073_p7 }
 0x6d3   : > { %p5080_p13 = por %p5079_p12, %p5078_p11 }
 0x6d5   : > { %p5081_p0 = pnand %p5080_p13, %p5074_p8 }
 0x6d7   : > { %5084 = shalt.err (!%p5081_p0)
}
 0x6d8   : > { %4954 = dma.vmem_to_hbm [thread:$0]  (%p5214_p5), %s8416_s15, 256, %s8414_s20, %s4373_s22  }
 0x6d9 PF: > { %p4960_p1 = scmp.ge.s32.totalorder %s5119_s27, 2  ;;  %s4399_s16 = sand.u32 1, %s5107_s24  }
 0x6da   : > { %s4400_s18 = scalar_lea.sflag [#allocation4], %s4399_s16 }
 0x6db   : > { %p4957_p2 = pnand %p4960_p1, %p5218_p6 }
 0x6dd   : > { %5102 = dma.done.wait (!%p4957_p2), %s4400_s18, 256  }
 0x6de   : > { %5104 = vsyncadd (!%p4957_p2), %s4400_s18, 4294967040  ;;  %p17_p3 = scmp.ge.s32.totalorder %s5201_s30, 4   ;;  %s9076_s24 = smov %s5111_s25 }
 0x6df   : > { %s9077_s25 = smov %s5115_s26  ;;  %s9078_s26 = smov %s5212_s10 }
 0x6e0   : > { %s9079_s27 = smov %s5201_s30  ;;  %19 = sbr.rel (!%p17_p3) target bundleno = 3 (0x3), region = 87 }
 0x6e7   :  { %4405 = vsyncpa [#allocation4], 1 }
 0x6e8   :  { %4407 = vsyncpa [#allocation4 + $0x1], 1 }

</bundles_post_ra>
